<compile_context>
chip_gen: v7x
topology: tpu7x:2x2x1
jax: 0.10.0
libtpu: 0.0.40
codegen_flags: <defaults>
</compile_context>

<pallas_src>
import jax
import jax.numpy as jnp
from jax import lax
from jax.experimental import pallas as pl
from jax.experimental.pallas import tpu as pltpu


def _silu(x):
    return x * (1.0 / (1.0 + jnp.exp(-x)))


def ghost_bottleneck_kernel(
    x_ref,                          # (1, C, H+8, W)  H-zero-padded input (VMEM)
    w11_ref, s11_ref, b11_ref,      # SMEM: (C, ch1), (ch1,), (ch1,)
    dw12_ref, s12_ref, b12_ref,     # SMEM: (ch1, 25), (ch1,), (ch1,)
    w21_ref, s21_ref, b21_ref,      # SMEM: (2*ch1, c2h), (c2h,), (c2h,)
    dw22_ref, s22_ref, b22_ref,     # SMEM: (c2h, 25), (c2h,), (c2h,)
    out_ref,                        # (1, C, TH, W)
    ybuf,                           # VMEM scratch (ch1, TH+8, W+4)
    pbuf,                           # VMEM scratch (c2h, TH+4, W+4)
):
    C = x_ref.shape[1]
    H = x_ref.shape[2] - 8
    W = x_ref.shape[3]
    TH = out_ref.shape[2]
    ch1 = ybuf.shape[0]
    c2h = pbuf.shape[0]
    E1 = TH + 8                     # y rows needed (4-row halo: two 5x5 convs)
    E2 = TH + 4                     # z / p rows needed (2-row halo: last conv)

    hb = pl.program_id(1)
    h0 = hb * TH                    # first output row of this band
    if TH % 8 == 0:
        h0 = pl.multiple_of(h0, 8)

    # Image-row validity masks: the DW convs need *exact zeros* outside the
    # image (the fused BN bias makes conv-of-zero-input nonzero, so the
    # intermediates must be masked, not just computed on padded x).
    r1 = h0 - 4 + lax.broadcasted_iota(jnp.int32, (E1, 1), 0)
    m1 = jnp.logical_and(r1 >= 0, r1 < H)
    r2 = h0 - 2 + lax.broadcasted_iota(jnp.int32, (E2, 1), 0)
    m2 = jnp.logical_and(r2 >= 0, r2 < H)

    # Input rows for the extended band, in padded coordinates (always in-bounds).
    xb = [x_ref[0, ci, pl.ds(h0, E1), :] for ci in range(C)]

    # ---- GhostConv #1: 1x1 conv + BN + SiLU, then depthwise 5x5 + BN + SiLU.
    # Channels are tiny -> unrolled scalar-broadcast FMAs on the VPU.
    y_mid = []
    z = []
    for co in range(ch1):
        acc = xb[0] * w11_ref[0, co]
        for ci in range(1, C):
            acc = acc + xb[ci] * w11_ref[ci, co]
        y = _silu(acc * s11_ref[co] + b11_ref[co])

        # Write straight into the interior of the padded scratch; only the
        # 2-wide W halo strips need zeroing (they are never written).
        ybuf[co, :, 0:2] = jnp.zeros((E1, 2), jnp.float32)
        ybuf[co, :, W + 2:W + 4] = jnp.zeros((E1, 2), jnp.float32)
        ybuf[co, :, 2:2 + W] = jnp.where(m1, y, 0.0)

        plane = ybuf[co]                           # one VMEM load per channel;
        dacc = jnp.zeros((E2, W), jnp.float32)     # the 25 taps below are
        for kh in range(5):                        # register-level slices.
            for kw in range(5):
                dacc = dacc + plane[kh:kh + E2, kw:kw + W] * dw12_ref[co, kh * 5 + kw]
        z.append(_silu(dacc * s12_ref[co] + b12_ref[co]))
        y_mid.append(plane[2:2 + E2, 2:2 + W])

    # ---- GhostConv #2: 1x1 conv over concat([y, z]) + BN (no act), then
    # depthwise 5x5 + BN (no act); add the Identity shortcut; store the band.
    for co in range(c2h):
        acc = y_mid[0] * w21_ref[0, co]
        for c in range(1, ch1):
            acc = acc + y_mid[c] * w21_ref[c, co]
        for c in range(ch1):
            acc = acc + z[c] * w21_ref[ch1 + c, co]
        p = acc * s21_ref[co] + b21_ref[co]

        pbuf[co, :, 0:2] = jnp.zeros((E2, 2), jnp.float32)
        pbuf[co, :, W + 2:W + 4] = jnp.zeros((E2, 2), jnp.float32)
        pbuf[co, :, 2:2 + W] = jnp.where(m2, p, 0.0)

        pplane = pbuf[co]
        qacc = jnp.zeros((TH, W), jnp.float32)
        for kh in range(5):
            for kw in range(5):
                qacc = qacc + pplane[kh:kh + TH, kw:kw + W] * dw22_ref[co, kh * 5 + kw]
        q = qacc * s22_ref[co] + b22_ref[co]
        p_band = pplane[2:2 + TH, 2:2 + W]

        # Residual (shortcut is Identity for s == 1); x is only read here, not
        # kept live through the body.
        out_ref[0, co, :, :] = (
            p_band + x_ref[0, co, pl.ds(h0 + 4, TH), :]).astype(out_ref.dtype)
        out_ref[0, c2h + co, :, :] = (
            q + x_ref[0, c2h + co, pl.ds(h0 + 4, TH), :]).astype(out_ref.dtype)


def _pick_band_rows(H, cap=64):
    """Largest output-row band <= cap that tiles H and satisfies the (8,128)
    block rule (multiple of 8, or the full height)."""
    if H <= cap:
        return H
    best = None
    for th in range(8, cap + 1, 8):
        if H % th == 0:
            best = th
    return best if best is not None else H


def ghost_bottleneck(x, params, band_rows=None):
    """GhostBottleneck(c1, c2, k=3, s=1) forward.  x: (N, C, H, W) NCHW, c1 == c2."""
    N, C, H, W = x.shape
    ch1 = params["w11"].shape[1]
    c2h = params["w21"].shape[1]
    assert 2 * c2h == C, "s=1 GhostBottleneck residual requires c1 == c2"

    TH = band_rows if band_rows is not None else _pick_band_rows(H)
    assert H % TH == 0 and (TH % 8 == 0 or TH == H)
    nbands = H // TH

    # Zero-pad H by the 4-row halo once in HBM so every in-kernel halo read is
    # in bounds; exact conv zero-padding is applied in-kernel by masking.
    xp = jnp.pad(x, ((0, 0), (0, 0), (4, 4), (0, 0)))

    smem = pl.BlockSpec(memory_space=pltpu.MemorySpace.SMEM)
    kernel = pl.pallas_call(
        ghost_bottleneck_kernel,
        out_shape=jax.ShapeDtypeStruct((N, C, H, W), x.dtype),
        grid=(N, nbands),
        in_specs=[pl.BlockSpec((1, C, H + 8, W), lambda n, hb: (n, 0, 0, 0))]
                 + [smem] * 12,
        out_specs=pl.BlockSpec((1, C, TH, W), lambda n, hb: (n, 0, hb, 0)),
        scratch_shapes=[
            pltpu.VMEM((ch1, TH + 8, W + 4), jnp.float32),
            pltpu.VMEM((c2h, TH + 4, W + 4), jnp.float32),
        ],
        compiler_params=pltpu.CompilerParams(
            dimension_semantics=("parallel", "parallel"),
            vmem_limit_bytes=32 * 1024 * 1024,
        ),
    )
    return kernel(
        xp,
        params["w11"], params["s11"], params["b11"],
        params["dw12"], params["s12"], params["b12"],
        params["w21"], params["s21"], params["b21"],
        params["dw22"], params["s22"], params["b22"],
    )


def make_params(key, c1, c2):
    """Deterministic synthetic parameters matching GhostBottleneck(c1, c2, k=3, s=1)."""
    assert c1 == c2, "s=1 GhostBottleneck residual add requires c1 == c2"
    c_ = c2 // 2          # GhostBottleneck hidden width
    ch1 = c_ // 2         # GhostConv #1 primary channels
    c2h = c2 // 2         # GhostConv #2 primary channels
    ks = jax.random.split(key, 8)

    def bn(k, c):
        kg, kb, km, kv = jax.random.split(k, 4)
        gamma = 1.0 + 0.1 * jax.random.normal(kg, (c,), jnp.float32)
        beta = 0.1 * jax.random.normal(kb, (c,), jnp.float32)
        mean = 0.1 * jax.random.normal(km, (c,), jnp.float32)
        var = 0.5 + jnp.abs(jax.random.normal(kv, (c,), jnp.float32))
        scale = gamma / jnp.sqrt(var + 1e-5)        # fused eval-mode BatchNorm2d
        bias = beta - mean * scale
        return scale, bias

    w11 = 0.3 * jax.random.normal(ks[0], (c1, ch1), jnp.float32)
    s11, b11 = bn(ks[1], ch1)
    dw12 = 0.3 * jax.random.normal(ks[2], (ch1, 25), jnp.float32)
    s12, b12 = bn(ks[3], ch1)
    w21 = 0.3 * jax.random.normal(ks[4], (c_, c2h), jnp.float32)
    s21, b21 = bn(ks[5], c2h)
    dw22 = 0.3 * jax.random.normal(ks[6], (c2h, 25), jnp.float32)
    s22, b22 = bn(ks[7], c2h)
    return dict(w11=w11, s11=s11, b11=b11, dw12=dw12, s12=s12, b12=b12,
                w21=w21, s21=s21, b21=b21, dw22=dw22, s22=s22, b22=b22)


def reference(x, p):
    """Pure-JAX NCHW reference (mirrors the PyTorch forward), for validation."""
    def conv1x1(v, w, s, b):
        y = jnp.einsum("nchw,cd->ndhw", v, w)
        return y * s[None, :, None, None] + b[None, :, None, None]

    def dw5(v, w, s, b):
        C = v.shape[1]
        y = lax.conv_general_dilated(
            v, w.reshape(C, 1, 5, 5), (1, 1), ((2, 2), (2, 2)),
            dimension_numbers=("NCHW", "OIHW", "NCHW"), feature_group_count=C)
        return y * s[None, :, None, None] + b[None, :, None, None]

    y1 = jax.nn.silu(conv1x1(x, p["w11"], p["s11"], p["b11"]))
    z = jax.nn.silu(dw5(y1, p["dw12"], p["s12"], p["b12"]))
    pp = conv1x1(jnp.concatenate([y1, z], 1), p["w21"], p["s21"], p["b21"])
    qq = dw5(pp, p["dw22"], p["s22"], p["b22"])
    return jnp.concatenate([pp, qq], 1) + x


if __name__ == "__main__":
    key = jax.random.PRNGKey(0)
    kx, kp = jax.random.split(key)

    N, C, H, W = 2, 8, 16, 16          # NCHW, c1 == c2 == 8
    x = jax.random.normal(kx, (N, C, H, W), jnp.float32)
    params = make_params(kp, C, C)

    # band_rows=8 -> grid (2 batches, 2 H-bands): exercises the halo logic.
    out = jax.block_until_ready(ghost_bottleneck(x, params, band_rows=8))
    ref = reference(x, params)

    assert out.shape == (N, C, H, W), out.shape
    max_err = float(jnp.max(jnp.abs(out - ref)))
    assert jnp.allclose(out, ref, atol=1e-4, rtol=1e-4), f"max_err={max_err}"
    print("KERNEL_OK")
</pallas_src>

<mosaic_0001>
module attributes {stable_mosaic.version = 11 : i64} {
  func.func @ghost_bottleneck_kernel(%arg0: i32, %arg1: i32, %arg2: memref<1x8x24x16xf32, #tpu.memory_space<vmem>>, %arg3: memref<8x2xf32, #tpu.memory_space<smem>>, %arg4: memref<2xf32, #tpu.memory_space<smem>>, %arg5: memref<2xf32, #tpu.memory_space<smem>>, %arg6: memref<2x25xf32, #tpu.memory_space<smem>>, %arg7: memref<2xf32, #tpu.memory_space<smem>>, %arg8: memref<2xf32, #tpu.memory_space<smem>>, %arg9: memref<4x4xf32, #tpu.memory_space<smem>>, %arg10: memref<4xf32, #tpu.memory_space<smem>>, %arg11: memref<4xf32, #tpu.memory_space<smem>>, %arg12: memref<4x25xf32, #tpu.memory_space<smem>>, %arg13: memref<4xf32, #tpu.memory_space<smem>>, %arg14: memref<4xf32, #tpu.memory_space<smem>>, %arg15: memref<1x8x8x16xf32, #tpu.memory_space<vmem>>, %arg16: memref<2x16x20xf32, #tpu.memory_space<vmem>>, %arg17: memref<4x12x20xf32, #tpu.memory_space<vmem>>) attributes {dimension_semantics = [#tpu.dimension_semantics<parallel>, #tpu.dimension_semantics<parallel>], iteration_bounds = array<i64: 2, 2>, scalar_prefetch = 0 : i64, scratch_operands = 2 : i64, tpu.core_type = #tpu.core_type<tc>, window_params = [{transform_indices = @transform_0, window_bounds = array<i64: 1, 8, 24, 16>}, {transform_indices = @transform_1, window_bounds = array<i64: 8, 2>}, {transform_indices = @transform_2, window_bounds = array<i64: 2>}, {transform_indices = @transform_3, window_bounds = array<i64: 2>}, {transform_indices = @transform_4, window_bounds = array<i64: 2, 25>}, {transform_indices = @transform_5, window_bounds = array<i64: 2>}, {transform_indices = @transform_6, window_bounds = array<i64: 2>}, {transform_indices = @transform_7, window_bounds = array<i64: 4, 4>}, {transform_indices = @transform_8, window_bounds = array<i64: 4>}, {transform_indices = @transform_9, window_bounds = array<i64: 4>}, {transform_indices = @transform_10, window_bounds = array<i64: 4, 25>}, {transform_indices = @transform_11, window_bounds = array<i64: 4>}, {transform_indices = @transform_12, window_bounds = array<i64: 4>}, {transform_indices = @transform_13, window_bounds = array<i64: 1, 8, 8, 16>}]} {
    %c8_i32 = arith.constant 8 : i32
    %0 = arith.muli %arg1, %c8_i32 : i32
    %1 = tpu.assume_multiple %0, 8 : i32
    %c4_i32 = arith.constant 4 : i32
    %2 = arith.subi %1, %c4_i32 : i32
    %3 = tpu.iota {dimensions = array<i32: 0>} : vector<16x1xi32>
    %4 = vector.broadcast %2 : i32 to vector<16x1xi32>
    %5 = arith.addi %4, %3 : vector<16x1xi32>
    %c0_i32 = arith.constant 0 : i32
    %6 = vector.broadcast %c0_i32 : i32 to vector<16x1xi32>
    %7 = arith.cmpi sge, %5, %6 : vector<16x1xi32>
    %c16_i32 = arith.constant 16 : i32
    %8 = vector.broadcast %c16_i32 : i32 to vector<16x1xi32>
    %9 = arith.cmpi slt, %5, %8 : vector<16x1xi32>
    %10 = arith.andi %7, %9 : vector<16x1xi1>
    %c2_i32 = arith.constant 2 : i32
    %11 = arith.subi %1, %c2_i32 : i32
    %12 = tpu.iota {dimensions = array<i32: 0>} : vector<12x1xi32>
    %13 = vector.broadcast %11 : i32 to vector<12x1xi32>
    %14 = arith.addi %13, %12 : vector<12x1xi32>
    %c0_i32_0 = arith.constant 0 : i32
    %15 = vector.broadcast %c0_i32_0 : i32 to vector<12x1xi32>
    %16 = arith.cmpi sge, %14, %15 : vector<12x1xi32>
    %c16_i32_1 = arith.constant 16 : i32
    %17 = vector.broadcast %c16_i32_1 : i32 to vector<12x1xi32>
    %18 = arith.cmpi slt, %14, %17 : vector<12x1xi32>
    %19 = arith.andi %16, %18 : vector<12x1xi1>
    %c0 = arith.constant 0 : index
    %c0_2 = arith.constant 0 : index
    %20 = arith.index_cast %1 : i32 to index
    %c0_3 = arith.constant 0 : index
    %21 = vector.load %arg2[%c0, %c0_2, %20, %c0_3] : memref<1x8x24x16xf32, #tpu.memory_space<vmem>>, vector<1x1x16x16xf32>
    %22 = vector.shape_cast %21 : vector<1x1x16x16xf32> to vector<16x16xf32>
    %c0_4 = arith.constant 0 : index
    %c1 = arith.constant 1 : index
    %23 = arith.index_cast %1 : i32 to index
    %c0_5 = arith.constant 0 : index
    %24 = vector.load %arg2[%c0_4, %c1, %23, %c0_5] : memref<1x8x24x16xf32, #tpu.memory_space<vmem>>, vector<1x1x16x16xf32>
    %25 = vector.shape_cast %24 : vector<1x1x16x16xf32> to vector<16x16xf32>
    %c0_6 = arith.constant 0 : index
    %c2 = arith.constant 2 : index
    %26 = arith.index_cast %1 : i32 to index
    %c0_7 = arith.constant 0 : index
    %27 = vector.load %arg2[%c0_6, %c2, %26, %c0_7] : memref<1x8x24x16xf32, #tpu.memory_space<vmem>>, vector<1x1x16x16xf32>
    %28 = vector.shape_cast %27 : vector<1x1x16x16xf32> to vector<16x16xf32>
    %c0_8 = arith.constant 0 : index
    %c3 = arith.constant 3 : index
    %29 = arith.index_cast %1 : i32 to index
    %c0_9 = arith.constant 0 : index
    %30 = vector.load %arg2[%c0_8, %c3, %29, %c0_9] : memref<1x8x24x16xf32, #tpu.memory_space<vmem>>, vector<1x1x16x16xf32>
    %31 = vector.shape_cast %30 : vector<1x1x16x16xf32> to vector<16x16xf32>
    %c0_10 = arith.constant 0 : index
    %c4 = arith.constant 4 : index
    %32 = arith.index_cast %1 : i32 to index
    %c0_11 = arith.constant 0 : index
    %33 = vector.load %arg2[%c0_10, %c4, %32, %c0_11] : memref<1x8x24x16xf32, #tpu.memory_space<vmem>>, vector<1x1x16x16xf32>
    %34 = vector.shape_cast %33 : vector<1x1x16x16xf32> to vector<16x16xf32>
    %c0_12 = arith.constant 0 : index
    %c5 = arith.constant 5 : index
    %35 = arith.index_cast %1 : i32 to index
    %c0_13 = arith.constant 0 : index
    %36 = vector.load %arg2[%c0_12, %c5, %35, %c0_13] : memref<1x8x24x16xf32, #tpu.memory_space<vmem>>, vector<1x1x16x16xf32>
    %37 = vector.shape_cast %36 : vector<1x1x16x16xf32> to vector<16x16xf32>
    %c0_14 = arith.constant 0 : index
    %c6 = arith.constant 6 : index
    %38 = arith.index_cast %1 : i32 to index
    %c0_15 = arith.constant 0 : index
    %39 = vector.load %arg2[%c0_14, %c6, %38, %c0_15] : memref<1x8x24x16xf32, #tpu.memory_space<vmem>>, vector<1x1x16x16xf32>
    %40 = vector.shape_cast %39 : vector<1x1x16x16xf32> to vector<16x16xf32>
    %c0_16 = arith.constant 0 : index
    %c7 = arith.constant 7 : index
    %41 = arith.index_cast %1 : i32 to index
    %c0_17 = arith.constant 0 : index
    %42 = vector.load %arg2[%c0_16, %c7, %41, %c0_17] : memref<1x8x24x16xf32, #tpu.memory_space<vmem>>, vector<1x1x16x16xf32>
    %43 = vector.shape_cast %42 : vector<1x1x16x16xf32> to vector<16x16xf32>
    %c0_18 = arith.constant 0 : index
    %c0_19 = arith.constant 0 : index
    %44 = memref.load %arg3[%c0_18, %c0_19] : memref<8x2xf32, #tpu.memory_space<smem>>
    %45 = vector.broadcast %44 : f32 to vector<16x16xf32>
    %46 = arith.mulf %22, %45 : vector<16x16xf32>
    %c1_20 = arith.constant 1 : index
    %c0_21 = arith.constant 0 : index
    %47 = memref.load %arg3[%c1_20, %c0_21] : memref<8x2xf32, #tpu.memory_space<smem>>
    %48 = vector.broadcast %47 : f32 to vector<16x16xf32>
    %49 = arith.mulf %25, %48 : vector<16x16xf32>
    %50 = arith.addf %46, %49 : vector<16x16xf32>
    %c2_22 = arith.constant 2 : index
    %c0_23 = arith.constant 0 : index
    %51 = memref.load %arg3[%c2_22, %c0_23] : memref<8x2xf32, #tpu.memory_space<smem>>
    %52 = vector.broadcast %51 : f32 to vector<16x16xf32>
    %53 = arith.mulf %28, %52 : vector<16x16xf32>
    %54 = arith.addf %50, %53 : vector<16x16xf32>
    %c3_24 = arith.constant 3 : index
    %c0_25 = arith.constant 0 : index
    %55 = memref.load %arg3[%c3_24, %c0_25] : memref<8x2xf32, #tpu.memory_space<smem>>
    %56 = vector.broadcast %55 : f32 to vector<16x16xf32>
    %57 = arith.mulf %31, %56 : vector<16x16xf32>
    %58 = arith.addf %54, %57 : vector<16x16xf32>
    %c4_26 = arith.constant 4 : index
    %c0_27 = arith.constant 0 : index
    %59 = memref.load %arg3[%c4_26, %c0_27] : memref<8x2xf32, #tpu.memory_space<smem>>
    %60 = vector.broadcast %59 : f32 to vector<16x16xf32>
    %61 = arith.mulf %34, %60 : vector<16x16xf32>
    %62 = arith.addf %58, %61 : vector<16x16xf32>
    %c5_28 = arith.constant 5 : index
    %c0_29 = arith.constant 0 : index
    %63 = memref.load %arg3[%c5_28, %c0_29] : memref<8x2xf32, #tpu.memory_space<smem>>
    %64 = vector.broadcast %63 : f32 to vector<16x16xf32>
    %65 = arith.mulf %37, %64 : vector<16x16xf32>
    %66 = arith.addf %62, %65 : vector<16x16xf32>
    %c6_30 = arith.constant 6 : index
    %c0_31 = arith.constant 0 : index
    %67 = memref.load %arg3[%c6_30, %c0_31] : memref<8x2xf32, #tpu.memory_space<smem>>
    %68 = vector.broadcast %67 : f32 to vector<16x16xf32>
    %69 = arith.mulf %40, %68 : vector<16x16xf32>
    %70 = arith.addf %66, %69 : vector<16x16xf32>
    %c7_32 = arith.constant 7 : index
    %c0_33 = arith.constant 0 : index
    %71 = memref.load %arg3[%c7_32, %c0_33] : memref<8x2xf32, #tpu.memory_space<smem>>
    %72 = vector.broadcast %71 : f32 to vector<16x16xf32>
    %73 = arith.mulf %43, %72 : vector<16x16xf32>
    %74 = arith.addf %70, %73 : vector<16x16xf32>
    %c0_34 = arith.constant 0 : index
    %75 = memref.load %arg4[%c0_34] : memref<2xf32, #tpu.memory_space<smem>>
    %76 = vector.broadcast %75 : f32 to vector<16x16xf32>
    %77 = arith.mulf %74, %76 : vector<16x16xf32>
    %c0_35 = arith.constant 0 : index
    %78 = memref.load %arg5[%c0_35] : memref<2xf32, #tpu.memory_space<smem>>
    %79 = vector.broadcast %78 : f32 to vector<16x16xf32>
    %80 = arith.addf %77, %79 : vector<16x16xf32>
    %cst = arith.constant 0.000000e+00 : f32
    %81 = vector.broadcast %cst : f32 to vector<16x16xf32>
    %82 = arith.subf %81, %80 : vector<16x16xf32>
    %83 = math.exp %82 : vector<16x16xf32>
    %cst_36 = arith.constant 1.000000e+00 : f32
    %84 = vector.broadcast %cst_36 : f32 to vector<16x16xf32>
    %85 = arith.addf %84, %83 : vector<16x16xf32>
    %cst_37 = arith.constant 1.000000e+00 : f32
    %86 = vector.broadcast %cst_37 : f32 to vector<16x16xf32>
    %87 = arith.divf %86, %85 : vector<16x16xf32>
    %88 = arith.mulf %80, %87 : vector<16x16xf32>
    %cst_38 = arith.constant 0.000000e+00 : f32
    %89 = vector.broadcast %cst_38 : f32 to vector<16x2xf32>
    %c0_39 = arith.constant 0 : index
    %c0_40 = arith.constant 0 : index
    %c0_41 = arith.constant 0 : index
    %90 = vector.load %arg16[%c0_39, %c0_40, %c0_41] : memref<2x16x20xf32, #tpu.memory_space<vmem>>, vector<1x16x2xf32>
    %91 = vector.shape_cast %90 : vector<1x16x2xf32> to vector<16x2xf32>
    %92 = vector.shape_cast %89 : vector<16x2xf32> to vector<1x16x2xf32>
    tpu.vector_store %arg16[%c0_39, %c0_40, %c0_41], %92 {strides = array<i32>} : memref<2x16x20xf32, #tpu.memory_space<vmem>>, vector<1x16x2xf32>,
    %cst_42 = arith.constant 0.000000e+00 : f32
    %93 = vector.broadcast %cst_42 : f32 to vector<16x2xf32>
    %c0_43 = arith.constant 0 : index
    %c0_44 = arith.constant 0 : index
    %c18 = arith.constant 18 : index
    %94 = vector.load %arg16[%c0_43, %c0_44, %c18] : memref<2x16x20xf32, #tpu.memory_space<vmem>>, vector<1x16x2xf32>
    %95 = vector.shape_cast %94 : vector<1x16x2xf32> to vector<16x2xf32>
    %96 = vector.shape_cast %93 : vector<16x2xf32> to vector<1x16x2xf32>
    tpu.vector_store %arg16[%c0_43, %c0_44, %c18], %96 {strides = array<i32>} : memref<2x16x20xf32, #tpu.memory_space<vmem>>, vector<1x16x2xf32>,
    %cst_45 = arith.constant 0.000000e+00 : f32
    %97 = vector.shape_cast %10 : vector<16x1xi1> to vector<16x1xi1>
    %98 = vector.broadcast %97 : vector<16x1xi1> to vector<16x16xi1>
    %99 = vector.broadcast %cst_45 : f32 to vector<16x16xf32>
    %100 = arith.select %98, %88, %99 : vector<16x16xi1>, vector<16x16xf32>
    %c0_46 = arith.constant 0 : index
    %c0_47 = arith.constant 0 : index
    %c2_48 = arith.constant 2 : index
    %101 = vector.load %arg16[%c0_46, %c0_47, %c2_48] : memref<2x16x20xf32, #tpu.memory_space<vmem>>, vector<1x16x16xf32>
    %102 = vector.shape_cast %101 : vector<1x16x16xf32> to vector<16x16xf32>
    %103 = vector.shape_cast %100 : vector<16x16xf32> to vector<1x16x16xf32>
    tpu.vector_store %arg16[%c0_46, %c0_47, %c2_48], %103 {strides = array<i32>} : memref<2x16x20xf32, #tpu.memory_space<vmem>>, vector<1x16x16xf32>,
    %c0_49 = arith.constant 0 : index
    %c0_50 = arith.constant 0 : index
    %c0_51 = arith.constant 0 : index
    %104 = vector.load %arg16[%c0_49, %c0_50, %c0_51] : memref<2x16x20xf32, #tpu.memory_space<vmem>>, vector<1x16x20xf32>
    %105 = vector.shape_cast %104 : vector<1x16x20xf32> to vector<16x20xf32>
    %cst_52 = arith.constant 0.000000e+00 : f32
    %106 = vector.broadcast %cst_52 : f32 to vector<12x16xf32>
    %107 = vector.extract_strided_slice %105 {offsets = [0, 0], sizes = [12, 16], strides = [1, 1]} : vector<16x20xf32> to vector<12x16xf32>
    %c0_53 = arith.constant 0 : index
    %c0_54 = arith.constant 0 : index
    %108 = memref.load %arg6[%c0_53, %c0_54] : memref<2x25xf32, #tpu.memory_space<smem>>
    %109 = vector.broadcast %108 : f32 to vector<12x16xf32>
    %110 = arith.mulf %107, %109 : vector<12x16xf32>
    %111 = arith.addf %106, %110 : vector<12x16xf32>
    %112 = vector.extract_strided_slice %105 {offsets = [0, 1], sizes = [12, 16], strides = [1, 1]} : vector<16x20xf32> to vector<12x16xf32>
    %c0_55 = arith.constant 0 : index
    %c1_56 = arith.constant 1 : index
    %113 = memref.load %arg6[%c0_55, %c1_56] : memref<2x25xf32, #tpu.memory_space<smem>>
    %114 = vector.broadcast %113 : f32 to vector<12x16xf32>
    %115 = arith.mulf %112, %114 : vector<12x16xf32>
    %116 = arith.addf %111, %115 : vector<12x16xf32>
    %117 = vector.extract_strided_slice %105 {offsets = [0, 2], sizes = [12, 16], strides = [1, 1]} : vector<16x20xf32> to vector<12x16xf32>
    %c0_57 = arith.constant 0 : index
    %c2_58 = arith.constant 2 : index
    %118 = memref.load %arg6[%c0_57, %c2_58] : memref<2x25xf32, #tpu.memory_space<smem>>
    %119 = vector.broadcast %118 : f32 to vector<12x16xf32>
    %120 = arith.mulf %117, %119 : vector<12x16xf32>
    %121 = arith.addf %116, %120 : vector<12x16xf32>
    %122 = vector.extract_strided_slice %105 {offsets = [0, 3], sizes = [12, 16], strides = [1, 1]} : vector<16x20xf32> to vector<12x16xf32>
    %c0_59 = arith.constant 0 : index
    %c3_60 = arith.constant 3 : index
    %123 = memref.load %arg6[%c0_59, %c3_60] : memref<2x25xf32, #tpu.memory_space<smem>>
    %124 = vector.broadcast %123 : f32 to vector<12x16xf32>
    %125 = arith.mulf %122, %124 : vector<12x16xf32>
    %126 = arith.addf %121, %125 : vector<12x16xf32>
    %127 = vector.extract_strided_slice %105 {offsets = [0, 4], sizes = [12, 16], strides = [1, 1]} : vector<16x20xf32> to vector<12x16xf32>
    %c0_61 = arith.constant 0 : index
    %c4_62 = arith.constant 4 : index
    %128 = memref.load %arg6[%c0_61, %c4_62] : memref<2x25xf32, #tpu.memory_space<smem>>
    %129 = vector.broadcast %128 : f32 to vector<12x16xf32>
    %130 = arith.mulf %127, %129 : vector<12x16xf32>
    %131 = arith.addf %126, %130 : vector<12x16xf32>
    %132 = vector.extract_strided_slice %105 {offsets = [1, 0], sizes = [12, 16], strides = [1, 1]} : vector<16x20xf32> to vector<12x16xf32>
    %c0_63 = arith.constant 0 : index
    %c5_64 = arith.constant 5 : index
    %133 = memref.load %arg6[%c0_63, %c5_64] : memref<2x25xf32, #tpu.memory_space<smem>>
    %134 = vector.broadcast %133 : f32 to vector<12x16xf32>
    %135 = arith.mulf %132, %134 : vector<12x16xf32>
    %136 = arith.addf %131, %135 : vector<12x16xf32>
    %137 = vector.extract_strided_slice %105 {offsets = [1, 1], sizes = [12, 16], strides = [1, 1]} : vector<16x20xf32> to vector<12x16xf32>
    %c0_65 = arith.constant 0 : index
    %c6_66 = arith.constant 6 : index
    %138 = memref.load %arg6[%c0_65, %c6_66] : memref<2x25xf32, #tpu.memory_space<smem>>
    %139 = vector.broadcast %138 : f32 to vector<12x16xf32>
    %140 = arith.mulf %137, %139 : vector<12x16xf32>
    %141 = arith.addf %136, %140 : vector<12x16xf32>
    %142 = vector.extract_strided_slice %105 {offsets = [1, 2], sizes = [12, 16], strides = [1, 1]} : vector<16x20xf32> to vector<12x16xf32>
    %c0_67 = arith.constant 0 : index
    %c7_68 = arith.constant 7 : index
    %143 = memref.load %arg6[%c0_67, %c7_68] : memref<2x25xf32, #tpu.memory_space<smem>>
    %144 = vector.broadcast %143 : f32 to vector<12x16xf32>
    %145 = arith.mulf %142, %144 : vector<12x16xf32>
    %146 = arith.addf %141, %145 : vector<12x16xf32>
    %147 = vector.extract_strided_slice %105 {offsets = [1, 3], sizes = [12, 16], strides = [1, 1]} : vector<16x20xf32> to vector<12x16xf32>
    %c0_69 = arith.constant 0 : index
    %c8 = arith.constant 8 : index
    %148 = memref.load %arg6[%c0_69, %c8] : memref<2x25xf32, #tpu.memory_space<smem>>
    %149 = vector.broadcast %148 : f32 to vector<12x16xf32>
    %150 = arith.mulf %147, %149 : vector<12x16xf32>
    %151 = arith.addf %146, %150 : vector<12x16xf32>
    %152 = vector.extract_strided_slice %105 {offsets = [1, 4], sizes = [12, 16], strides = [1, 1]} : vector<16x20xf32> to vector<12x16xf32>
    %c0_70 = arith.constant 0 : index
    %c9 = arith.constant 9 : index
    %153 = memref.load %arg6[%c0_70, %c9] : memref<2x25xf32, #tpu.memory_space<smem>>
    %154 = vector.broadcast %153 : f32 to vector<12x16xf32>
    %155 = arith.mulf %152, %154 : vector<12x16xf32>
    %156 = arith.addf %151, %155 : vector<12x16xf32>
    %157 = vector.extract_strided_slice %105 {offsets = [2, 0], sizes = [12, 16], strides = [1, 1]} : vector<16x20xf32> to vector<12x16xf32>
    %c0_71 = arith.constant 0 : index
    %c10 = arith.constant 10 : index
    %158 = memref.load %arg6[%c0_71, %c10] : memref<2x25xf32, #tpu.memory_space<smem>>
    %159 = vector.broadcast %158 : f32 to vector<12x16xf32>
    %160 = arith.mulf %157, %159 : vector<12x16xf32>
    %161 = arith.addf %156, %160 : vector<12x16xf32>
    %162 = vector.extract_strided_slice %105 {offsets = [2, 1], sizes = [12, 16], strides = [1, 1]} : vector<16x20xf32> to vector<12x16xf32>
    %c0_72 = arith.constant 0 : index
    %c11 = arith.constant 11 : index
    %163 = memref.load %arg6[%c0_72, %c11] : memref<2x25xf32, #tpu.memory_space<smem>>
    %164 = vector.broadcast %163 : f32 to vector<12x16xf32>
    %165 = arith.mulf %162, %164 : vector<12x16xf32>
    %166 = arith.addf %161, %165 : vector<12x16xf32>
    %167 = vector.extract_strided_slice %105 {offsets = [2, 2], sizes = [12, 16], strides = [1, 1]} : vector<16x20xf32> to vector<12x16xf32>
    %c0_73 = arith.constant 0 : index
    %c12 = arith.constant 12 : index
    %168 = memref.load %arg6[%c0_73, %c12] : memref<2x25xf32, #tpu.memory_space<smem>>
    %169 = vector.broadcast %168 : f32 to vector<12x16xf32>
    %170 = arith.mulf %167, %169 : vector<12x16xf32>
    %171 = arith.addf %166, %170 : vector<12x16xf32>
    %172 = vector.extract_strided_slice %105 {offsets = [2, 3], sizes = [12, 16], strides = [1, 1]} : vector<16x20xf32> to vector<12x16xf32>
    %c0_74 = arith.constant 0 : index
    %c13 = arith.constant 13 : index
    %173 = memref.load %arg6[%c0_74, %c13] : memref<2x25xf32, #tpu.memory_space<smem>>
    %174 = vector.broadcast %173 : f32 to vector<12x16xf32>
    %175 = arith.mulf %172, %174 : vector<12x16xf32>
    %176 = arith.addf %171, %175 : vector<12x16xf32>
    %177 = vector.extract_strided_slice %105 {offsets = [2, 4], sizes = [12, 16], strides = [1, 1]} : vector<16x20xf32> to vector<12x16xf32>
    %c0_75 = arith.constant 0 : index
    %c14 = arith.constant 14 : index
    %178 = memref.load %arg6[%c0_75, %c14] : memref<2x25xf32, #tpu.memory_space<smem>>
    %179 = vector.broadcast %178 : f32 to vector<12x16xf32>
    %180 = arith.mulf %177, %179 : vector<12x16xf32>
    %181 = arith.addf %176, %180 : vector<12x16xf32>
    %182 = vector.extract_strided_slice %105 {offsets = [3, 0], sizes = [12, 16], strides = [1, 1]} : vector<16x20xf32> to vector<12x16xf32>
    %c0_76 = arith.constant 0 : index
    %c15 = arith.constant 15 : index
    %183 = memref.load %arg6[%c0_76, %c15] : memref<2x25xf32, #tpu.memory_space<smem>>
    %184 = vector.broadcast %183 : f32 to vector<12x16xf32>
    %185 = arith.mulf %182, %184 : vector<12x16xf32>
    %186 = arith.addf %181, %185 : vector<12x16xf32>
    %187 = vector.extract_strided_slice %105 {offsets = [3, 1], sizes = [12, 16], strides = [1, 1]} : vector<16x20xf32> to vector<12x16xf32>
    %c0_77 = arith.constant 0 : index
    %c16 = arith.constant 16 : index
    %188 = memref.load %arg6[%c0_77, %c16] : memref<2x25xf32, #tpu.memory_space<smem>>
    %189 = vector.broadcast %188 : f32 to vector<12x16xf32>
    %190 = arith.mulf %187, %189 : vector<12x16xf32>
    %191 = arith.addf %186, %190 : vector<12x16xf32>
    %192 = vector.extract_strided_slice %105 {offsets = [3, 2], sizes = [12, 16], strides = [1, 1]} : vector<16x20xf32> to vector<12x16xf32>
    %c0_78 = arith.constant 0 : index
    %c17 = arith.constant 17 : index
    %193 = memref.load %arg6[%c0_78, %c17] : memref<2x25xf32, #tpu.memory_space<smem>>
    %194 = vector.broadcast %193 : f32 to vector<12x16xf32>
    %195 = arith.mulf %192, %194 : vector<12x16xf32>
    %196 = arith.addf %191, %195 : vector<12x16xf32>
    %197 = vector.extract_strided_slice %105 {offsets = [3, 3], sizes = [12, 16], strides = [1, 1]} : vector<16x20xf32> to vector<12x16xf32>
    %c0_79 = arith.constant 0 : index
    %c18_80 = arith.constant 18 : index
    %198 = memref.load %arg6[%c0_79, %c18_80] : memref<2x25xf32, #tpu.memory_space<smem>>
    %199 = vector.broadcast %198 : f32 to vector<12x16xf32>
    %200 = arith.mulf %197, %199 : vector<12x16xf32>
    %201 = arith.addf %196, %200 : vector<12x16xf32>
    %202 = vector.extract_strided_slice %105 {offsets = [3, 4], sizes = [12, 16], strides = [1, 1]} : vector<16x20xf32> to vector<12x16xf32>
    %c0_81 = arith.constant 0 : index
    %c19 = arith.constant 19 : index
    %203 = memref.load %arg6[%c0_81, %c19] : memref<2x25xf32, #tpu.memory_space<smem>>
    %204 = vector.broadcast %203 : f32 to vector<12x16xf32>
    %205 = arith.mulf %202, %204 : vector<12x16xf32>
    %206 = arith.addf %201, %205 : vector<12x16xf32>
    %207 = vector.extract_strided_slice %105 {offsets = [4, 0], sizes = [12, 16], strides = [1, 1]} : vector<16x20xf32> to vector<12x16xf32>
    %c0_82 = arith.constant 0 : index
    %c20 = arith.constant 20 : index
    %208 = memref.load %arg6[%c0_82, %c20] : memref<2x25xf32, #tpu.memory_space<smem>>
    %209 = vector.broadcast %208 : f32 to vector<12x16xf32>
    %210 = arith.mulf %207, %209 : vector<12x16xf32>
    %211 = arith.addf %206, %210 : vector<12x16xf32>
    %212 = vector.extract_strided_slice %105 {offsets = [4, 1], sizes = [12, 16], strides = [1, 1]} : vector<16x20xf32> to vector<12x16xf32>
    %c0_83 = arith.constant 0 : index
    %c21 = arith.constant 21 : index
    %213 = memref.load %arg6[%c0_83, %c21] : memref<2x25xf32, #tpu.memory_space<smem>>
    %214 = vector.broadcast %213 : f32 to vector<12x16xf32>
    %215 = arith.mulf %212, %214 : vector<12x16xf32>
    %216 = arith.addf %211, %215 : vector<12x16xf32>
    %217 = vector.extract_strided_slice %105 {offsets = [4, 2], sizes = [12, 16], strides = [1, 1]} : vector<16x20xf32> to vector<12x16xf32>
    %c0_84 = arith.constant 0 : index
    %c22 = arith.constant 22 : index
    %218 = memref.load %arg6[%c0_84, %c22] : memref<2x25xf32, #tpu.memory_space<smem>>
    %219 = vector.broadcast %218 : f32 to vector<12x16xf32>
    %220 = arith.mulf %217, %219 : vector<12x16xf32>
    %221 = arith.addf %216, %220 : vector<12x16xf32>
    %222 = vector.extract_strided_slice %105 {offsets = [4, 3], sizes = [12, 16], strides = [1, 1]} : vector<16x20xf32> to vector<12x16xf32>
    %c0_85 = arith.constant 0 : index
    %c23 = arith.constant 23 : index
    %223 = memref.load %arg6[%c0_85, %c23] : memref<2x25xf32, #tpu.memory_space<smem>>
    %224 = vector.broadcast %223 : f32 to vector<12x16xf32>
    %225 = arith.mulf %222, %224 : vector<12x16xf32>
    %226 = arith.addf %221, %225 : vector<12x16xf32>
    %227 = vector.extract_strided_slice %105 {offsets = [4, 4], sizes = [12, 16], strides = [1, 1]} : vector<16x20xf32> to vector<12x16xf32>
    %c0_86 = arith.constant 0 : index
    %c24 = arith.constant 24 : index
    %228 = memref.load %arg6[%c0_86, %c24] : memref<2x25xf32, #tpu.memory_space<smem>>
    %229 = vector.broadcast %228 : f32 to vector<12x16xf32>
    %230 = arith.mulf %227, %229 : vector<12x16xf32>
    %231 = arith.addf %226, %230 : vector<12x16xf32>
    %c0_87 = arith.constant 0 : index
    %232 = memref.load %arg7[%c0_87] : memref<2xf32, #tpu.memory_space<smem>>
    %233 = vector.broadcast %232 : f32 to vector<12x16xf32>
    %234 = arith.mulf %231, %233 : vector<12x16xf32>
    %c0_88 = arith.constant 0 : index
    %235 = memref.load %arg8[%c0_88] : memref<2xf32, #tpu.memory_space<smem>>
    %236 = vector.broadcast %235 : f32 to vector<12x16xf32>
    %237 = arith.addf %234, %236 : vector<12x16xf32>
    %cst_89 = arith.constant 0.000000e+00 : f32
    %238 = vector.broadcast %cst_89 : f32 to vector<12x16xf32>
    %239 = arith.subf %238, %237 : vector<12x16xf32>
    %240 = math.exp %239 : vector<12x16xf32>
    %cst_90 = arith.constant 1.000000e+00 : f32
    %241 = vector.broadcast %cst_90 : f32 to vector<12x16xf32>
    %242 = arith.addf %241, %240 : vector<12x16xf32>
    %cst_91 = arith.constant 1.000000e+00 : f32
    %243 = vector.broadcast %cst_91 : f32 to vector<12x16xf32>
    %244 = arith.divf %243, %242 : vector<12x16xf32>
    %245 = arith.mulf %237, %244 : vector<12x16xf32>
    %246 = vector.extract_strided_slice %105 {offsets = [2, 2], sizes = [12, 16], strides = [1, 1]} : vector<16x20xf32> to vector<12x16xf32>
    %c0_92 = arith.constant 0 : index
    %c1_93 = arith.constant 1 : index
    %247 = memref.load %arg3[%c0_92, %c1_93] : memref<8x2xf32, #tpu.memory_space<smem>>
    %248 = vector.broadcast %247 : f32 to vector<16x16xf32>
    %249 = arith.mulf %22, %248 : vector<16x16xf32>
    %c1_94 = arith.constant 1 : index
    %c1_95 = arith.constant 1 : index
    %250 = memref.load %arg3[%c1_94, %c1_95] : memref<8x2xf32, #tpu.memory_space<smem>>
    %251 = vector.broadcast %250 : f32 to vector<16x16xf32>
    %252 = arith.mulf %25, %251 : vector<16x16xf32>
    %253 = arith.addf %249, %252 : vector<16x16xf32>
    %c2_96 = arith.constant 2 : index
    %c1_97 = arith.constant 1 : index
    %254 = memref.load %arg3[%c2_96, %c1_97] : memref<8x2xf32, #tpu.memory_space<smem>>
    %255 = vector.broadcast %254 : f32 to vector<16x16xf32>
    %256 = arith.mulf %28, %255 : vector<16x16xf32>
    %257 = arith.addf %253, %256 : vector<16x16xf32>
    %c3_98 = arith.constant 3 : index
    %c1_99 = arith.constant 1 : index
    %258 = memref.load %arg3[%c3_98, %c1_99] : memref<8x2xf32, #tpu.memory_space<smem>>
    %259 = vector.broadcast %258 : f32 to vector<16x16xf32>
    %260 = arith.mulf %31, %259 : vector<16x16xf32>
    %261 = arith.addf %257, %260 : vector<16x16xf32>
    %c4_100 = arith.constant 4 : index
    %c1_101 = arith.constant 1 : index
    %262 = memref.load %arg3[%c4_100, %c1_101] : memref<8x2xf32, #tpu.memory_space<smem>>
    %263 = vector.broadcast %262 : f32 to vector<16x16xf32>
    %264 = arith.mulf %34, %263 : vector<16x16xf32>
    %265 = arith.addf %261, %264 : vector<16x16xf32>
    %c5_102 = arith.constant 5 : index
    %c1_103 = arith.constant 1 : index
    %266 = memref.load %arg3[%c5_102, %c1_103] : memref<8x2xf32, #tpu.memory_space<smem>>
    %267 = vector.broadcast %266 : f32 to vector<16x16xf32>
    %268 = arith.mulf %37, %267 : vector<16x16xf32>
    %269 = arith.addf %265, %268 : vector<16x16xf32>
    %c6_104 = arith.constant 6 : index
    %c1_105 = arith.constant 1 : index
    %270 = memref.load %arg3[%c6_104, %c1_105] : memref<8x2xf32, #tpu.memory_space<smem>>
    %271 = vector.broadcast %270 : f32 to vector<16x16xf32>
    %272 = arith.mulf %40, %271 : vector<16x16xf32>
    %273 = arith.addf %269, %272 : vector<16x16xf32>
    %c7_106 = arith.constant 7 : index
    %c1_107 = arith.constant 1 : index
    %274 = memref.load %arg3[%c7_106, %c1_107] : memref<8x2xf32, #tpu.memory_space<smem>>
    %275 = vector.broadcast %274 : f32 to vector<16x16xf32>
    %276 = arith.mulf %43, %275 : vector<16x16xf32>
    %277 = arith.addf %273, %276 : vector<16x16xf32>
    %c1_108 = arith.constant 1 : index
    %278 = memref.load %arg4[%c1_108] : memref<2xf32, #tpu.memory_space<smem>>
    %279 = vector.broadcast %278 : f32 to vector<16x16xf32>
    %280 = arith.mulf %277, %279 : vector<16x16xf32>
    %c1_109 = arith.constant 1 : index
    %281 = memref.load %arg5[%c1_109] : memref<2xf32, #tpu.memory_space<smem>>
    %282 = vector.broadcast %281 : f32 to vector<16x16xf32>
    %283 = arith.addf %280, %282 : vector<16x16xf32>
    %cst_110 = arith.constant 0.000000e+00 : f32
    %284 = vector.broadcast %cst_110 : f32 to vector<16x16xf32>
    %285 = arith.subf %284, %283 : vector<16x16xf32>
    %286 = math.exp %285 : vector<16x16xf32>
    %cst_111 = arith.constant 1.000000e+00 : f32
    %287 = vector.broadcast %cst_111 : f32 to vector<16x16xf32>
    %288 = arith.addf %287, %286 : vector<16x16xf32>
    %cst_112 = arith.constant 1.000000e+00 : f32
    %289 = vector.broadcast %cst_112 : f32 to vector<16x16xf32>
    %290 = arith.divf %289, %288 : vector<16x16xf32>
    %291 = arith.mulf %283, %290 : vector<16x16xf32>
    %cst_113 = arith.constant 0.000000e+00 : f32
    %292 = vector.broadcast %cst_113 : f32 to vector<16x2xf32>
    %c1_114 = arith.constant 1 : index
    %c0_115 = arith.constant 0 : index
    %c0_116 = arith.constant 0 : index
    %293 = vector.load %arg16[%c1_114, %c0_115, %c0_116] : memref<2x16x20xf32, #tpu.memory_space<vmem>>, vector<1x16x2xf32>
    %294 = vector.shape_cast %293 : vector<1x16x2xf32> to vector<16x2xf32>
    %295 = vector.shape_cast %292 : vector<16x2xf32> to vector<1x16x2xf32>
    tpu.vector_store %arg16[%c1_114, %c0_115, %c0_116], %295 {strides = array<i32>} : memref<2x16x20xf32, #tpu.memory_space<vmem>>, vector<1x16x2xf32>,
    %cst_117 = arith.constant 0.000000e+00 : f32
    %296 = vector.broadcast %cst_117 : f32 to vector<16x2xf32>
    %c1_118 = arith.constant 1 : index
    %c0_119 = arith.constant 0 : index
    %c18_120 = arith.constant 18 : index
    %297 = vector.load %arg16[%c1_118, %c0_119, %c18_120] : memref<2x16x20xf32, #tpu.memory_space<vmem>>, vector<1x16x2xf32>
    %298 = vector.shape_cast %297 : vector<1x16x2xf32> to vector<16x2xf32>
    %299 = vector.shape_cast %296 : vector<16x2xf32> to vector<1x16x2xf32>
    tpu.vector_store %arg16[%c1_118, %c0_119, %c18_120], %299 {strides = array<i32>} : memref<2x16x20xf32, #tpu.memory_space<vmem>>, vector<1x16x2xf32>,
    %cst_121 = arith.constant 0.000000e+00 : f32
    %300 = vector.shape_cast %10 : vector<16x1xi1> to vector<16x1xi1>
    %301 = vector.broadcast %300 : vector<16x1xi1> to vector<16x16xi1>
    %302 = vector.broadcast %cst_121 : f32 to vector<16x16xf32>
    %303 = arith.select %301, %291, %302 : vector<16x16xi1>, vector<16x16xf32>
    %c1_122 = arith.constant 1 : index
    %c0_123 = arith.constant 0 : index
    %c2_124 = arith.constant 2 : index
    %304 = vector.load %arg16[%c1_122, %c0_123, %c2_124] : memref<2x16x20xf32, #tpu.memory_space<vmem>>, vector<1x16x16xf32>
    %305 = vector.shape_cast %304 : vector<1x16x16xf32> to vector<16x16xf32>
    %306 = vector.shape_cast %303 : vector<16x16xf32> to vector<1x16x16xf32>
    tpu.vector_store %arg16[%c1_122, %c0_123, %c2_124], %306 {strides = array<i32>} : memref<2x16x20xf32, #tpu.memory_space<vmem>>, vector<1x16x16xf32>,
    %c1_125 = arith.constant 1 : index
    %c0_126 = arith.constant 0 : index
    %c0_127 = arith.constant 0 : index
    %307 = vector.load %arg16[%c1_125, %c0_126, %c0_127] : memref<2x16x20xf32, #tpu.memory_space<vmem>>, vector<1x16x20xf32>
    %308 = vector.shape_cast %307 : vector<1x16x20xf32> to vector<16x20xf32>
    %cst_128 = arith.constant 0.000000e+00 : f32
    %309 = vector.broadcast %cst_128 : f32 to vector<12x16xf32>
    %310 = vector.extract_strided_slice %308 {offsets = [0, 0], sizes = [12, 16], strides = [1, 1]} : vector<16x20xf32> to vector<12x16xf32>
    %c1_129 = arith.constant 1 : index
    %c0_130 = arith.constant 0 : index
    %311 = memref.load %arg6[%c1_129, %c0_130] : memref<2x25xf32, #tpu.memory_space<smem>>
    %312 = vector.broadcast %311 : f32 to vector<12x16xf32>
    %313 = arith.mulf %310, %312 : vector<12x16xf32>
    %314 = arith.addf %309, %313 : vector<12x16xf32>
    %315 = vector.extract_strided_slice %308 {offsets = [0, 1], sizes = [12, 16], strides = [1, 1]} : vector<16x20xf32> to vector<12x16xf32>
    %c1_131 = arith.constant 1 : index
    %c1_132 = arith.constant 1 : index
    %316 = memref.load %arg6[%c1_131, %c1_132] : memref<2x25xf32, #tpu.memory_space<smem>>
    %317 = vector.broadcast %316 : f32 to vector<12x16xf32>
    %318 = arith.mulf %315, %317 : vector<12x16xf32>
    %319 = arith.addf %314, %318 : vector<12x16xf32>
    %320 = vector.extract_strided_slice %308 {offsets = [0, 2], sizes = [12, 16], strides = [1, 1]} : vector<16x20xf32> to vector<12x16xf32>
    %c1_133 = arith.constant 1 : index
    %c2_134 = arith.constant 2 : index
    %321 = memref.load %arg6[%c1_133, %c2_134] : memref<2x25xf32, #tpu.memory_space<smem>>
    %322 = vector.broadcast %321 : f32 to vector<12x16xf32>
    %323 = arith.mulf %320, %322 : vector<12x16xf32>
    %324 = arith.addf %319, %323 : vector<12x16xf32>
    %325 = vector.extract_strided_slice %308 {offsets = [0, 3], sizes = [12, 16], strides = [1, 1]} : vector<16x20xf32> to vector<12x16xf32>
    %c1_135 = arith.constant 1 : index
    %c3_136 = arith.constant 3 : index
    %326 = memref.load %arg6[%c1_135, %c3_136] : memref<2x25xf32, #tpu.memory_space<smem>>
    %327 = vector.broadcast %326 : f32 to vector<12x16xf32>
    %328 = arith.mulf %325, %327 : vector<12x16xf32>
    %329 = arith.addf %324, %328 : vector<12x16xf32>
    %330 = vector.extract_strided_slice %308 {offsets = [0, 4], sizes = [12, 16], strides = [1, 1]} : vector<16x20xf32> to vector<12x16xf32>
    %c1_137 = arith.constant 1 : index
    %c4_138 = arith.constant 4 : index
    %331 = memref.load %arg6[%c1_137, %c4_138] : memref<2x25xf32, #tpu.memory_space<smem>>
    %332 = vector.broadcast %331 : f32 to vector<12x16xf32>
    %333 = arith.mulf %330, %332 : vector<12x16xf32>
    %334 = arith.addf %329, %333 : vector<12x16xf32>
    %335 = vector.extract_strided_slice %308 {offsets = [1, 0], sizes = [12, 16], strides = [1, 1]} : vector<16x20xf32> to vector<12x16xf32>
    %c1_139 = arith.constant 1 : index
    %c5_140 = arith.constant 5 : index
    %336 = memref.load %arg6[%c1_139, %c5_140] : memref<2x25xf32, #tpu.memory_space<smem>>
    %337 = vector.broadcast %336 : f32 to vector<12x16xf32>
    %338 = arith.mulf %335, %337 : vector<12x16xf32>
    %339 = arith.addf %334, %338 : vector<12x16xf32>
    %340 = vector.extract_strided_slice %308 {offsets = [1, 1], sizes = [12, 16], strides = [1, 1]} : vector<16x20xf32> to vector<12x16xf32>
    %c1_141 = arith.constant 1 : index
    %c6_142 = arith.constant 6 : index
    %341 = memref.load %arg6[%c1_141, %c6_142] : memref<2x25xf32, #tpu.memory_space<smem>>
    %342 = vector.broadcast %341 : f32 to vector<12x16xf32>
    %343 = arith.mulf %340, %342 : vector<12x16xf32>
    %344 = arith.addf %339, %343 : vector<12x16xf32>
    %345 = vector.extract_strided_slice %308 {offsets = [1, 2], sizes = [12, 16], strides = [1, 1]} : vector<16x20xf32> to vector<12x16xf32>
    %c1_143 = arith.constant 1 : index
    %c7_144 = arith.constant 7 : index
    %346 = memref.load %arg6[%c1_143, %c7_144] : memref<2x25xf32, #tpu.memory_space<smem>>
    %347 = vector.broadcast %346 : f32 to vector<12x16xf32>
    %348 = arith.mulf %345, %347 : vector<12x16xf32>
    %349 = arith.addf %344, %348 : vector<12x16xf32>
    %350 = vector.extract_strided_slice %308 {offsets = [1, 3], sizes = [12, 16], strides = [1, 1]} : vector<16x20xf32> to vector<12x16xf32>
    %c1_145 = arith.constant 1 : index
    %c8_146 = arith.constant 8 : index
    %351 = memref.load %arg6[%c1_145, %c8_146] : memref<2x25xf32, #tpu.memory_space<smem>>
    %352 = vector.broadcast %351 : f32 to vector<12x16xf32>
    %353 = arith.mulf %350, %352 : vector<12x16xf32>
    %354 = arith.addf %349, %353 : vector<12x16xf32>
    %355 = vector.extract_strided_slice %308 {offsets = [1, 4], sizes = [12, 16], strides = [1, 1]} : vector<16x20xf32> to vector<12x16xf32>
    %c1_147 = arith.constant 1 : index
    %c9_148 = arith.constant 9 : index
    %356 = memref.load %arg6[%c1_147, %c9_148] : memref<2x25xf32, #tpu.memory_space<smem>>
    %357 = vector.broadcast %356 : f32 to vector<12x16xf32>
    %358 = arith.mulf %355, %357 : vector<12x16xf32>
    %359 = arith.addf %354, %358 : vector<12x16xf32>
    %360 = vector.extract_strided_slice %308 {offsets = [2, 0], sizes = [12, 16], strides = [1, 1]} : vector<16x20xf32> to vector<12x16xf32>
    %c1_149 = arith.constant 1 : index
    %c10_150 = arith.constant 10 : index
    %361 = memref.load %arg6[%c1_149, %c10_150] : memref<2x25xf32, #tpu.memory_space<smem>>
    %362 = vector.broadcast %361 : f32 to vector<12x16xf32>
    %363 = arith.mulf %360, %362 : vector<12x16xf32>
    %364 = arith.addf %359, %363 : vector<12x16xf32>
    %365 = vector.extract_strided_slice %308 {offsets = [2, 1], sizes = [12, 16], strides = [1, 1]} : vector<16x20xf32> to vector<12x16xf32>
    %c1_151 = arith.constant 1 : index
    %c11_152 = arith.constant 11 : index
    %366 = memref.load %arg6[%c1_151, %c11_152] : memref<2x25xf32, #tpu.memory_space<smem>>
    %367 = vector.broadcast %366 : f32 to vector<12x16xf32>
    %368 = arith.mulf %365, %367 : vector<12x16xf32>
    %369 = arith.addf %364, %368 : vector<12x16xf32>
    %370 = vector.extract_strided_slice %308 {offsets = [2, 2], sizes = [12, 16], strides = [1, 1]} : vector<16x20xf32> to vector<12x16xf32>
    %c1_153 = arith.constant 1 : index
    %c12_154 = arith.constant 12 : index
    %371 = memref.load %arg6[%c1_153, %c12_154] : memref<2x25xf32, #tpu.memory_space<smem>>
    %372 = vector.broadcast %371 : f32 to vector<12x16xf32>
    %373 = arith.mulf %370, %372 : vector<12x16xf32>
    %374 = arith.addf %369, %373 : vector<12x16xf32>
    %375 = vector.extract_strided_slice %308 {offsets = [2, 3], sizes = [12, 16], strides = [1, 1]} : vector<16x20xf32> to vector<12x16xf32>
    %c1_155 = arith.constant 1 : index
    %c13_156 = arith.constant 13 : index
    %376 = memref.load %arg6[%c1_155, %c13_156] : memref<2x25xf32, #tpu.memory_space<smem>>
    %377 = vector.broadcast %376 : f32 to vector<12x16xf32>
    %378 = arith.mulf %375, %377 : vector<12x16xf32>
    %379 = arith.addf %374, %378 : vector<12x16xf32>
    %380 = vector.extract_strided_slice %308 {offsets = [2, 4], sizes = [12, 16], strides = [1, 1]} : vector<16x20xf32> to vector<12x16xf32>
    %c1_157 = arith.constant 1 : index
    %c14_158 = arith.constant 14 : index
    %381 = memref.load %arg6[%c1_157, %c14_158] : memref<2x25xf32, #tpu.memory_space<smem>>
    %382 = vector.broadcast %381 : f32 to vector<12x16xf32>
    %383 = arith.mulf %380, %382 : vector<12x16xf32>
    %384 = arith.addf %379, %383 : vector<12x16xf32>
    %385 = vector.extract_strided_slice %308 {offsets = [3, 0], sizes = [12, 16], strides = [1, 1]} : vector<16x20xf32> to vector<12x16xf32>
    %c1_159 = arith.constant 1 : index
    %c15_160 = arith.constant 15 : index
    %386 = memref.load %arg6[%c1_159, %c15_160] : memref<2x25xf32, #tpu.memory_space<smem>>
    %387 = vector.broadcast %386 : f32 to vector<12x16xf32>
    %388 = arith.mulf %385, %387 : vector<12x16xf32>
    %389 = arith.addf %384, %388 : vector<12x16xf32>
    %390 = vector.extract_strided_slice %308 {offsets = [3, 1], sizes = [12, 16], strides = [1, 1]} : vector<16x20xf32> to vector<12x16xf32>
    %c1_161 = arith.constant 1 : index
    %c16_162 = arith.constant 16 : index
    %391 = memref.load %arg6[%c1_161, %c16_162] : memref<2x25xf32, #tpu.memory_space<smem>>
    %392 = vector.broadcast %391 : f32 to vector<12x16xf32>
    %393 = arith.mulf %390, %392 : vector<12x16xf32>
    %394 = arith.addf %389, %393 : vector<12x16xf32>
    %395 = vector.extract_strided_slice %308 {offsets = [3, 2], sizes = [12, 16], strides = [1, 1]} : vector<16x20xf32> to vector<12x16xf32>
    %c1_163 = arith.constant 1 : index
    %c17_164 = arith.constant 17 : index
    %396 = memref.load %arg6[%c1_163, %c17_164] : memref<2x25xf32, #tpu.memory_space<smem>>
    %397 = vector.broadcast %396 : f32 to vector<12x16xf32>
    %398 = arith.mulf %395, %397 : vector<12x16xf32>
    %399 = arith.addf %394, %398 : vector<12x16xf32>
    %400 = vector.extract_strided_slice %308 {offsets = [3, 3], sizes = [12, 16], strides = [1, 1]} : vector<16x20xf32> to vector<12x16xf32>
    %c1_165 = arith.constant 1 : index
    %c18_166 = arith.constant 18 : index
    %401 = memref.load %arg6[%c1_165, %c18_166] : memref<2x25xf32, #tpu.memory_space<smem>>
    %402 = vector.broadcast %401 : f32 to vector<12x16xf32>
    %403 = arith.mulf %400, %402 : vector<12x16xf32>
    %404 = arith.addf %399, %403 : vector<12x16xf32>
    %405 = vector.extract_strided_slice %308 {offsets = [3, 4], sizes = [12, 16], strides = [1, 1]} : vector<16x20xf32> to vector<12x16xf32>
    %c1_167 = arith.constant 1 : index
    %c19_168 = arith.constant 19 : index
    %406 = memref.load %arg6[%c1_167, %c19_168] : memref<2x25xf32, #tpu.memory_space<smem>>
    %407 = vector.broadcast %406 : f32 to vector<12x16xf32>
    %408 = arith.mulf %405, %407 : vector<12x16xf32>
    %409 = arith.addf %404, %408 : vector<12x16xf32>
    %410 = vector.extract_strided_slice %308 {offsets = [4, 0], sizes = [12, 16], strides = [1, 1]} : vector<16x20xf32> to vector<12x16xf32>
    %c1_169 = arith.constant 1 : index
    %c20_170 = arith.constant 20 : index
    %411 = memref.load %arg6[%c1_169, %c20_170] : memref<2x25xf32, #tpu.memory_space<smem>>
    %412 = vector.broadcast %411 : f32 to vector<12x16xf32>
    %413 = arith.mulf %410, %412 : vector<12x16xf32>
    %414 = arith.addf %409, %413 : vector<12x16xf32>
    %415 = vector.extract_strided_slice %308 {offsets = [4, 1], sizes = [12, 16], strides = [1, 1]} : vector<16x20xf32> to vector<12x16xf32>
    %c1_171 = arith.constant 1 : index
    %c21_172 = arith.constant 21 : index
    %416 = memref.load %arg6[%c1_171, %c21_172] : memref<2x25xf32, #tpu.memory_space<smem>>
    %417 = vector.broadcast %416 : f32 to vector<12x16xf32>
    %418 = arith.mulf %415, %417 : vector<12x16xf32>
    %419 = arith.addf %414, %418 : vector<12x16xf32>
    %420 = vector.extract_strided_slice %308 {offsets = [4, 2], sizes = [12, 16], strides = [1, 1]} : vector<16x20xf32> to vector<12x16xf32>
    %c1_173 = arith.constant 1 : index
    %c22_174 = arith.constant 22 : index
    %421 = memref.load %arg6[%c1_173, %c22_174] : memref<2x25xf32, #tpu.memory_space<smem>>
    %422 = vector.broadcast %421 : f32 to vector<12x16xf32>
    %423 = arith.mulf %420, %422 : vector<12x16xf32>
    %424 = arith.addf %419, %423 : vector<12x16xf32>
    %425 = vector.extract_strided_slice %308 {offsets = [4, 3], sizes = [12, 16], strides = [1, 1]} : vector<16x20xf32> to vector<12x16xf32>
    %c1_175 = arith.constant 1 : index
    %c23_176 = arith.constant 23 : index
    %426 = memref.load %arg6[%c1_175, %c23_176] : memref<2x25xf32, #tpu.memory_space<smem>>
    %427 = vector.broadcast %426 : f32 to vector<12x16xf32>
    %428 = arith.mulf %425, %427 : vector<12x16xf32>
    %429 = arith.addf %424, %428 : vector<12x16xf32>
    %430 = vector.extract_strided_slice %308 {offsets = [4, 4], sizes = [12, 16], strides = [1, 1]} : vector<16x20xf32> to vector<12x16xf32>
    %c1_177 = arith.constant 1 : index
    %c24_178 = arith.constant 24 : index
    %431 = memref.load %arg6[%c1_177, %c24_178] : memref<2x25xf32, #tpu.memory_space<smem>>
    %432 = vector.broadcast %431 : f32 to vector<12x16xf32>
    %433 = arith.mulf %430, %432 : vector<12x16xf32>
    %434 = arith.addf %429, %433 : vector<12x16xf32>
    %c1_179 = arith.constant 1 : index
    %435 = memref.load %arg7[%c1_179] : memref<2xf32, #tpu.memory_space<smem>>
    %436 = vector.broadcast %435 : f32 to vector<12x16xf32>
    %437 = arith.mulf %434, %436 : vector<12x16xf32>
    %c1_180 = arith.constant 1 : index
    %438 = memref.load %arg8[%c1_180] : memref<2xf32, #tpu.memory_space<smem>>
    %439 = vector.broadcast %438 : f32 to vector<12x16xf32>
    %440 = arith.addf %437, %439 : vector<12x16xf32>
    %cst_181 = arith.constant 0.000000e+00 : f32
    %441 = vector.broadcast %cst_181 : f32 to vector<12x16xf32>
    %442 = arith.subf %441, %440 : vector<12x16xf32>
    %443 = math.exp %442 : vector<12x16xf32>
    %cst_182 = arith.constant 1.000000e+00 : f32
    %444 = vector.broadcast %cst_182 : f32 to vector<12x16xf32>
    %445 = arith.addf %444, %443 : vector<12x16xf32>
    %cst_183 = arith.constant 1.000000e+00 : f32
    %446 = vector.broadcast %cst_183 : f32 to vector<12x16xf32>
    %447 = arith.divf %446, %445 : vector<12x16xf32>
    %448 = arith.mulf %440, %447 : vector<12x16xf32>
    %449 = vector.extract_strided_slice %308 {offsets = [2, 2], sizes = [12, 16], strides = [1, 1]} : vector<16x20xf32> to vector<12x16xf32>
    %c0_184 = arith.constant 0 : index
    %c0_185 = arith.constant 0 : index
    %450 = memref.load %arg9[%c0_184, %c0_185] : memref<4x4xf32, #tpu.memory_space<smem>>
    %451 = vector.broadcast %450 : f32 to vector<12x16xf32>
    %452 = arith.mulf %246, %451 : vector<12x16xf32>
    %c1_186 = arith.constant 1 : index
    %c0_187 = arith.constant 0 : index
    %453 = memref.load %arg9[%c1_186, %c0_187] : memref<4x4xf32, #tpu.memory_space<smem>>
    %454 = vector.broadcast %453 : f32 to vector<12x16xf32>
    %455 = arith.mulf %449, %454 : vector<12x16xf32>
    %456 = arith.addf %452, %455 : vector<12x16xf32>
    %c2_188 = arith.constant 2 : index
    %c0_189 = arith.constant 0 : index
    %457 = memref.load %arg9[%c2_188, %c0_189] : memref<4x4xf32, #tpu.memory_space<smem>>
    %458 = vector.broadcast %457 : f32 to vector<12x16xf32>
    %459 = arith.mulf %245, %458 : vector<12x16xf32>
    %460 = arith.addf %456, %459 : vector<12x16xf32>
    %c3_190 = arith.constant 3 : index
    %c0_191 = arith.constant 0 : index
    %461 = memref.load %arg9[%c3_190, %c0_191] : memref<4x4xf32, #tpu.memory_space<smem>>
    %462 = vector.broadcast %461 : f32 to vector<12x16xf32>
    %463 = arith.mulf %448, %462 : vector<12x16xf32>
    %464 = arith.addf %460, %463 : vector<12x16xf32>
    %c0_192 = arith.constant 0 : index
    %465 = memref.load %arg10[%c0_192] : memref<4xf32, #tpu.memory_space<smem>>
    %466 = vector.broadcast %465 : f32 to vector<12x16xf32>
    %467 = arith.mulf %464, %466 : vector<12x16xf32>
    %c0_193 = arith.constant 0 : index
    %468 = memref.load %arg11[%c0_193] : memref<4xf32, #tpu.memory_space<smem>>
    %469 = vector.broadcast %468 : f32 to vector<12x16xf32>
    %470 = arith.addf %467, %469 : vector<12x16xf32>
    %cst_194 = arith.constant 0.000000e+00 : f32
    %471 = vector.broadcast %cst_194 : f32 to vector<12x2xf32>
    %c0_195 = arith.constant 0 : index
    %c0_196 = arith.constant 0 : index
    %c0_197 = arith.constant 0 : index
    %472 = vector.load %arg17[%c0_195, %c0_196, %c0_197] : memref<4x12x20xf32, #tpu.memory_space<vmem>>, vector<1x12x2xf32>
    %473 = vector.shape_cast %472 : vector<1x12x2xf32> to vector<12x2xf32>
    %474 = vector.shape_cast %471 : vector<12x2xf32> to vector<1x12x2xf32>
    tpu.vector_store %arg17[%c0_195, %c0_196, %c0_197], %474 {strides = array<i32>} : memref<4x12x20xf32, #tpu.memory_space<vmem>>, vector<1x12x2xf32>,
    %cst_198 = arith.constant 0.000000e+00 : f32
    %475 = vector.broadcast %cst_198 : f32 to vector<12x2xf32>
    %c0_199 = arith.constant 0 : index
    %c0_200 = arith.constant 0 : index
    %c18_201 = arith.constant 18 : index
    %476 = vector.load %arg17[%c0_199, %c0_200, %c18_201] : memref<4x12x20xf32, #tpu.memory_space<vmem>>, vector<1x12x2xf32>
    %477 = vector.shape_cast %476 : vector<1x12x2xf32> to vector<12x2xf32>
    %478 = vector.shape_cast %475 : vector<12x2xf32> to vector<1x12x2xf32>
    tpu.vector_store %arg17[%c0_199, %c0_200, %c18_201], %478 {strides = array<i32>} : memref<4x12x20xf32, #tpu.memory_space<vmem>>, vector<1x12x2xf32>,
    %cst_202 = arith.constant 0.000000e+00 : f32
    %479 = vector.shape_cast %19 : vector<12x1xi1> to vector<12x1xi1>
    %480 = vector.broadcast %479 : vector<12x1xi1> to vector<12x16xi1>
    %481 = vector.broadcast %cst_202 : f32 to vector<12x16xf32>
    %482 = arith.select %480, %470, %481 : vector<12x16xi1>, vector<12x16xf32>
    %c0_203 = arith.constant 0 : index
    %c0_204 = arith.constant 0 : index
    %c2_205 = arith.constant 2 : index
    %483 = vector.load %arg17[%c0_203, %c0_204, %c2_205] : memref<4x12x20xf32, #tpu.memory_space<vmem>>, vector<1x12x16xf32>
    %484 = vector.shape_cast %483 : vector<1x12x16xf32> to vector<12x16xf32>
    %485 = vector.shape_cast %482 : vector<12x16xf32> to vector<1x12x16xf32>
    tpu.vector_store %arg17[%c0_203, %c0_204, %c2_205], %485 {strides = array<i32>} : memref<4x12x20xf32, #tpu.memory_space<vmem>>, vector<1x12x16xf32>,
    %c0_206 = arith.constant 0 : index
    %c0_207 = arith.constant 0 : index
    %c0_208 = arith.constant 0 : index
    %486 = vector.load %arg17[%c0_206, %c0_207, %c0_208] : memref<4x12x20xf32, #tpu.memory_space<vmem>>, vector<1x12x20xf32>
    %487 = vector.shape_cast %486 : vector<1x12x20xf32> to vector<12x20xf32>
    %cst_209 = arith.constant 0.000000e+00 : f32
    %488 = vector.broadcast %cst_209 : f32 to vector<8x16xf32>
    %489 = vector.extract_strided_slice %487 {offsets = [0, 0], sizes = [8, 16], strides = [1, 1]} : vector<12x20xf32> to vector<8x16xf32>
    %c0_210 = arith.constant 0 : index
    %c0_211 = arith.constant 0 : index
    %490 = memref.load %arg12[%c0_210, %c0_211] : memref<4x25xf32, #tpu.memory_space<smem>>
    %491 = vector.broadcast %490 : f32 to vector<8x16xf32>
    %492 = arith.mulf %489, %491 : vector<8x16xf32>
    %493 = arith.addf %488, %492 : vector<8x16xf32>
    %494 = vector.extract_strided_slice %487 {offsets = [0, 1], sizes = [8, 16], strides = [1, 1]} : vector<12x20xf32> to vector<8x16xf32>
    %c0_212 = arith.constant 0 : index
    %c1_213 = arith.constant 1 : index
    %495 = memref.load %arg12[%c0_212, %c1_213] : memref<4x25xf32, #tpu.memory_space<smem>>
    %496 = vector.broadcast %495 : f32 to vector<8x16xf32>
    %497 = arith.mulf %494, %496 : vector<8x16xf32>
    %498 = arith.addf %493, %497 : vector<8x16xf32>
    %499 = vector.extract_strided_slice %487 {offsets = [0, 2], sizes = [8, 16], strides = [1, 1]} : vector<12x20xf32> to vector<8x16xf32>
    %c0_214 = arith.constant 0 : index
    %c2_215 = arith.constant 2 : index
    %500 = memref.load %arg12[%c0_214, %c2_215] : memref<4x25xf32, #tpu.memory_space<smem>>
    %501 = vector.broadcast %500 : f32 to vector<8x16xf32>
    %502 = arith.mulf %499, %501 : vector<8x16xf32>
    %503 = arith.addf %498, %502 : vector<8x16xf32>
    %504 = vector.extract_strided_slice %487 {offsets = [0, 3], sizes = [8, 16], strides = [1, 1]} : vector<12x20xf32> to vector<8x16xf32>
    %c0_216 = arith.constant 0 : index
    %c3_217 = arith.constant 3 : index
    %505 = memref.load %arg12[%c0_216, %c3_217] : memref<4x25xf32, #tpu.memory_space<smem>>
    %506 = vector.broadcast %505 : f32 to vector<8x16xf32>
    %507 = arith.mulf %504, %506 : vector<8x16xf32>
    %508 = arith.addf %503, %507 : vector<8x16xf32>
    %509 = vector.extract_strided_slice %487 {offsets = [0, 4], sizes = [8, 16], strides = [1, 1]} : vector<12x20xf32> to vector<8x16xf32>
    %c0_218 = arith.constant 0 : index
    %c4_219 = arith.constant 4 : index
    %510 = memref.load %arg12[%c0_218, %c4_219] : memref<4x25xf32, #tpu.memory_space<smem>>
    %511 = vector.broadcast %510 : f32 to vector<8x16xf32>
    %512 = arith.mulf %509, %511 : vector<8x16xf32>
    %513 = arith.addf %508, %512 : vector<8x16xf32>
    %514 = vector.extract_strided_slice %487 {offsets = [1, 0], sizes = [8, 16], strides = [1, 1]} : vector<12x20xf32> to vector<8x16xf32>
    %c0_220 = arith.constant 0 : index
    %c5_221 = arith.constant 5 : index
    %515 = memref.load %arg12[%c0_220, %c5_221] : memref<4x25xf32, #tpu.memory_space<smem>>
    %516 = vector.broadcast %515 : f32 to vector<8x16xf32>
    %517 = arith.mulf %514, %516 : vector<8x16xf32>
    %518 = arith.addf %513, %517 : vector<8x16xf32>
    %519 = vector.extract_strided_slice %487 {offsets = [1, 1], sizes = [8, 16], strides = [1, 1]} : vector<12x20xf32> to vector<8x16xf32>
    %c0_222 = arith.constant 0 : index
    %c6_223 = arith.constant 6 : index
    %520 = memref.load %arg12[%c0_222, %c6_223] : memref<4x25xf32, #tpu.memory_space<smem>>
    %521 = vector.broadcast %520 : f32 to vector<8x16xf32>
    %522 = arith.mulf %519, %521 : vector<8x16xf32>
    %523 = arith.addf %518, %522 : vector<8x16xf32>
    %524 = vector.extract_strided_slice %487 {offsets = [1, 2], sizes = [8, 16], strides = [1, 1]} : vector<12x20xf32> to vector<8x16xf32>
    %c0_224 = arith.constant 0 : index
    %c7_225 = arith.constant 7 : index
    %525 = memref.load %arg12[%c0_224, %c7_225] : memref<4x25xf32, #tpu.memory_space<smem>>
    %526 = vector.broadcast %525 : f32 to vector<8x16xf32>
    %527 = arith.mulf %524, %526 : vector<8x16xf32>
    %528 = arith.addf %523, %527 : vector<8x16xf32>
    %529 = vector.extract_strided_slice %487 {offsets = [1, 3], sizes = [8, 16], strides = [1, 1]} : vector<12x20xf32> to vector<8x16xf32>
    %c0_226 = arith.constant 0 : index
    %c8_227 = arith.constant 8 : index
    %530 = memref.load %arg12[%c0_226, %c8_227] : memref<4x25xf32, #tpu.memory_space<smem>>
    %531 = vector.broadcast %530 : f32 to vector<8x16xf32>
    %532 = arith.mulf %529, %531 : vector<8x16xf32>
    %533 = arith.addf %528, %532 : vector<8x16xf32>
    %534 = vector.extract_strided_slice %487 {offsets = [1, 4], sizes = [8, 16], strides = [1, 1]} : vector<12x20xf32> to vector<8x16xf32>
    %c0_228 = arith.constant 0 : index
    %c9_229 = arith.constant 9 : index
    %535 = memref.load %arg12[%c0_228, %c9_229] : memref<4x25xf32, #tpu.memory_space<smem>>
    %536 = vector.broadcast %535 : f32 to vector<8x16xf32>
    %537 = arith.mulf %534, %536 : vector<8x16xf32>
    %538 = arith.addf %533, %537 : vector<8x16xf32>
    %539 = vector.extract_strided_slice %487 {offsets = [2, 0], sizes = [8, 16], strides = [1, 1]} : vector<12x20xf32> to vector<8x16xf32>
    %c0_230 = arith.constant 0 : index
    %c10_231 = arith.constant 10 : index
    %540 = memref.load %arg12[%c0_230, %c10_231] : memref<4x25xf32, #tpu.memory_space<smem>>
    %541 = vector.broadcast %540 : f32 to vector<8x16xf32>
    %542 = arith.mulf %539, %541 : vector<8x16xf32>
    %543 = arith.addf %538, %542 : vector<8x16xf32>
    %544 = vector.extract_strided_slice %487 {offsets = [2, 1], sizes = [8, 16], strides = [1, 1]} : vector<12x20xf32> to vector<8x16xf32>
    %c0_232 = arith.constant 0 : index
    %c11_233 = arith.constant 11 : index
    %545 = memref.load %arg12[%c0_232, %c11_233] : memref<4x25xf32, #tpu.memory_space<smem>>
    %546 = vector.broadcast %545 : f32 to vector<8x16xf32>
    %547 = arith.mulf %544, %546 : vector<8x16xf32>
    %548 = arith.addf %543, %547 : vector<8x16xf32>
    %549 = vector.extract_strided_slice %487 {offsets = [2, 2], sizes = [8, 16], strides = [1, 1]} : vector<12x20xf32> to vector<8x16xf32>
    %c0_234 = arith.constant 0 : index
    %c12_235 = arith.constant 12 : index
    %550 = memref.load %arg12[%c0_234, %c12_235] : memref<4x25xf32, #tpu.memory_space<smem>>
    %551 = vector.broadcast %550 : f32 to vector<8x16xf32>
    %552 = arith.mulf %549, %551 : vector<8x16xf32>
    %553 = arith.addf %548, %552 : vector<8x16xf32>
    %554 = vector.extract_strided_slice %487 {offsets = [2, 3], sizes = [8, 16], strides = [1, 1]} : vector<12x20xf32> to vector<8x16xf32>
    %c0_236 = arith.constant 0 : index
    %c13_237 = arith.constant 13 : index
    %555 = memref.load %arg12[%c0_236, %c13_237] : memref<4x25xf32, #tpu.memory_space<smem>>
    %556 = vector.broadcast %555 : f32 to vector<8x16xf32>
    %557 = arith.mulf %554, %556 : vector<8x16xf32>
    %558 = arith.addf %553, %557 : vector<8x16xf32>
    %559 = vector.extract_strided_slice %487 {offsets = [2, 4], sizes = [8, 16], strides = [1, 1]} : vector<12x20xf32> to vector<8x16xf32>
    %c0_238 = arith.constant 0 : index
    %c14_239 = arith.constant 14 : index
    %560 = memref.load %arg12[%c0_238, %c14_239] : memref<4x25xf32, #tpu.memory_space<smem>>
    %561 = vector.broadcast %560 : f32 to vector<8x16xf32>
    %562 = arith.mulf %559, %561 : vector<8x16xf32>
    %563 = arith.addf %558, %562 : vector<8x16xf32>
    %564 = vector.extract_strided_slice %487 {offsets = [3, 0], sizes = [8, 16], strides = [1, 1]} : vector<12x20xf32> to vector<8x16xf32>
    %c0_240 = arith.constant 0 : index
    %c15_241 = arith.constant 15 : index
    %565 = memref.load %arg12[%c0_240, %c15_241] : memref<4x25xf32, #tpu.memory_space<smem>>
    %566 = vector.broadcast %565 : f32 to vector<8x16xf32>
    %567 = arith.mulf %564, %566 : vector<8x16xf32>
    %568 = arith.addf %563, %567 : vector<8x16xf32>
    %569 = vector.extract_strided_slice %487 {offsets = [3, 1], sizes = [8, 16], strides = [1, 1]} : vector<12x20xf32> to vector<8x16xf32>
    %c0_242 = arith.constant 0 : index
    %c16_243 = arith.constant 16 : index
    %570 = memref.load %arg12[%c0_242, %c16_243] : memref<4x25xf32, #tpu.memory_space<smem>>
    %571 = vector.broadcast %570 : f32 to vector<8x16xf32>
    %572 = arith.mulf %569, %571 : vector<8x16xf32>
    %573 = arith.addf %568, %572 : vector<8x16xf32>
    %574 = vector.extract_strided_slice %487 {offsets = [3, 2], sizes = [8, 16], strides = [1, 1]} : vector<12x20xf32> to vector<8x16xf32>
    %c0_244 = arith.constant 0 : index
    %c17_245 = arith.constant 17 : index
    %575 = memref.load %arg12[%c0_244, %c17_245] : memref<4x25xf32, #tpu.memory_space<smem>>
    %576 = vector.broadcast %575 : f32 to vector<8x16xf32>
    %577 = arith.mulf %574, %576 : vector<8x16xf32>
    %578 = arith.addf %573, %577 : vector<8x16xf32>
    %579 = vector.extract_strided_slice %487 {offsets = [3, 3], sizes = [8, 16], strides = [1, 1]} : vector<12x20xf32> to vector<8x16xf32>
    %c0_246 = arith.constant 0 : index
    %c18_247 = arith.constant 18 : index
    %580 = memref.load %arg12[%c0_246, %c18_247] : memref<4x25xf32, #tpu.memory_space<smem>>
    %581 = vector.broadcast %580 : f32 to vector<8x16xf32>
    %582 = arith.mulf %579, %581 : vector<8x16xf32>
    %583 = arith.addf %578, %582 : vector<8x16xf32>
    %584 = vector.extract_strided_slice %487 {offsets = [3, 4], sizes = [8, 16], strides = [1, 1]} : vector<12x20xf32> to vector<8x16xf32>
    %c0_248 = arith.constant 0 : index
    %c19_249 = arith.constant 19 : index
    %585 = memref.load %arg12[%c0_248, %c19_249] : memref<4x25xf32, #tpu.memory_space<smem>>
    %586 = vector.broadcast %585 : f32 to vector<8x16xf32>
    %587 = arith.mulf %584, %586 : vector<8x16xf32>
    %588 = arith.addf %583, %587 : vector<8x16xf32>
    %589 = vector.extract_strided_slice %487 {offsets = [4, 0], sizes = [8, 16], strides = [1, 1]} : vector<12x20xf32> to vector<8x16xf32>
    %c0_250 = arith.constant 0 : index
    %c20_251 = arith.constant 20 : index
    %590 = memref.load %arg12[%c0_250, %c20_251] : memref<4x25xf32, #tpu.memory_space<smem>>
    %591 = vector.broadcast %590 : f32 to vector<8x16xf32>
    %592 = arith.mulf %589, %591 : vector<8x16xf32>
    %593 = arith.addf %588, %592 : vector<8x16xf32>
    %594 = vector.extract_strided_slice %487 {offsets = [4, 1], sizes = [8, 16], strides = [1, 1]} : vector<12x20xf32> to vector<8x16xf32>
    %c0_252 = arith.constant 0 : index
    %c21_253 = arith.constant 21 : index
    %595 = memref.load %arg12[%c0_252, %c21_253] : memref<4x25xf32, #tpu.memory_space<smem>>
    %596 = vector.broadcast %595 : f32 to vector<8x16xf32>
    %597 = arith.mulf %594, %596 : vector<8x16xf32>
    %598 = arith.addf %593, %597 : vector<8x16xf32>
    %599 = vector.extract_strided_slice %487 {offsets = [4, 2], sizes = [8, 16], strides = [1, 1]} : vector<12x20xf32> to vector<8x16xf32>
    %c0_254 = arith.constant 0 : index
    %c22_255 = arith.constant 22 : index
    %600 = memref.load %arg12[%c0_254, %c22_255] : memref<4x25xf32, #tpu.memory_space<smem>>
    %601 = vector.broadcast %600 : f32 to vector<8x16xf32>
    %602 = arith.mulf %599, %601 : vector<8x16xf32>
    %603 = arith.addf %598, %602 : vector<8x16xf32>
    %604 = vector.extract_strided_slice %487 {offsets = [4, 3], sizes = [8, 16], strides = [1, 1]} : vector<12x20xf32> to vector<8x16xf32>
    %c0_256 = arith.constant 0 : index
    %c23_257 = arith.constant 23 : index
    %605 = memref.load %arg12[%c0_256, %c23_257] : memref<4x25xf32, #tpu.memory_space<smem>>
    %606 = vector.broadcast %605 : f32 to vector<8x16xf32>
    %607 = arith.mulf %604, %606 : vector<8x16xf32>
    %608 = arith.addf %603, %607 : vector<8x16xf32>
    %609 = vector.extract_strided_slice %487 {offsets = [4, 4], sizes = [8, 16], strides = [1, 1]} : vector<12x20xf32> to vector<8x16xf32>
    %c0_258 = arith.constant 0 : index
    %c24_259 = arith.constant 24 : index
    %610 = memref.load %arg12[%c0_258, %c24_259] : memref<4x25xf32, #tpu.memory_space<smem>>
    %611 = vector.broadcast %610 : f32 to vector<8x16xf32>
    %612 = arith.mulf %609, %611 : vector<8x16xf32>
    %613 = arith.addf %608, %612 : vector<8x16xf32>
    %c0_260 = arith.constant 0 : index
    %614 = memref.load %arg13[%c0_260] : memref<4xf32, #tpu.memory_space<smem>>
    %615 = vector.broadcast %614 : f32 to vector<8x16xf32>
    %616 = arith.mulf %613, %615 : vector<8x16xf32>
    %c0_261 = arith.constant 0 : index
    %617 = memref.load %arg14[%c0_261] : memref<4xf32, #tpu.memory_space<smem>>
    %618 = vector.broadcast %617 : f32 to vector<8x16xf32>
    %619 = arith.addf %616, %618 : vector<8x16xf32>
    %620 = vector.extract_strided_slice %487 {offsets = [2, 2], sizes = [8, 16], strides = [1, 1]} : vector<12x20xf32> to vector<8x16xf32>
    %c4_i32_262 = arith.constant 4 : i32
    %621 = arith.addi %1, %c4_i32_262 : i32
    %c0_263 = arith.constant 0 : index
    %c0_264 = arith.constant 0 : index
    %622 = arith.index_cast %621 : i32 to index
    %c0_265 = arith.constant 0 : index
    %623 = vector.load %arg2[%c0_263, %c0_264, %622, %c0_265] : memref<1x8x24x16xf32, #tpu.memory_space<vmem>>, vector<1x1x8x16xf32>
    %624 = vector.shape_cast %623 : vector<1x1x8x16xf32> to vector<8x16xf32>
    %625 = arith.addf %620, %624 : vector<8x16xf32>
    %c0_266 = arith.constant 0 : index
    %c0_267 = arith.constant 0 : index
    %c0_268 = arith.constant 0 : index
    %c0_269 = arith.constant 0 : index
    %626 = vector.load %arg15[%c0_266, %c0_267, %c0_268, %c0_269] : memref<1x8x8x16xf32, #tpu.memory_space<vmem>>, vector<1x1x8x16xf32>
    %627 = vector.shape_cast %626 : vector<1x1x8x16xf32> to vector<8x16xf32>
    %628 = vector.shape_cast %625 : vector<8x16xf32> to vector<1x1x8x16xf32>
    tpu.vector_store %arg15[%c0_266, %c0_267, %c0_268, %c0_269], %628 {strides = array<i32>} : memref<1x8x8x16xf32, #tpu.memory_space<vmem>>, vector<1x1x8x16xf32>,
    %c4_i32_270 = arith.constant 4 : i32
    %629 = arith.addi %1, %c4_i32_270 : i32
    %c0_271 = arith.constant 0 : index
    %c4_272 = arith.constant 4 : index
    %630 = arith.index_cast %629 : i32 to index
    %c0_273 = arith.constant 0 : index
    %631 = vector.load %arg2[%c0_271, %c4_272, %630, %c0_273] : memref<1x8x24x16xf32, #tpu.memory_space<vmem>>, vector<1x1x8x16xf32>
    %632 = vector.shape_cast %631 : vector<1x1x8x16xf32> to vector<8x16xf32>
    %633 = arith.addf %619, %632 : vector<8x16xf32>
    %c0_274 = arith.constant 0 : index
    %c4_275 = arith.constant 4 : index
    %c0_276 = arith.constant 0 : index
    %c0_277 = arith.constant 0 : index
    %634 = vector.load %arg15[%c0_274, %c4_275, %c0_276, %c0_277] : memref<1x8x8x16xf32, #tpu.memory_space<vmem>>, vector<1x1x8x16xf32>
    %635 = vector.shape_cast %634 : vector<1x1x8x16xf32> to vector<8x16xf32>
    %636 = vector.shape_cast %633 : vector<8x16xf32> to vector<1x1x8x16xf32>
    tpu.vector_store %arg15[%c0_274, %c4_275, %c0_276, %c0_277], %636 {strides = array<i32>} : memref<1x8x8x16xf32, #tpu.memory_space<vmem>>, vector<1x1x8x16xf32>,
    %c0_278 = arith.constant 0 : index
    %c1_279 = arith.constant 1 : index
    %637 = memref.load %arg9[%c0_278, %c1_279] : memref<4x4xf32, #tpu.memory_space<smem>>
    %638 = vector.broadcast %637 : f32 to vector<12x16xf32>
    %639 = arith.mulf %246, %638 : vector<12x16xf32>
    %c1_280 = arith.constant 1 : index
    %c1_281 = arith.constant 1 : index
    %640 = memref.load %arg9[%c1_280, %c1_281] : memref<4x4xf32, #tpu.memory_space<smem>>
    %641 = vector.broadcast %640 : f32 to vector<12x16xf32>
    %642 = arith.mulf %449, %641 : vector<12x16xf32>
    %643 = arith.addf %639, %642 : vector<12x16xf32>
    %c2_282 = arith.constant 2 : index
    %c1_283 = arith.constant 1 : index
    %644 = memref.load %arg9[%c2_282, %c1_283] : memref<4x4xf32, #tpu.memory_space<smem>>
    %645 = vector.broadcast %644 : f32 to vector<12x16xf32>
    %646 = arith.mulf %245, %645 : vector<12x16xf32>
    %647 = arith.addf %643, %646 : vector<12x16xf32>
    %c3_284 = arith.constant 3 : index
    %c1_285 = arith.constant 1 : index
    %648 = memref.load %arg9[%c3_284, %c1_285] : memref<4x4xf32, #tpu.memory_space<smem>>
    %649 = vector.broadcast %648 : f32 to vector<12x16xf32>
    %650 = arith.mulf %448, %649 : vector<12x16xf32>
    %651 = arith.addf %647, %650 : vector<12x16xf32>
    %c1_286 = arith.constant 1 : index
    %652 = memref.load %arg10[%c1_286] : memref<4xf32, #tpu.memory_space<smem>>
    %653 = vector.broadcast %652 : f32 to vector<12x16xf32>
    %654 = arith.mulf %651, %653 : vector<12x16xf32>
    %c1_287 = arith.constant 1 : index
    %655 = memref.load %arg11[%c1_287] : memref<4xf32, #tpu.memory_space<smem>>
    %656 = vector.broadcast %655 : f32 to vector<12x16xf32>
    %657 = arith.addf %654, %656 : vector<12x16xf32>
    %cst_288 = arith.constant 0.000000e+00 : f32
    %658 = vector.broadcast %cst_288 : f32 to vector<12x2xf32>
    %c1_289 = arith.constant 1 : index
    %c0_290 = arith.constant 0 : index
    %c0_291 = arith.constant 0 : index
    %659 = vector.load %arg17[%c1_289, %c0_290, %c0_291] : memref<4x12x20xf32, #tpu.memory_space<vmem>>, vector<1x12x2xf32>
    %660 = vector.shape_cast %659 : vector<1x12x2xf32> to vector<12x2xf32>
    %661 = vector.shape_cast %658 : vector<12x2xf32> to vector<1x12x2xf32>
    tpu.vector_store %arg17[%c1_289, %c0_290, %c0_291], %661 {strides = array<i32>} : memref<4x12x20xf32, #tpu.memory_space<vmem>>, vector<1x12x2xf32>,
    %cst_292 = arith.constant 0.000000e+00 : f32
    %662 = vector.broadcast %cst_292 : f32 to vector<12x2xf32>
    %c1_293 = arith.constant 1 : index
    %c0_294 = arith.constant 0 : index
    %c18_295 = arith.constant 18 : index
    %663 = vector.load %arg17[%c1_293, %c0_294, %c18_295] : memref<4x12x20xf32, #tpu.memory_space<vmem>>, vector<1x12x2xf32>
    %664 = vector.shape_cast %663 : vector<1x12x2xf32> to vector<12x2xf32>
    %665 = vector.shape_cast %662 : vector<12x2xf32> to vector<1x12x2xf32>
    tpu.vector_store %arg17[%c1_293, %c0_294, %c18_295], %665 {strides = array<i32>} : memref<4x12x20xf32, #tpu.memory_space<vmem>>, vector<1x12x2xf32>,
    %cst_296 = arith.constant 0.000000e+00 : f32
    %666 = vector.shape_cast %19 : vector<12x1xi1> to vector<12x1xi1>
    %667 = vector.broadcast %666 : vector<12x1xi1> to vector<12x16xi1>
    %668 = vector.broadcast %cst_296 : f32 to vector<12x16xf32>
    %669 = arith.select %667, %657, %668 : vector<12x16xi1>, vector<12x16xf32>
    %c1_297 = arith.constant 1 : index
    %c0_298 = arith.constant 0 : index
    %c2_299 = arith.constant 2 : index
    %670 = vector.load %arg17[%c1_297, %c0_298, %c2_299] : memref<4x12x20xf32, #tpu.memory_space<vmem>>, vector<1x12x16xf32>
    %671 = vector.shape_cast %670 : vector<1x12x16xf32> to vector<12x16xf32>
    %672 = vector.shape_cast %669 : vector<12x16xf32> to vector<1x12x16xf32>
    tpu.vector_store %arg17[%c1_297, %c0_298, %c2_299], %672 {strides = array<i32>} : memref<4x12x20xf32, #tpu.memory_space<vmem>>, vector<1x12x16xf32>,
    %c1_300 = arith.constant 1 : index
    %c0_301 = arith.constant 0 : index
    %c0_302 = arith.constant 0 : index
    %673 = vector.load %arg17[%c1_300, %c0_301, %c0_302] : memref<4x12x20xf32, #tpu.memory_space<vmem>>, vector<1x12x20xf32>
    %674 = vector.shape_cast %673 : vector<1x12x20xf32> to vector<12x20xf32>
    %cst_303 = arith.constant 0.000000e+00 : f32
    %675 = vector.broadcast %cst_303 : f32 to vector<8x16xf32>
    %676 = vector.extract_strided_slice %674 {offsets = [0, 0], sizes = [8, 16], strides = [1, 1]} : vector<12x20xf32> to vector<8x16xf32>
    %c1_304 = arith.constant 1 : index
    %c0_305 = arith.constant 0 : index
    %677 = memref.load %arg12[%c1_304, %c0_305] : memref<4x25xf32, #tpu.memory_space<smem>>
    %678 = vector.broadcast %677 : f32 to vector<8x16xf32>
    %679 = arith.mulf %676, %678 : vector<8x16xf32>
    %680 = arith.addf %675, %679 : vector<8x16xf32>
    %681 = vector.extract_strided_slice %674 {offsets = [0, 1], sizes = [8, 16], strides = [1, 1]} : vector<12x20xf32> to vector<8x16xf32>
    %c1_306 = arith.constant 1 : index
    %c1_307 = arith.constant 1 : index
    %682 = memref.load %arg12[%c1_306, %c1_307] : memref<4x25xf32, #tpu.memory_space<smem>>
    %683 = vector.broadcast %682 : f32 to vector<8x16xf32>
    %684 = arith.mulf %681, %683 : vector<8x16xf32>
    %685 = arith.addf %680, %684 : vector<8x16xf32>
    %686 = vector.extract_strided_slice %674 {offsets = [0, 2], sizes = [8, 16], strides = [1, 1]} : vector<12x20xf32> to vector<8x16xf32>
    %c1_308 = arith.constant 1 : index
    %c2_309 = arith.constant 2 : index
    %687 = memref.load %arg12[%c1_308, %c2_309] : memref<4x25xf32, #tpu.memory_space<smem>>
    %688 = vector.broadcast %687 : f32 to vector<8x16xf32>
    %689 = arith.mulf %686, %688 : vector<8x16xf32>
    %690 = arith.addf %685, %689 : vector<8x16xf32>
    %691 = vector.extract_strided_slice %674 {offsets = [0, 3], sizes = [8, 16], strides = [1, 1]} : vector<12x20xf32> to vector<8x16xf32>
    %c1_310 = arith.constant 1 : index
    %c3_311 = arith.constant 3 : index
    %692 = memref.load %arg12[%c1_310, %c3_311] : memref<4x25xf32, #tpu.memory_space<smem>>
    %693 = vector.broadcast %692 : f32 to vector<8x16xf32>
    %694 = arith.mulf %691, %693 : vector<8x16xf32>
    %695 = arith.addf %690, %694 : vector<8x16xf32>
    %696 = vector.extract_strided_slice %674 {offsets = [0, 4], sizes = [8, 16], strides = [1, 1]} : vector<12x20xf32> to vector<8x16xf32>
    %c1_312 = arith.constant 1 : index
    %c4_313 = arith.constant 4 : index
    %697 = memref.load %arg12[%c1_312, %c4_313] : memref<4x25xf32, #tpu.memory_space<smem>>
    %698 = vector.broadcast %697 : f32 to vector<8x16xf32>
    %699 = arith.mulf %696, %698 : vector<8x16xf32>
    %700 = arith.addf %695, %699 : vector<8x16xf32>
    %701 = vector.extract_strided_slice %674 {offsets = [1, 0], sizes = [8, 16], strides = [1, 1]} : vector<12x20xf32> to vector<8x16xf32>
    %c1_314 = arith.constant 1 : index
    %c5_315 = arith.constant 5 : index
    %702 = memref.load %arg12[%c1_314, %c5_315] : memref<4x25xf32, #tpu.memory_space<smem>>
    %703 = vector.broadcast %702 : f32 to vector<8x16xf32>
    %704 = arith.mulf %701, %703 : vector<8x16xf32>
    %705 = arith.addf %700, %704 : vector<8x16xf32>
    %706 = vector.extract_strided_slice %674 {offsets = [1, 1], sizes = [8, 16], strides = [1, 1]} : vector<12x20xf32> to vector<8x16xf32>
    %c1_316 = arith.constant 1 : index
    %c6_317 = arith.constant 6 : index
    %707 = memref.load %arg12[%c1_316, %c6_317] : memref<4x25xf32, #tpu.memory_space<smem>>
    %708 = vector.broadcast %707 : f32 to vector<8x16xf32>
    %709 = arith.mulf %706, %708 : vector<8x16xf32>
    %710 = arith.addf %705, %709 : vector<8x16xf32>
    %711 = vector.extract_strided_slice %674 {offsets = [1, 2], sizes = [8, 16], strides = [1, 1]} : vector<12x20xf32> to vector<8x16xf32>
    %c1_318 = arith.constant 1 : index
    %c7_319 = arith.constant 7 : index
    %712 = memref.load %arg12[%c1_318, %c7_319] : memref<4x25xf32, #tpu.memory_space<smem>>
    %713 = vector.broadcast %712 : f32 to vector<8x16xf32>
    %714 = arith.mulf %711, %713 : vector<8x16xf32>
    %715 = arith.addf %710, %714 : vector<8x16xf32>
    %716 = vector.extract_strided_slice %674 {offsets = [1, 3], sizes = [8, 16], strides = [1, 1]} : vector<12x20xf32> to vector<8x16xf32>
    %c1_320 = arith.constant 1 : index
    %c8_321 = arith.constant 8 : index
    %717 = memref.load %arg12[%c1_320, %c8_321] : memref<4x25xf32, #tpu.memory_space<smem>>
    %718 = vector.broadcast %717 : f32 to vector<8x16xf32>
    %719 = arith.mulf %716, %718 : vector<8x16xf32>
    %720 = arith.addf %715, %719 : vector<8x16xf32>
    %721 = vector.extract_strided_slice %674 {offsets = [1, 4], sizes = [8, 16], strides = [1, 1]} : vector<12x20xf32> to vector<8x16xf32>
    %c1_322 = arith.constant 1 : index
    %c9_323 = arith.constant 9 : index
    %722 = memref.load %arg12[%c1_322, %c9_323] : memref<4x25xf32, #tpu.memory_space<smem>>
    %723 = vector.broadcast %722 : f32 to vector<8x16xf32>
    %724 = arith.mulf %721, %723 : vector<8x16xf32>
    %725 = arith.addf %720, %724 : vector<8x16xf32>
    %726 = vector.extract_strided_slice %674 {offsets = [2, 0], sizes = [8, 16], strides = [1, 1]} : vector<12x20xf32> to vector<8x16xf32>
    %c1_324 = arith.constant 1 : index
    %c10_325 = arith.constant 10 : index
    %727 = memref.load %arg12[%c1_324, %c10_325] : memref<4x25xf32, #tpu.memory_space<smem>>
    %728 = vector.broadcast %727 : f32 to vector<8x16xf32>
    %729 = arith.mulf %726, %728 : vector<8x16xf32>
    %730 = arith.addf %725, %729 : vector<8x16xf32>
    %731 = vector.extract_strided_slice %674 {offsets = [2, 1], sizes = [8, 16], strides = [1, 1]} : vector<12x20xf32> to vector<8x16xf32>
    %c1_326 = arith.constant 1 : index
    %c11_327 = arith.constant 11 : index
    %732 = memref.load %arg12[%c1_326, %c11_327] : memref<4x25xf32, #tpu.memory_space<smem>>
    %733 = vector.broadcast %732 : f32 to vector<8x16xf32>
    %734 = arith.mulf %731, %733 : vector<8x16xf32>
    %735 = arith.addf %730, %734 : vector<8x16xf32>
    %736 = vector.extract_strided_slice %674 {offsets = [2, 2], sizes = [8, 16], strides = [1, 1]} : vector<12x20xf32> to vector<8x16xf32>
    %c1_328 = arith.constant 1 : index
    %c12_329 = arith.constant 12 : index
    %737 = memref.load %arg12[%c1_328, %c12_329] : memref<4x25xf32, #tpu.memory_space<smem>>
    %738 = vector.broadcast %737 : f32 to vector<8x16xf32>
    %739 = arith.mulf %736, %738 : vector<8x16xf32>
    %740 = arith.addf %735, %739 : vector<8x16xf32>
    %741 = vector.extract_strided_slice %674 {offsets = [2, 3], sizes = [8, 16], strides = [1, 1]} : vector<12x20xf32> to vector<8x16xf32>
    %c1_330 = arith.constant 1 : index
    %c13_331 = arith.constant 13 : index
    %742 = memref.load %arg12[%c1_330, %c13_331] : memref<4x25xf32, #tpu.memory_space<smem>>
    %743 = vector.broadcast %742 : f32 to vector<8x16xf32>
    %744 = arith.mulf %741, %743 : vector<8x16xf32>
    %745 = arith.addf %740, %744 : vector<8x16xf32>
    %746 = vector.extract_strided_slice %674 {offsets = [2, 4], sizes = [8, 16], strides = [1, 1]} : vector<12x20xf32> to vector<8x16xf32>
    %c1_332 = arith.constant 1 : index
    %c14_333 = arith.constant 14 : index
    %747 = memref.load %arg12[%c1_332, %c14_333] : memref<4x25xf32, #tpu.memory_space<smem>>
    %748 = vector.broadcast %747 : f32 to vector<8x16xf32>
    %749 = arith.mulf %746, %748 : vector<8x16xf32>
    %750 = arith.addf %745, %749 : vector<8x16xf32>
    %751 = vector.extract_strided_slice %674 {offsets = [3, 0], sizes = [8, 16], strides = [1, 1]} : vector<12x20xf32> to vector<8x16xf32>
    %c1_334 = arith.constant 1 : index
    %c15_335 = arith.constant 15 : index
    %752 = memref.load %arg12[%c1_334, %c15_335] : memref<4x25xf32, #tpu.memory_space<smem>>
    %753 = vector.broadcast %752 : f32 to vector<8x16xf32>
    %754 = arith.mulf %751, %753 : vector<8x16xf32>
    %755 = arith.addf %750, %754 : vector<8x16xf32>
    %756 = vector.extract_strided_slice %674 {offsets = [3, 1], sizes = [8, 16], strides = [1, 1]} : vector<12x20xf32> to vector<8x16xf32>
    %c1_336 = arith.constant 1 : index
    %c16_337 = arith.constant 16 : index
    %757 = memref.load %arg12[%c1_336, %c16_337] : memref<4x25xf32, #tpu.memory_space<smem>>
    %758 = vector.broadcast %757 : f32 to vector<8x16xf32>
    %759 = arith.mulf %756, %758 : vector<8x16xf32>
    %760 = arith.addf %755, %759 : vector<8x16xf32>
    %761 = vector.extract_strided_slice %674 {offsets = [3, 2], sizes = [8, 16], strides = [1, 1]} : vector<12x20xf32> to vector<8x16xf32>
    %c1_338 = arith.constant 1 : index
    %c17_339 = arith.constant 17 : index
    %762 = memref.load %arg12[%c1_338, %c17_339] : memref<4x25xf32, #tpu.memory_space<smem>>
    %763 = vector.broadcast %762 : f32 to vector<8x16xf32>
    %764 = arith.mulf %761, %763 : vector<8x16xf32>
    %765 = arith.addf %760, %764 : vector<8x16xf32>
    %766 = vector.extract_strided_slice %674 {offsets = [3, 3], sizes = [8, 16], strides = [1, 1]} : vector<12x20xf32> to vector<8x16xf32>
    %c1_340 = arith.constant 1 : index
    %c18_341 = arith.constant 18 : index
    %767 = memref.load %arg12[%c1_340, %c18_341] : memref<4x25xf32, #tpu.memory_space<smem>>
    %768 = vector.broadcast %767 : f32 to vector<8x16xf32>
    %769 = arith.mulf %766, %768 : vector<8x16xf32>
    %770 = arith.addf %765, %769 : vector<8x16xf32>
    %771 = vector.extract_strided_slice %674 {offsets = [3, 4], sizes = [8, 16], strides = [1, 1]} : vector<12x20xf32> to vector<8x16xf32>
    %c1_342 = arith.constant 1 : index
    %c19_343 = arith.constant 19 : index
    %772 = memref.load %arg12[%c1_342, %c19_343] : memref<4x25xf32, #tpu.memory_space<smem>>
    %773 = vector.broadcast %772 : f32 to vector<8x16xf32>
    %774 = arith.mulf %771, %773 : vector<8x16xf32>
    %775 = arith.addf %770, %774 : vector<8x16xf32>
    %776 = vector.extract_strided_slice %674 {offsets = [4, 0], sizes = [8, 16], strides = [1, 1]} : vector<12x20xf32> to vector<8x16xf32>
    %c1_344 = arith.constant 1 : index
    %c20_345 = arith.constant 20 : index
    %777 = memref.load %arg12[%c1_344, %c20_345] : memref<4x25xf32, #tpu.memory_space<smem>>
    %778 = vector.broadcast %777 : f32 to vector<8x16xf32>
    %779 = arith.mulf %776, %778 : vector<8x16xf32>
    %780 = arith.addf %775, %779 : vector<8x16xf32>
    %781 = vector.extract_strided_slice %674 {offsets = [4, 1], sizes = [8, 16], strides = [1, 1]} : vector<12x20xf32> to vector<8x16xf32>
    %c1_346 = arith.constant 1 : index
    %c21_347 = arith.constant 21 : index
    %782 = memref.load %arg12[%c1_346, %c21_347] : memref<4x25xf32, #tpu.memory_space<smem>>
    %783 = vector.broadcast %782 : f32 to vector<8x16xf32>
    %784 = arith.mulf %781, %783 : vector<8x16xf32>
    %785 = arith.addf %780, %784 : vector<8x16xf32>
    %786 = vector.extract_strided_slice %674 {offsets = [4, 2], sizes = [8, 16], strides = [1, 1]} : vector<12x20xf32> to vector<8x16xf32>
    %c1_348 = arith.constant 1 : index
    %c22_349 = arith.constant 22 : index
    %787 = memref.load %arg12[%c1_348, %c22_349] : memref<4x25xf32, #tpu.memory_space<smem>>
    %788 = vector.broadcast %787 : f32 to vector<8x16xf32>
    %789 = arith.mulf %786, %788 : vector<8x16xf32>
    %790 = arith.addf %785, %789 : vector<8x16xf32>
    %791 = vector.extract_strided_slice %674 {offsets = [4, 3], sizes = [8, 16], strides = [1, 1]} : vector<12x20xf32> to vector<8x16xf32>
    %c1_350 = arith.constant 1 : index
    %c23_351 = arith.constant 23 : index
    %792 = memref.load %arg12[%c1_350, %c23_351] : memref<4x25xf32, #tpu.memory_space<smem>>
    %793 = vector.broadcast %792 : f32 to vector<8x16xf32>
    %794 = arith.mulf %791, %793 : vector<8x16xf32>
    %795 = arith.addf %790, %794 : vector<8x16xf32>
    %796 = vector.extract_strided_slice %674 {offsets = [4, 4], sizes = [8, 16], strides = [1, 1]} : vector<12x20xf32> to vector<8x16xf32>
    %c1_352 = arith.constant 1 : index
    %c24_353 = arith.constant 24 : index
    %797 = memref.load %arg12[%c1_352, %c24_353] : memref<4x25xf32, #tpu.memory_space<smem>>
    %798 = vector.broadcast %797 : f32 to vector<8x16xf32>
    %799 = arith.mulf %796, %798 : vector<8x16xf32>
    %800 = arith.addf %795, %799 : vector<8x16xf32>
    %c1_354 = arith.constant 1 : index
    %801 = memref.load %arg13[%c1_354] : memref<4xf32, #tpu.memory_space<smem>>
    %802 = vector.broadcast %801 : f32 to vector<8x16xf32>
    %803 = arith.mulf %800, %802 : vector<8x16xf32>
    %c1_355 = arith.constant 1 : index
    %804 = memref.load %arg14[%c1_355] : memref<4xf32, #tpu.memory_space<smem>>
    %805 = vector.broadcast %804 : f32 to vector<8x16xf32>
    %806 = arith.addf %803, %805 : vector<8x16xf32>
    %807 = vector.extract_strided_slice %674 {offsets = [2, 2], sizes = [8, 16], strides = [1, 1]} : vector<12x20xf32> to vector<8x16xf32>
    %c4_i32_356 = arith.constant 4 : i32
    %808 = arith.addi %1, %c4_i32_356 : i32
    %c0_357 = arith.constant 0 : index
    %c1_358 = arith.constant 1 : index
    %809 = arith.index_cast %808 : i32 to index
    %c0_359 = arith.constant 0 : index
    %810 = vector.load %arg2[%c0_357, %c1_358, %809, %c0_359] : memref<1x8x24x16xf32, #tpu.memory_space<vmem>>, vector<1x1x8x16xf32>
    %811 = vector.shape_cast %810 : vector<1x1x8x16xf32> to vector<8x16xf32>
    %812 = arith.addf %807, %811 : vector<8x16xf32>
    %c0_360 = arith.constant 0 : index
    %c1_361 = arith.constant 1 : index
    %c0_362 = arith.constant 0 : index
    %c0_363 = arith.constant 0 : index
    %813 = vector.load %arg15[%c0_360, %c1_361, %c0_362, %c0_363] : memref<1x8x8x16xf32, #tpu.memory_space<vmem>>, vector<1x1x8x16xf32>
    %814 = vector.shape_cast %813 : vector<1x1x8x16xf32> to vector<8x16xf32>
    %815 = vector.shape_cast %812 : vector<8x16xf32> to vector<1x1x8x16xf32>
    tpu.vector_store %arg15[%c0_360, %c1_361, %c0_362, %c0_363], %815 {strides = array<i32>} : memref<1x8x8x16xf32, #tpu.memory_space<vmem>>, vector<1x1x8x16xf32>,
    %c4_i32_364 = arith.constant 4 : i32
    %816 = arith.addi %1, %c4_i32_364 : i32
    %c0_365 = arith.constant 0 : index
    %c5_366 = arith.constant 5 : index
    %817 = arith.index_cast %816 : i32 to index
    %c0_367 = arith.constant 0 : index
    %818 = vector.load %arg2[%c0_365, %c5_366, %817, %c0_367] : memref<1x8x24x16xf32, #tpu.memory_space<vmem>>, vector<1x1x8x16xf32>
    %819 = vector.shape_cast %818 : vector<1x1x8x16xf32> to vector<8x16xf32>
    %820 = arith.addf %806, %819 : vector<8x16xf32>
    %c0_368 = arith.constant 0 : index
    %c5_369 = arith.constant 5 : index
    %c0_370 = arith.constant 0 : index
    %c0_371 = arith.constant 0 : index
    %821 = vector.load %arg15[%c0_368, %c5_369, %c0_370, %c0_371] : memref<1x8x8x16xf32, #tpu.memory_space<vmem>>, vector<1x1x8x16xf32>
    %822 = vector.shape_cast %821 : vector<1x1x8x16xf32> to vector<8x16xf32>
    %823 = vector.shape_cast %820 : vector<8x16xf32> to vector<1x1x8x16xf32>
    tpu.vector_store %arg15[%c0_368, %c5_369, %c0_370, %c0_371], %823 {strides = array<i32>} : memref<1x8x8x16xf32, #tpu.memory_space<vmem>>, vector<1x1x8x16xf32>,
    %c0_372 = arith.constant 0 : index
    %c2_373 = arith.constant 2 : index
    %824 = memref.load %arg9[%c0_372, %c2_373] : memref<4x4xf32, #tpu.memory_space<smem>>
    %825 = vector.broadcast %824 : f32 to vector<12x16xf32>
    %826 = arith.mulf %246, %825 : vector<12x16xf32>
    %c1_374 = arith.constant 1 : index
    %c2_375 = arith.constant 2 : index
    %827 = memref.load %arg9[%c1_374, %c2_375] : memref<4x4xf32, #tpu.memory_space<smem>>
    %828 = vector.broadcast %827 : f32 to vector<12x16xf32>
    %829 = arith.mulf %449, %828 : vector<12x16xf32>
    %830 = arith.addf %826, %829 : vector<12x16xf32>
    %c2_376 = arith.constant 2 : index
    %c2_377 = arith.constant 2 : index
    %831 = memref.load %arg9[%c2_376, %c2_377] : memref<4x4xf32, #tpu.memory_space<smem>>
    %832 = vector.broadcast %831 : f32 to vector<12x16xf32>
    %833 = arith.mulf %245, %832 : vector<12x16xf32>
    %834 = arith.addf %830, %833 : vector<12x16xf32>
    %c3_378 = arith.constant 3 : index
    %c2_379 = arith.constant 2 : index
    %835 = memref.load %arg9[%c3_378, %c2_379] : memref<4x4xf32, #tpu.memory_space<smem>>
    %836 = vector.broadcast %835 : f32 to vector<12x16xf32>
    %837 = arith.mulf %448, %836 : vector<12x16xf32>
    %838 = arith.addf %834, %837 : vector<12x16xf32>
    %c2_380 = arith.constant 2 : index
    %839 = memref.load %arg10[%c2_380] : memref<4xf32, #tpu.memory_space<smem>>
    %840 = vector.broadcast %839 : f32 to vector<12x16xf32>
    %841 = arith.mulf %838, %840 : vector<12x16xf32>
    %c2_381 = arith.constant 2 : index
    %842 = memref.load %arg11[%c2_381] : memref<4xf32, #tpu.memory_space<smem>>
    %843 = vector.broadcast %842 : f32 to vector<12x16xf32>
    %844 = arith.addf %841, %843 : vector<12x16xf32>
    %cst_382 = arith.constant 0.000000e+00 : f32
    %845 = vector.broadcast %cst_382 : f32 to vector<12x2xf32>
    %c2_383 = arith.constant 2 : index
    %c0_384 = arith.constant 0 : index
    %c0_385 = arith.constant 0 : index
    %846 = vector.load %arg17[%c2_383, %c0_384, %c0_385] : memref<4x12x20xf32, #tpu.memory_space<vmem>>, vector<1x12x2xf32>
    %847 = vector.shape_cast %846 : vector<1x12x2xf32> to vector<12x2xf32>
    %848 = vector.shape_cast %845 : vector<12x2xf32> to vector<1x12x2xf32>
    tpu.vector_store %arg17[%c2_383, %c0_384, %c0_385], %848 {strides = array<i32>} : memref<4x12x20xf32, #tpu.memory_space<vmem>>, vector<1x12x2xf32>,
    %cst_386 = arith.constant 0.000000e+00 : f32
    %849 = vector.broadcast %cst_386 : f32 to vector<12x2xf32>
    %c2_387 = arith.constant 2 : index
    %c0_388 = arith.constant 0 : index
    %c18_389 = arith.constant 18 : index
    %850 = vector.load %arg17[%c2_387, %c0_388, %c18_389] : memref<4x12x20xf32, #tpu.memory_space<vmem>>, vector<1x12x2xf32>
    %851 = vector.shape_cast %850 : vector<1x12x2xf32> to vector<12x2xf32>
    %852 = vector.shape_cast %849 : vector<12x2xf32> to vector<1x12x2xf32>
    tpu.vector_store %arg17[%c2_387, %c0_388, %c18_389], %852 {strides = array<i32>} : memref<4x12x20xf32, #tpu.memory_space<vmem>>, vector<1x12x2xf32>,
    %cst_390 = arith.constant 0.000000e+00 : f32
    %853 = vector.shape_cast %19 : vector<12x1xi1> to vector<12x1xi1>
    %854 = vector.broadcast %853 : vector<12x1xi1> to vector<12x16xi1>
    %855 = vector.broadcast %cst_390 : f32 to vector<12x16xf32>
    %856 = arith.select %854, %844, %855 : vector<12x16xi1>, vector<12x16xf32>
    %c2_391 = arith.constant 2 : index
    %c0_392 = arith.constant 0 : index
    %c2_393 = arith.constant 2 : index
    %857 = vector.load %arg17[%c2_391, %c0_392, %c2_393] : memref<4x12x20xf32, #tpu.memory_space<vmem>>, vector<1x12x16xf32>
    %858 = vector.shape_cast %857 : vector<1x12x16xf32> to vector<12x16xf32>
    %859 = vector.shape_cast %856 : vector<12x16xf32> to vector<1x12x16xf32>
    tpu.vector_store %arg17[%c2_391, %c0_392, %c2_393], %859 {strides = array<i32>} : memref<4x12x20xf32, #tpu.memory_space<vmem>>, vector<1x12x16xf32>,
    %c2_394 = arith.constant 2 : index
    %c0_395 = arith.constant 0 : index
    %c0_396 = arith.constant 0 : index
    %860 = vector.load %arg17[%c2_394, %c0_395, %c0_396] : memref<4x12x20xf32, #tpu.memory_space<vmem>>, vector<1x12x20xf32>
    %861 = vector.shape_cast %860 : vector<1x12x20xf32> to vector<12x20xf32>
    %cst_397 = arith.constant 0.000000e+00 : f32
    %862 = vector.broadcast %cst_397 : f32 to vector<8x16xf32>
    %863 = vector.extract_strided_slice %861 {offsets = [0, 0], sizes = [8, 16], strides = [1, 1]} : vector<12x20xf32> to vector<8x16xf32>
    %c2_398 = arith.constant 2 : index
    %c0_399 = arith.constant 0 : index
    %864 = memref.load %arg12[%c2_398, %c0_399] : memref<4x25xf32, #tpu.memory_space<smem>>
    %865 = vector.broadcast %864 : f32 to vector<8x16xf32>
    %866 = arith.mulf %863, %865 : vector<8x16xf32>
    %867 = arith.addf %862, %866 : vector<8x16xf32>
    %868 = vector.extract_strided_slice %861 {offsets = [0, 1], sizes = [8, 16], strides = [1, 1]} : vector<12x20xf32> to vector<8x16xf32>
    %c2_400 = arith.constant 2 : index
    %c1_401 = arith.constant 1 : index
    %869 = memref.load %arg12[%c2_400, %c1_401] : memref<4x25xf32, #tpu.memory_space<smem>>
    %870 = vector.broadcast %869 : f32 to vector<8x16xf32>
    %871 = arith.mulf %868, %870 : vector<8x16xf32>
    %872 = arith.addf %867, %871 : vector<8x16xf32>
    %873 = vector.extract_strided_slice %861 {offsets = [0, 2], sizes = [8, 16], strides = [1, 1]} : vector<12x20xf32> to vector<8x16xf32>
    %c2_402 = arith.constant 2 : index
    %c2_403 = arith.constant 2 : index
    %874 = memref.load %arg12[%c2_402, %c2_403] : memref<4x25xf32, #tpu.memory_space<smem>>
    %875 = vector.broadcast %874 : f32 to vector<8x16xf32>
    %876 = arith.mulf %873, %875 : vector<8x16xf32>
    %877 = arith.addf %872, %876 : vector<8x16xf32>
    %878 = vector.extract_strided_slice %861 {offsets = [0, 3], sizes = [8, 16], strides = [1, 1]} : vector<12x20xf32> to vector<8x16xf32>
    %c2_404 = arith.constant 2 : index
    %c3_405 = arith.constant 3 : index
    %879 = memref.load %arg12[%c2_404, %c3_405] : memref<4x25xf32, #tpu.memory_space<smem>>
    %880 = vector.broadcast %879 : f32 to vector<8x16xf32>
    %881 = arith.mulf %878, %880 : vector<8x16xf32>
    %882 = arith.addf %877, %881 : vector<8x16xf32>
    %883 = vector.extract_strided_slice %861 {offsets = [0, 4], sizes = [8, 16], strides = [1, 1]} : vector<12x20xf32> to vector<8x16xf32>
    %c2_406 = arith.constant 2 : index
    %c4_407 = arith.constant 4 : index
    %884 = memref.load %arg12[%c2_406, %c4_407] : memref<4x25xf32, #tpu.memory_space<smem>>
    %885 = vector.broadcast %884 : f32 to vector<8x16xf32>
    %886 = arith.mulf %883, %885 : vector<8x16xf32>
    %887 = arith.addf %882, %886 : vector<8x16xf32>
    %888 = vector.extract_strided_slice %861 {offsets = [1, 0], sizes = [8, 16], strides = [1, 1]} : vector<12x20xf32> to vector<8x16xf32>
    %c2_408 = arith.constant 2 : index
    %c5_409 = arith.constant 5 : index
    %889 = memref.load %arg12[%c2_408, %c5_409] : memref<4x25xf32, #tpu.memory_space<smem>>
    %890 = vector.broadcast %889 : f32 to vector<8x16xf32>
    %891 = arith.mulf %888, %890 : vector<8x16xf32>
    %892 = arith.addf %887, %891 : vector<8x16xf32>
    %893 = vector.extract_strided_slice %861 {offsets = [1, 1], sizes = [8, 16], strides = [1, 1]} : vector<12x20xf32> to vector<8x16xf32>
    %c2_410 = arith.constant 2 : index
    %c6_411 = arith.constant 6 : index
    %894 = memref.load %arg12[%c2_410, %c6_411] : memref<4x25xf32, #tpu.memory_space<smem>>
    %895 = vector.broadcast %894 : f32 to vector<8x16xf32>
    %896 = arith.mulf %893, %895 : vector<8x16xf32>
    %897 = arith.addf %892, %896 : vector<8x16xf32>
    %898 = vector.extract_strided_slice %861 {offsets = [1, 2], sizes = [8, 16], strides = [1, 1]} : vector<12x20xf32> to vector<8x16xf32>
    %c2_412 = arith.constant 2 : index
    %c7_413 = arith.constant 7 : index
    %899 = memref.load %arg12[%c2_412, %c7_413] : memref<4x25xf32, #tpu.memory_space<smem>>
    %900 = vector.broadcast %899 : f32 to vector<8x16xf32>
    %901 = arith.mulf %898, %900 : vector<8x16xf32>
    %902 = arith.addf %897, %901 : vector<8x16xf32>
    %903 = vector.extract_strided_slice %861 {offsets = [1, 3], sizes = [8, 16], strides = [1, 1]} : vector<12x20xf32> to vector<8x16xf32>
    %c2_414 = arith.constant 2 : index
    %c8_415 = arith.constant 8 : index
    %904 = memref.load %arg12[%c2_414, %c8_415] : memref<4x25xf32, #tpu.memory_space<smem>>
    %905 = vector.broadcast %904 : f32 to vector<8x16xf32>
    %906 = arith.mulf %903, %905 : vector<8x16xf32>
    %907 = arith.addf %902, %906 : vector<8x16xf32>
    %908 = vector.extract_strided_slice %861 {offsets = [1, 4], sizes = [8, 16], strides = [1, 1]} : vector<12x20xf32> to vector<8x16xf32>
    %c2_416 = arith.constant 2 : index
    %c9_417 = arith.constant 9 : index
    %909 = memref.load %arg12[%c2_416, %c9_417] : memref<4x25xf32, #tpu.memory_space<smem>>
    %910 = vector.broadcast %909 : f32 to vector<8x16xf32>
    %911 = arith.mulf %908, %910 : vector<8x16xf32>
    %912 = arith.addf %907, %911 : vector<8x16xf32>
    %913 = vector.extract_strided_slice %861 {offsets = [2, 0], sizes = [8, 16], strides = [1, 1]} : vector<12x20xf32> to vector<8x16xf32>
    %c2_418 = arith.constant 2 : index
    %c10_419 = arith.constant 10 : index
    %914 = memref.load %arg12[%c2_418, %c10_419] : memref<4x25xf32, #tpu.memory_space<smem>>
    %915 = vector.broadcast %914 : f32 to vector<8x16xf32>
    %916 = arith.mulf %913, %915 : vector<8x16xf32>
    %917 = arith.addf %912, %916 : vector<8x16xf32>
    %918 = vector.extract_strided_slice %861 {offsets = [2, 1], sizes = [8, 16], strides = [1, 1]} : vector<12x20xf32> to vector<8x16xf32>
    %c2_420 = arith.constant 2 : index
    %c11_421 = arith.constant 11 : index
    %919 = memref.load %arg12[%c2_420, %c11_421] : memref<4x25xf32, #tpu.memory_space<smem>>
    %920 = vector.broadcast %919 : f32 to vector<8x16xf32>
    %921 = arith.mulf %918, %920 : vector<8x16xf32>
    %922 = arith.addf %917, %921 : vector<8x16xf32>
    %923 = vector.extract_strided_slice %861 {offsets = [2, 2], sizes = [8, 16], strides = [1, 1]} : vector<12x20xf32> to vector<8x16xf32>
    %c2_422 = arith.constant 2 : index
    %c12_423 = arith.constant 12 : index
    %924 = memref.load %arg12[%c2_422, %c12_423] : memref<4x25xf32, #tpu.memory_space<smem>>
    %925 = vector.broadcast %924 : f32 to vector<8x16xf32>
    %926 = arith.mulf %923, %925 : vector<8x16xf32>
    %927 = arith.addf %922, %926 : vector<8x16xf32>
    %928 = vector.extract_strided_slice %861 {offsets = [2, 3], sizes = [8, 16], strides = [1, 1]} : vector<12x20xf32> to vector<8x16xf32>
    %c2_424 = arith.constant 2 : index
    %c13_425 = arith.constant 13 : index
    %929 = memref.load %arg12[%c2_424, %c13_425] : memref<4x25xf32, #tpu.memory_space<smem>>
    %930 = vector.broadcast %929 : f32 to vector<8x16xf32>
    %931 = arith.mulf %928, %930 : vector<8x16xf32>
    %932 = arith.addf %927, %931 : vector<8x16xf32>
    %933 = vector.extract_strided_slice %861 {offsets = [2, 4], sizes = [8, 16], strides = [1, 1]} : vector<12x20xf32> to vector<8x16xf32>
    %c2_426 = arith.constant 2 : index
    %c14_427 = arith.constant 14 : index
    %934 = memref.load %arg12[%c2_426, %c14_427] : memref<4x25xf32, #tpu.memory_space<smem>>
    %935 = vector.broadcast %934 : f32 to vector<8x16xf32>
    %936 = arith.mulf %933, %935 : vector<8x16xf32>
    %937 = arith.addf %932, %936 : vector<8x16xf32>
    %938 = vector.extract_strided_slice %861 {offsets = [3, 0], sizes = [8, 16], strides = [1, 1]} : vector<12x20xf32> to vector<8x16xf32>
    %c2_428 = arith.constant 2 : index
    %c15_429 = arith.constant 15 : index
    %939 = memref.load %arg12[%c2_428, %c15_429] : memref<4x25xf32, #tpu.memory_space<smem>>
    %940 = vector.broadcast %939 : f32 to vector<8x16xf32>
    %941 = arith.mulf %938, %940 : vector<8x16xf32>
    %942 = arith.addf %937, %941 : vector<8x16xf32>
    %943 = vector.extract_strided_slice %861 {offsets = [3, 1], sizes = [8, 16], strides = [1, 1]} : vector<12x20xf32> to vector<8x16xf32>
    %c2_430 = arith.constant 2 : index
    %c16_431 = arith.constant 16 : index
    %944 = memref.load %arg12[%c2_430, %c16_431] : memref<4x25xf32, #tpu.memory_space<smem>>
    %945 = vector.broadcast %944 : f32 to vector<8x16xf32>
    %946 = arith.mulf %943, %945 : vector<8x16xf32>
    %947 = arith.addf %942, %946 : vector<8x16xf32>
    %948 = vector.extract_strided_slice %861 {offsets = [3, 2], sizes = [8, 16], strides = [1, 1]} : vector<12x20xf32> to vector<8x16xf32>
    %c2_432 = arith.constant 2 : index
    %c17_433 = arith.constant 17 : index
    %949 = memref.load %arg12[%c2_432, %c17_433] : memref<4x25xf32, #tpu.memory_space<smem>>
    %950 = vector.broadcast %949 : f32 to vector<8x16xf32>
    %951 = arith.mulf %948, %950 : vector<8x16xf32>
    %952 = arith.addf %947, %951 : vector<8x16xf32>
    %953 = vector.extract_strided_slice %861 {offsets = [3, 3], sizes = [8, 16], strides = [1, 1]} : vector<12x20xf32> to vector<8x16xf32>
    %c2_434 = arith.constant 2 : index
    %c18_435 = arith.constant 18 : index
    %954 = memref.load %arg12[%c2_434, %c18_435] : memref<4x25xf32, #tpu.memory_space<smem>>
    %955 = vector.broadcast %954 : f32 to vector<8x16xf32>
    %956 = arith.mulf %953, %955 : vector<8x16xf32>
    %957 = arith.addf %952, %956 : vector<8x16xf32>
    %958 = vector.extract_strided_slice %861 {offsets = [3, 4], sizes = [8, 16], strides = [1, 1]} : vector<12x20xf32> to vector<8x16xf32>
    %c2_436 = arith.constant 2 : index
    %c19_437 = arith.constant 19 : index
    %959 = memref.load %arg12[%c2_436, %c19_437] : memref<4x25xf32, #tpu.memory_space<smem>>
    %960 = vector.broadcast %959 : f32 to vector<8x16xf32>
    %961 = arith.mulf %958, %960 : vector<8x16xf32>
    %962 = arith.addf %957, %961 : vector<8x16xf32>
    %963 = vector.extract_strided_slice %861 {offsets = [4, 0], sizes = [8, 16], strides = [1, 1]} : vector<12x20xf32> to vector<8x16xf32>
    %c2_438 = arith.constant 2 : index
    %c20_439 = arith.constant 20 : index
    %964 = memref.load %arg12[%c2_438, %c20_439] : memref<4x25xf32, #tpu.memory_space<smem>>
    %965 = vector.broadcast %964 : f32 to vector<8x16xf32>
    %966 = arith.mulf %963, %965 : vector<8x16xf32>
    %967 = arith.addf %962, %966 : vector<8x16xf32>
    %968 = vector.extract_strided_slice %861 {offsets = [4, 1], sizes = [8, 16], strides = [1, 1]} : vector<12x20xf32> to vector<8x16xf32>
    %c2_440 = arith.constant 2 : index
    %c21_441 = arith.constant 21 : index
    %969 = memref.load %arg12[%c2_440, %c21_441] : memref<4x25xf32, #tpu.memory_space<smem>>
    %970 = vector.broadcast %969 : f32 to vector<8x16xf32>
    %971 = arith.mulf %968, %970 : vector<8x16xf32>
    %972 = arith.addf %967, %971 : vector<8x16xf32>
    %973 = vector.extract_strided_slice %861 {offsets = [4, 2], sizes = [8, 16], strides = [1, 1]} : vector<12x20xf32> to vector<8x16xf32>
    %c2_442 = arith.constant 2 : index
    %c22_443 = arith.constant 22 : index
    %974 = memref.load %arg12[%c2_442, %c22_443] : memref<4x25xf32, #tpu.memory_space<smem>>
    %975 = vector.broadcast %974 : f32 to vector<8x16xf32>
    %976 = arith.mulf %973, %975 : vector<8x16xf32>
    %977 = arith.addf %972, %976 : vector<8x16xf32>
    %978 = vector.extract_strided_slice %861 {offsets = [4, 3], sizes = [8, 16], strides = [1, 1]} : vector<12x20xf32> to vector<8x16xf32>
    %c2_444 = arith.constant 2 : index
    %c23_445 = arith.constant 23 : index
    %979 = memref.load %arg12[%c2_444, %c23_445] : memref<4x25xf32, #tpu.memory_space<smem>>
    %980 = vector.broadcast %979 : f32 to vector<8x16xf32>
    %981 = arith.mulf %978, %980 : vector<8x16xf32>
    %982 = arith.addf %977, %981 : vector<8x16xf32>
    %983 = vector.extract_strided_slice %861 {offsets = [4, 4], sizes = [8, 16], strides = [1, 1]} : vector<12x20xf32> to vector<8x16xf32>
    %c2_446 = arith.constant 2 : index
    %c24_447 = arith.constant 24 : index
    %984 = memref.load %arg12[%c2_446, %c24_447] : memref<4x25xf32, #tpu.memory_space<smem>>
    %985 = vector.broadcast %984 : f32 to vector<8x16xf32>
    %986 = arith.mulf %983, %985 : vector<8x16xf32>
    %987 = arith.addf %982, %986 : vector<8x16xf32>
    %c2_448 = arith.constant 2 : index
    %988 = memref.load %arg13[%c2_448] : memref<4xf32, #tpu.memory_space<smem>>
    %989 = vector.broadcast %988 : f32 to vector<8x16xf32>
    %990 = arith.mulf %987, %989 : vector<8x16xf32>
    %c2_449 = arith.constant 2 : index
    %991 = memref.load %arg14[%c2_449] : memref<4xf32, #tpu.memory_space<smem>>
    %992 = vector.broadcast %991 : f32 to vector<8x16xf32>
    %993 = arith.addf %990, %992 : vector<8x16xf32>
    %994 = vector.extract_strided_slice %861 {offsets = [2, 2], sizes = [8, 16], strides = [1, 1]} : vector<12x20xf32> to vector<8x16xf32>
    %c4_i32_450 = arith.constant 4 : i32
    %995 = arith.addi %1, %c4_i32_450 : i32
    %c0_451 = arith.constant 0 : index
    %c2_452 = arith.constant 2 : index
    %996 = arith.index_cast %995 : i32 to index
    %c0_453 = arith.constant 0 : index
    %997 = vector.load %arg2[%c0_451, %c2_452, %996, %c0_453] : memref<1x8x24x16xf32, #tpu.memory_space<vmem>>, vector<1x1x8x16xf32>
    %998 = vector.shape_cast %997 : vector<1x1x8x16xf32> to vector<8x16xf32>
    %999 = arith.addf %994, %998 : vector<8x16xf32>
    %c0_454 = arith.constant 0 : index
    %c2_455 = arith.constant 2 : index
    %c0_456 = arith.constant 0 : index
    %c0_457 = arith.constant 0 : index
    %1000 = vector.load %arg15[%c0_454, %c2_455, %c0_456, %c0_457] : memref<1x8x8x16xf32, #tpu.memory_space<vmem>>, vector<1x1x8x16xf32>
    %1001 = vector.shape_cast %1000 : vector<1x1x8x16xf32> to vector<8x16xf32>
    %1002 = vector.shape_cast %999 : vector<8x16xf32> to vector<1x1x8x16xf32>
    tpu.vector_store %arg15[%c0_454, %c2_455, %c0_456, %c0_457], %1002 {strides = array<i32>} : memref<1x8x8x16xf32, #tpu.memory_space<vmem>>, vector<1x1x8x16xf32>,
    %c4_i32_458 = arith.constant 4 : i32
    %1003 = arith.addi %1, %c4_i32_458 : i32
    %c0_459 = arith.constant 0 : index
    %c6_460 = arith.constant 6 : index
    %1004 = arith.index_cast %1003 : i32 to index
    %c0_461 = arith.constant 0 : index
    %1005 = vector.load %arg2[%c0_459, %c6_460, %1004, %c0_461] : memref<1x8x24x16xf32, #tpu.memory_space<vmem>>, vector<1x1x8x16xf32>
    %1006 = vector.shape_cast %1005 : vector<1x1x8x16xf32> to vector<8x16xf32>
    %1007 = arith.addf %993, %1006 : vector<8x16xf32>
    %c0_462 = arith.constant 0 : index
    %c6_463 = arith.constant 6 : index
    %c0_464 = arith.constant 0 : index
    %c0_465 = arith.constant 0 : index
    %1008 = vector.load %arg15[%c0_462, %c6_463, %c0_464, %c0_465] : memref<1x8x8x16xf32, #tpu.memory_space<vmem>>, vector<1x1x8x16xf32>
    %1009 = vector.shape_cast %1008 : vector<1x1x8x16xf32> to vector<8x16xf32>
    %1010 = vector.shape_cast %1007 : vector<8x16xf32> to vector<1x1x8x16xf32>
    tpu.vector_store %arg15[%c0_462, %c6_463, %c0_464, %c0_465], %1010 {strides = array<i32>} : memref<1x8x8x16xf32, #tpu.memory_space<vmem>>, vector<1x1x8x16xf32>,
    %c0_466 = arith.constant 0 : index
    %c3_467 = arith.constant 3 : index
    %1011 = memref.load %arg9[%c0_466, %c3_467] : memref<4x4xf32, #tpu.memory_space<smem>>
    %1012 = vector.broadcast %1011 : f32 to vector<12x16xf32>
    %1013 = arith.mulf %246, %1012 : vector<12x16xf32>
    %c1_468 = arith.constant 1 : index
    %c3_469 = arith.constant 3 : index
    %1014 = memref.load %arg9[%c1_468, %c3_469] : memref<4x4xf32, #tpu.memory_space<smem>>
    %1015 = vector.broadcast %1014 : f32 to vector<12x16xf32>
    %1016 = arith.mulf %449, %1015 : vector<12x16xf32>
    %1017 = arith.addf %1013, %1016 : vector<12x16xf32>
    %c2_470 = arith.constant 2 : index
    %c3_471 = arith.constant 3 : index
    %1018 = memref.load %arg9[%c2_470, %c3_471] : memref<4x4xf32, #tpu.memory_space<smem>>
    %1019 = vector.broadcast %1018 : f32 to vector<12x16xf32>
    %1020 = arith.mulf %245, %1019 : vector<12x16xf32>
    %1021 = arith.addf %1017, %1020 : vector<12x16xf32>
    %c3_472 = arith.constant 3 : index
    %c3_473 = arith.constant 3 : index
    %1022 = memref.load %arg9[%c3_472, %c3_473] : memref<4x4xf32, #tpu.memory_space<smem>>
    %1023 = vector.broadcast %1022 : f32 to vector<12x16xf32>
    %1024 = arith.mulf %448, %1023 : vector<12x16xf32>
    %1025 = arith.addf %1021, %1024 : vector<12x16xf32>
    %c3_474 = arith.constant 3 : index
    %1026 = memref.load %arg10[%c3_474] : memref<4xf32, #tpu.memory_space<smem>>
    %1027 = vector.broadcast %1026 : f32 to vector<12x16xf32>
    %1028 = arith.mulf %1025, %1027 : vector<12x16xf32>
    %c3_475 = arith.constant 3 : index
    %1029 = memref.load %arg11[%c3_475] : memref<4xf32, #tpu.memory_space<smem>>
    %1030 = vector.broadcast %1029 : f32 to vector<12x16xf32>
    %1031 = arith.addf %1028, %1030 : vector<12x16xf32>
    %cst_476 = arith.constant 0.000000e+00 : f32
    %1032 = vector.broadcast %cst_476 : f32 to vector<12x2xf32>
    %c3_477 = arith.constant 3 : index
    %c0_478 = arith.constant 0 : index
    %c0_479 = arith.constant 0 : index
    %1033 = vector.load %arg17[%c3_477, %c0_478, %c0_479] : memref<4x12x20xf32, #tpu.memory_space<vmem>>, vector<1x12x2xf32>
    %1034 = vector.shape_cast %1033 : vector<1x12x2xf32> to vector<12x2xf32>
    %1035 = vector.shape_cast %1032 : vector<12x2xf32> to vector<1x12x2xf32>
    tpu.vector_store %arg17[%c3_477, %c0_478, %c0_479], %1035 {strides = array<i32>} : memref<4x12x20xf32, #tpu.memory_space<vmem>>, vector<1x12x2xf32>,
    %cst_480 = arith.constant 0.000000e+00 : f32
    %1036 = vector.broadcast %cst_480 : f32 to vector<12x2xf32>
    %c3_481 = arith.constant 3 : index
    %c0_482 = arith.constant 0 : index
    %c18_483 = arith.constant 18 : index
    %1037 = vector.load %arg17[%c3_481, %c0_482, %c18_483] : memref<4x12x20xf32, #tpu.memory_space<vmem>>, vector<1x12x2xf32>
    %1038 = vector.shape_cast %1037 : vector<1x12x2xf32> to vector<12x2xf32>
    %1039 = vector.shape_cast %1036 : vector<12x2xf32> to vector<1x12x2xf32>
    tpu.vector_store %arg17[%c3_481, %c0_482, %c18_483], %1039 {strides = array<i32>} : memref<4x12x20xf32, #tpu.memory_space<vmem>>, vector<1x12x2xf32>,
    %cst_484 = arith.constant 0.000000e+00 : f32
    %1040 = vector.shape_cast %19 : vector<12x1xi1> to vector<12x1xi1>
    %1041 = vector.broadcast %1040 : vector<12x1xi1> to vector<12x16xi1>
    %1042 = vector.broadcast %cst_484 : f32 to vector<12x16xf32>
    %1043 = arith.select %1041, %1031, %1042 : vector<12x16xi1>, vector<12x16xf32>
    %c3_485 = arith.constant 3 : index
    %c0_486 = arith.constant 0 : index
    %c2_487 = arith.constant 2 : index
    %1044 = vector.load %arg17[%c3_485, %c0_486, %c2_487] : memref<4x12x20xf32, #tpu.memory_space<vmem>>, vector<1x12x16xf32>
    %1045 = vector.shape_cast %1044 : vector<1x12x16xf32> to vector<12x16xf32>
    %1046 = vector.shape_cast %1043 : vector<12x16xf32> to vector<1x12x16xf32>
    tpu.vector_store %arg17[%c3_485, %c0_486, %c2_487], %1046 {strides = array<i32>} : memref<4x12x20xf32, #tpu.memory_space<vmem>>, vector<1x12x16xf32>,
    %c3_488 = arith.constant 3 : index
    %c0_489 = arith.constant 0 : index
    %c0_490 = arith.constant 0 : index
    %1047 = vector.load %arg17[%c3_488, %c0_489, %c0_490] : memref<4x12x20xf32, #tpu.memory_space<vmem>>, vector<1x12x20xf32>
    %1048 = vector.shape_cast %1047 : vector<1x12x20xf32> to vector<12x20xf32>
    %cst_491 = arith.constant 0.000000e+00 : f32
    %1049 = vector.broadcast %cst_491 : f32 to vector<8x16xf32>
    %1050 = vector.extract_strided_slice %1048 {offsets = [0, 0], sizes = [8, 16], strides = [1, 1]} : vector<12x20xf32> to vector<8x16xf32>
    %c3_492 = arith.constant 3 : index
    %c0_493 = arith.constant 0 : index
    %1051 = memref.load %arg12[%c3_492, %c0_493] : memref<4x25xf32, #tpu.memory_space<smem>>
    %1052 = vector.broadcast %1051 : f32 to vector<8x16xf32>
    %1053 = arith.mulf %1050, %1052 : vector<8x16xf32>
    %1054 = arith.addf %1049, %1053 : vector<8x16xf32>
    %1055 = vector.extract_strided_slice %1048 {offsets = [0, 1], sizes = [8, 16], strides = [1, 1]} : vector<12x20xf32> to vector<8x16xf32>
    %c3_494 = arith.constant 3 : index
    %c1_495 = arith.constant 1 : index
    %1056 = memref.load %arg12[%c3_494, %c1_495] : memref<4x25xf32, #tpu.memory_space<smem>>
    %1057 = vector.broadcast %1056 : f32 to vector<8x16xf32>
    %1058 = arith.mulf %1055, %1057 : vector<8x16xf32>
    %1059 = arith.addf %1054, %1058 : vector<8x16xf32>
    %1060 = vector.extract_strided_slice %1048 {offsets = [0, 2], sizes = [8, 16], strides = [1, 1]} : vector<12x20xf32> to vector<8x16xf32>
    %c3_496 = arith.constant 3 : index
    %c2_497 = arith.constant 2 : index
    %1061 = memref.load %arg12[%c3_496, %c2_497] : memref<4x25xf32, #tpu.memory_space<smem>>
    %1062 = vector.broadcast %1061 : f32 to vector<8x16xf32>
    %1063 = arith.mulf %1060, %1062 : vector<8x16xf32>
    %1064 = arith.addf %1059, %1063 : vector<8x16xf32>
    %1065 = vector.extract_strided_slice %1048 {offsets = [0, 3], sizes = [8, 16], strides = [1, 1]} : vector<12x20xf32> to vector<8x16xf32>
    %c3_498 = arith.constant 3 : index
    %c3_499 = arith.constant 3 : index
    %1066 = memref.load %arg12[%c3_498, %c3_499] : memref<4x25xf32, #tpu.memory_space<smem>>
    %1067 = vector.broadcast %1066 : f32 to vector<8x16xf32>
    %1068 = arith.mulf %1065, %1067 : vector<8x16xf32>
    %1069 = arith.addf %1064, %1068 : vector<8x16xf32>
    %1070 = vector.extract_strided_slice %1048 {offsets = [0, 4], sizes = [8, 16], strides = [1, 1]} : vector<12x20xf32> to vector<8x16xf32>
    %c3_500 = arith.constant 3 : index
    %c4_501 = arith.constant 4 : index
    %1071 = memref.load %arg12[%c3_500, %c4_501] : memref<4x25xf32, #tpu.memory_space<smem>>
    %1072 = vector.broadcast %1071 : f32 to vector<8x16xf32>
    %1073 = arith.mulf %1070, %1072 : vector<8x16xf32>
    %1074 = arith.addf %1069, %1073 : vector<8x16xf32>
    %1075 = vector.extract_strided_slice %1048 {offsets = [1, 0], sizes = [8, 16], strides = [1, 1]} : vector<12x20xf32> to vector<8x16xf32>
    %c3_502 = arith.constant 3 : index
    %c5_503 = arith.constant 5 : index
    %1076 = memref.load %arg12[%c3_502, %c5_503] : memref<4x25xf32, #tpu.memory_space<smem>>
    %1077 = vector.broadcast %1076 : f32 to vector<8x16xf32>
    %1078 = arith.mulf %1075, %1077 : vector<8x16xf32>
    %1079 = arith.addf %1074, %1078 : vector<8x16xf32>
    %1080 = vector.extract_strided_slice %1048 {offsets = [1, 1], sizes = [8, 16], strides = [1, 1]} : vector<12x20xf32> to vector<8x16xf32>
    %c3_504 = arith.constant 3 : index
    %c6_505 = arith.constant 6 : index
    %1081 = memref.load %arg12[%c3_504, %c6_505] : memref<4x25xf32, #tpu.memory_space<smem>>
    %1082 = vector.broadcast %1081 : f32 to vector<8x16xf32>
    %1083 = arith.mulf %1080, %1082 : vector<8x16xf32>
    %1084 = arith.addf %1079, %1083 : vector<8x16xf32>
    %1085 = vector.extract_strided_slice %1048 {offsets = [1, 2], sizes = [8, 16], strides = [1, 1]} : vector<12x20xf32> to vector<8x16xf32>
    %c3_506 = arith.constant 3 : index
    %c7_507 = arith.constant 7 : index
    %1086 = memref.load %arg12[%c3_506, %c7_507] : memref<4x25xf32, #tpu.memory_space<smem>>
    %1087 = vector.broadcast %1086 : f32 to vector<8x16xf32>
    %1088 = arith.mulf %1085, %1087 : vector<8x16xf32>
    %1089 = arith.addf %1084, %1088 : vector<8x16xf32>
    %1090 = vector.extract_strided_slice %1048 {offsets = [1, 3], sizes = [8, 16], strides = [1, 1]} : vector<12x20xf32> to vector<8x16xf32>
    %c3_508 = arith.constant 3 : index
    %c8_509 = arith.constant 8 : index
    %1091 = memref.load %arg12[%c3_508, %c8_509] : memref<4x25xf32, #tpu.memory_space<smem>>
    %1092 = vector.broadcast %1091 : f32 to vector<8x16xf32>
    %1093 = arith.mulf %1090, %1092 : vector<8x16xf32>
    %1094 = arith.addf %1089, %1093 : vector<8x16xf32>
    %1095 = vector.extract_strided_slice %1048 {offsets = [1, 4], sizes = [8, 16], strides = [1, 1]} : vector<12x20xf32> to vector<8x16xf32>
    %c3_510 = arith.constant 3 : index
    %c9_511 = arith.constant 9 : index
    %1096 = memref.load %arg12[%c3_510, %c9_511] : memref<4x25xf32, #tpu.memory_space<smem>>
    %1097 = vector.broadcast %1096 : f32 to vector<8x16xf32>
    %1098 = arith.mulf %1095, %1097 : vector<8x16xf32>
    %1099 = arith.addf %1094, %1098 : vector<8x16xf32>
    %1100 = vector.extract_strided_slice %1048 {offsets = [2, 0], sizes = [8, 16], strides = [1, 1]} : vector<12x20xf32> to vector<8x16xf32>
    %c3_512 = arith.constant 3 : index
    %c10_513 = arith.constant 10 : index
    %1101 = memref.load %arg12[%c3_512, %c10_513] : memref<4x25xf32, #tpu.memory_space<smem>>
    %1102 = vector.broadcast %1101 : f32 to vector<8x16xf32>
    %1103 = arith.mulf %1100, %1102 : vector<8x16xf32>
    %1104 = arith.addf %1099, %1103 : vector<8x16xf32>
    %1105 = vector.extract_strided_slice %1048 {offsets = [2, 1], sizes = [8, 16], strides = [1, 1]} : vector<12x20xf32> to vector<8x16xf32>
    %c3_514 = arith.constant 3 : index
    %c11_515 = arith.constant 11 : index
    %1106 = memref.load %arg12[%c3_514, %c11_515] : memref<4x25xf32, #tpu.memory_space<smem>>
    %1107 = vector.broadcast %1106 : f32 to vector<8x16xf32>
    %1108 = arith.mulf %1105, %1107 : vector<8x16xf32>
    %1109 = arith.addf %1104, %1108 : vector<8x16xf32>
    %1110 = vector.extract_strided_slice %1048 {offsets = [2, 2], sizes = [8, 16], strides = [1, 1]} : vector<12x20xf32> to vector<8x16xf32>
    %c3_516 = arith.constant 3 : index
    %c12_517 = arith.constant 12 : index
    %1111 = memref.load %arg12[%c3_516, %c12_517] : memref<4x25xf32, #tpu.memory_space<smem>>
    %1112 = vector.broadcast %1111 : f32 to vector<8x16xf32>
    %1113 = arith.mulf %1110, %1112 : vector<8x16xf32>
    %1114 = arith.addf %1109, %1113 : vector<8x16xf32>
    %1115 = vector.extract_strided_slice %1048 {offsets = [2, 3], sizes = [8, 16], strides = [1, 1]} : vector<12x20xf32> to vector<8x16xf32>
    %c3_518 = arith.constant 3 : index
    %c13_519 = arith.constant 13 : index
    %1116 = memref.load %arg12[%c3_518, %c13_519] : memref<4x25xf32, #tpu.memory_space<smem>>
    %1117 = vector.broadcast %1116 : f32 to vector<8x16xf32>
    %1118 = arith.mulf %1115, %1117 : vector<8x16xf32>
    %1119 = arith.addf %1114, %1118 : vector<8x16xf32>
    %1120 = vector.extract_strided_slice %1048 {offsets = [2, 4], sizes = [8, 16], strides = [1, 1]} : vector<12x20xf32> to vector<8x16xf32>
    %c3_520 = arith.constant 3 : index
    %c14_521 = arith.constant 14 : index
    %1121 = memref.load %arg12[%c3_520, %c14_521] : memref<4x25xf32, #tpu.memory_space<smem>>
    %1122 = vector.broadcast %1121 : f32 to vector<8x16xf32>
    %1123 = arith.mulf %1120, %1122 : vector<8x16xf32>
    %1124 = arith.addf %1119, %1123 : vector<8x16xf32>
    %1125 = vector.extract_strided_slice %1048 {offsets = [3, 0], sizes = [8, 16], strides = [1, 1]} : vector<12x20xf32> to vector<8x16xf32>
    %c3_522 = arith.constant 3 : index
    %c15_523 = arith.constant 15 : index
    %1126 = memref.load %arg12[%c3_522, %c15_523] : memref<4x25xf32, #tpu.memory_space<smem>>
    %1127 = vector.broadcast %1126 : f32 to vector<8x16xf32>
    %1128 = arith.mulf %1125, %1127 : vector<8x16xf32>
    %1129 = arith.addf %1124, %1128 : vector<8x16xf32>
    %1130 = vector.extract_strided_slice %1048 {offsets = [3, 1], sizes = [8, 16], strides = [1, 1]} : vector<12x20xf32> to vector<8x16xf32>
    %c3_524 = arith.constant 3 : index
    %c16_525 = arith.constant 16 : index
    %1131 = memref.load %arg12[%c3_524, %c16_525] : memref<4x25xf32, #tpu.memory_space<smem>>
    %1132 = vector.broadcast %1131 : f32 to vector<8x16xf32>
    %1133 = arith.mulf %1130, %1132 : vector<8x16xf32>
    %1134 = arith.addf %1129, %1133 : vector<8x16xf32>
    %1135 = vector.extract_strided_slice %1048 {offsets = [3, 2], sizes = [8, 16], strides = [1, 1]} : vector<12x20xf32> to vector<8x16xf32>
    %c3_526 = arith.constant 3 : index
    %c17_527 = arith.constant 17 : index
    %1136 = memref.load %arg12[%c3_526, %c17_527] : memref<4x25xf32, #tpu.memory_space<smem>>
    %1137 = vector.broadcast %1136 : f32 to vector<8x16xf32>
    %1138 = arith.mulf %1135, %1137 : vector<8x16xf32>
    %1139 = arith.addf %1134, %1138 : vector<8x16xf32>
    %1140 = vector.extract_strided_slice %1048 {offsets = [3, 3], sizes = [8, 16], strides = [1, 1]} : vector<12x20xf32> to vector<8x16xf32>
    %c3_528 = arith.constant 3 : index
    %c18_529 = arith.constant 18 : index
    %1141 = memref.load %arg12[%c3_528, %c18_529] : memref<4x25xf32, #tpu.memory_space<smem>>
    %1142 = vector.broadcast %1141 : f32 to vector<8x16xf32>
    %1143 = arith.mulf %1140, %1142 : vector<8x16xf32>
    %1144 = arith.addf %1139, %1143 : vector<8x16xf32>
    %1145 = vector.extract_strided_slice %1048 {offsets = [3, 4], sizes = [8, 16], strides = [1, 1]} : vector<12x20xf32> to vector<8x16xf32>
    %c3_530 = arith.constant 3 : index
    %c19_531 = arith.constant 19 : index
    %1146 = memref.load %arg12[%c3_530, %c19_531] : memref<4x25xf32, #tpu.memory_space<smem>>
    %1147 = vector.broadcast %1146 : f32 to vector<8x16xf32>
    %1148 = arith.mulf %1145, %1147 : vector<8x16xf32>
    %1149 = arith.addf %1144, %1148 : vector<8x16xf32>
    %1150 = vector.extract_strided_slice %1048 {offsets = [4, 0], sizes = [8, 16], strides = [1, 1]} : vector<12x20xf32> to vector<8x16xf32>
    %c3_532 = arith.constant 3 : index
    %c20_533 = arith.constant 20 : index
    %1151 = memref.load %arg12[%c3_532, %c20_533] : memref<4x25xf32, #tpu.memory_space<smem>>
    %1152 = vector.broadcast %1151 : f32 to vector<8x16xf32>
    %1153 = arith.mulf %1150, %1152 : vector<8x16xf32>
    %1154 = arith.addf %1149, %1153 : vector<8x16xf32>
    %1155 = vector.extract_strided_slice %1048 {offsets = [4, 1], sizes = [8, 16], strides = [1, 1]} : vector<12x20xf32> to vector<8x16xf32>
    %c3_534 = arith.constant 3 : index
    %c21_535 = arith.constant 21 : index
    %1156 = memref.load %arg12[%c3_534, %c21_535] : memref<4x25xf32, #tpu.memory_space<smem>>
    %1157 = vector.broadcast %1156 : f32 to vector<8x16xf32>
    %1158 = arith.mulf %1155, %1157 : vector<8x16xf32>
    %1159 = arith.addf %1154, %1158 : vector<8x16xf32>
    %1160 = vector.extract_strided_slice %1048 {offsets = [4, 2], sizes = [8, 16], strides = [1, 1]} : vector<12x20xf32> to vector<8x16xf32>
    %c3_536 = arith.constant 3 : index
    %c22_537 = arith.constant 22 : index
    %1161 = memref.load %arg12[%c3_536, %c22_537] : memref<4x25xf32, #tpu.memory_space<smem>>
    %1162 = vector.broadcast %1161 : f32 to vector<8x16xf32>
    %1163 = arith.mulf %1160, %1162 : vector<8x16xf32>
    %1164 = arith.addf %1159, %1163 : vector<8x16xf32>
    %1165 = vector.extract_strided_slice %1048 {offsets = [4, 3], sizes = [8, 16], strides = [1, 1]} : vector<12x20xf32> to vector<8x16xf32>
    %c3_538 = arith.constant 3 : index
    %c23_539 = arith.constant 23 : index
    %1166 = memref.load %arg12[%c3_538, %c23_539] : memref<4x25xf32, #tpu.memory_space<smem>>
    %1167 = vector.broadcast %1166 : f32 to vector<8x16xf32>
    %1168 = arith.mulf %1165, %1167 : vector<8x16xf32>
    %1169 = arith.addf %1164, %1168 : vector<8x16xf32>
    %1170 = vector.extract_strided_slice %1048 {offsets = [4, 4], sizes = [8, 16], strides = [1, 1]} : vector<12x20xf32> to vector<8x16xf32>
    %c3_540 = arith.constant 3 : index
    %c24_541 = arith.constant 24 : index
    %1171 = memref.load %arg12[%c3_540, %c24_541] : memref<4x25xf32, #tpu.memory_space<smem>>
    %1172 = vector.broadcast %1171 : f32 to vector<8x16xf32>
    %1173 = arith.mulf %1170, %1172 : vector<8x16xf32>
    %1174 = arith.addf %1169, %1173 : vector<8x16xf32>
    %c3_542 = arith.constant 3 : index
    %1175 = memref.load %arg13[%c3_542] : memref<4xf32, #tpu.memory_space<smem>>
    %1176 = vector.broadcast %1175 : f32 to vector<8x16xf32>
    %1177 = arith.mulf %1174, %1176 : vector<8x16xf32>
    %c3_543 = arith.constant 3 : index
    %1178 = memref.load %arg14[%c3_543] : memref<4xf32, #tpu.memory_space<smem>>
    %1179 = vector.broadcast %1178 : f32 to vector<8x16xf32>
    %1180 = arith.addf %1177, %1179 : vector<8x16xf32>
    %1181 = vector.extract_strided_slice %1048 {offsets = [2, 2], sizes = [8, 16], strides = [1, 1]} : vector<12x20xf32> to vector<8x16xf32>
    %c4_i32_544 = arith.constant 4 : i32
    %1182 = arith.addi %1, %c4_i32_544 : i32
    %c0_545 = arith.constant 0 : index
    %c3_546 = arith.constant 3 : index
    %1183 = arith.index_cast %1182 : i32 to index
    %c0_547 = arith.constant 0 : index
    %1184 = vector.load %arg2[%c0_545, %c3_546, %1183, %c0_547] : memref<1x8x24x16xf32, #tpu.memory_space<vmem>>, vector<1x1x8x16xf32>
    %1185 = vector.shape_cast %1184 : vector<1x1x8x16xf32> to vector<8x16xf32>
    %1186 = arith.addf %1181, %1185 : vector<8x16xf32>
    %c0_548 = arith.constant 0 : index
    %c3_549 = arith.constant 3 : index
    %c0_550 = arith.constant 0 : index
    %c0_551 = arith.constant 0 : index
    %1187 = vector.load %arg15[%c0_548, %c3_549, %c0_550, %c0_551] : memref<1x8x8x16xf32, #tpu.memory_space<vmem>>, vector<1x1x8x16xf32>
    %1188 = vector.shape_cast %1187 : vector<1x1x8x16xf32> to vector<8x16xf32>
    %1189 = vector.shape_cast %1186 : vector<8x16xf32> to vector<1x1x8x16xf32>
    tpu.vector_store %arg15[%c0_548, %c3_549, %c0_550, %c0_551], %1189 {strides = array<i32>} : memref<1x8x8x16xf32, #tpu.memory_space<vmem>>, vector<1x1x8x16xf32>,
    %c4_i32_552 = arith.constant 4 : i32
    %1190 = arith.addi %1, %c4_i32_552 : i32
    %c0_553 = arith.constant 0 : index
    %c7_554 = arith.constant 7 : index
    %1191 = arith.index_cast %1190 : i32 to index
    %c0_555 = arith.constant 0 : index
    %1192 = vector.load %arg2[%c0_553, %c7_554, %1191, %c0_555] : memref<1x8x24x16xf32, #tpu.memory_space<vmem>>, vector<1x1x8x16xf32>
    %1193 = vector.shape_cast %1192 : vector<1x1x8x16xf32> to vector<8x16xf32>
    %1194 = arith.addf %1180, %1193 : vector<8x16xf32>
    %c0_556 = arith.constant 0 : index
    %c7_557 = arith.constant 7 : index
    %c0_558 = arith.constant 0 : index
    %c0_559 = arith.constant 0 : index
    %1195 = vector.load %arg15[%c0_556, %c7_557, %c0_558, %c0_559] : memref<1x8x8x16xf32, #tpu.memory_space<vmem>>, vector<1x1x8x16xf32>
    %1196 = vector.shape_cast %1195 : vector<1x1x8x16xf32> to vector<8x16xf32>
    %1197 = vector.shape_cast %1194 : vector<8x16xf32> to vector<1x1x8x16xf32>
    tpu.vector_store %arg15[%c0_556, %c7_557, %c0_558, %c0_559], %1197 {strides = array<i32>} : memref<1x8x8x16xf32, #tpu.memory_space<vmem>>, vector<1x1x8x16xf32>,
    return
  }
  func.func @transform_0(%arg0: i32, %arg1: i32) -> (i32, i32, i32, i32) {
    %c0_i32 = arith.constant 0 : i32
    %c0_i32_0 = arith.constant 0 : i32
    %c0_i32_1 = arith.constant 0 : i32
    %c0_i32_2 = arith.constant 0 : i32
    return %arg0, %c0_i32, %c0_i32_0, %c0_i32_1 : i32, i32, i32, i32
  }
  func.func @transform_1(%arg0: i32, %arg1: i32) -> (i32, i32) {
    %c0_i32 = arith.constant 0 : i32
    %c0_i32_0 = arith.constant 0 : i32
    %c0_i32_1 = arith.constant 0 : i32
    return %c0_i32, %c0_i32_0 : i32, i32
  }
  func.func @transform_2(%arg0: i32, %arg1: i32) -> i32 {
    %c0_i32 = arith.constant 0 : i32
    %c0_i32_0 = arith.constant 0 : i32
    return %c0_i32 : i32
  }
  func.func @transform_3(%arg0: i32, %arg1: i32) -> i32 {
    %c0_i32 = arith.constant 0 : i32
    %c0_i32_0 = arith.constant 0 : i32
    return %c0_i32 : i32
  }
  func.func @transform_4(%arg0: i32, %arg1: i32) -> (i32, i32) {
    %c0_i32 = arith.constant 0 : i32
    %c0_i32_0 = arith.constant 0 : i32
    %c0_i32_1 = arith.constant 0 : i32
    return %c0_i32, %c0_i32_0 : i32, i32
  }
  func.func @transform_5(%arg0: i32, %arg1: i32) -> i32 {
    %c0_i32 = arith.constant 0 : i32
    %c0_i32_0 = arith.constant 0 : i32
    return %c0_i32 : i32
  }
  func.func @transform_6(%arg0: i32, %arg1: i32) -> i32 {
    %c0_i32 = arith.constant 0 : i32
    %c0_i32_0 = arith.constant 0 : i32
    return %c0_i32 : i32
  }
  func.func @transform_7(%arg0: i32, %arg1: i32) -> (i32, i32) {
    %c0_i32 = arith.constant 0 : i32
    %c0_i32_0 = arith.constant 0 : i32
    %c0_i32_1 = arith.constant 0 : i32
    return %c0_i32, %c0_i32_0 : i32, i32
  }
  func.func @transform_8(%arg0: i32, %arg1: i32) -> i32 {
    %c0_i32 = arith.constant 0 : i32
    %c0_i32_0 = arith.constant 0 : i32
    return %c0_i32 : i32
  }
  func.func @transform_9(%arg0: i32, %arg1: i32) -> i32 {
    %c0_i32 = arith.constant 0 : i32
    %c0_i32_0 = arith.constant 0 : i32
    return %c0_i32 : i32
  }
  func.func @transform_10(%arg0: i32, %arg1: i32) -> (i32, i32) {
    %c0_i32 = arith.constant 0 : i32
    %c0_i32_0 = arith.constant 0 : i32
    %c0_i32_1 = arith.constant 0 : i32
    return %c0_i32, %c0_i32_0 : i32, i32
  }
  func.func @transform_11(%arg0: i32, %arg1: i32) -> i32 {
    %c0_i32 = arith.constant 0 : i32
    %c0_i32_0 = arith.constant 0 : i32
    return %c0_i32 : i32
  }
  func.func @transform_12(%arg0: i32, %arg1: i32) -> i32 {
    %c0_i32 = arith.constant 0 : i32
    %c0_i32_0 = arith.constant 0 : i32
    return %c0_i32 : i32
  }
  func.func @transform_13(%arg0: i32, %arg1: i32) -> (i32, i32, i32, i32) {
    %c0_i32 = arith.constant 0 : i32
    %c0_i32_0 = arith.constant 0 : i32
    %c0_i32_1 = arith.constant 0 : i32
    return %arg0, %c0_i32, %arg1, %c0_i32_0 : i32, i32, i32, i32
  }
}

</mosaic_0001>

<bundles_post_ra>
// kernel: tpu_custom_call.1
= control target key start
LH: loop header
LB: loop body
LE: loop exit
PB: predicated region body
PF: predicated region fallthrough
CT: control target
= control target key end

     0   :  { %s6935_s0 = inlined_call_operand.vmem [shape: f32[2,8,24,16], index: 0, kind: input, shape index: {}]   ;;  %s6936_s1 = inlined_call_operand.vmem [shape: f32[8,2], index: 1, kind: input, shape index: {}]   ;;  %s6937_s2 = inlined_call_operand.vmem [shape: f32[2], index: 2, kind: input, shape index: {}]   ;;  %s6938_s3 = inlined_call_operand.vmem [shape: f32[2], index: 3, kind: input, shape index: {}]   ;;  %s6939_s4 = inlined_call_operand.vmem [shape: f32[2,25], index: 4, kind: input, shape index: {}]   ;;  %s6940_s5 = inlined_call_operand.vmem [shape: f32[2], index: 5, kind: input, shape index: {}]   ;;  %s6941_s6 = inlined_call_operand.vmem [shape: f32[2], index: 6, kind: input, shape index: {}]   ;;  %s6942_s7 = inlined_call_operand.vmem [shape: f32[4,4], index: 7, kind: input, shape index: {}]   ;;  %s6943_s8 = inlined_call_operand.vmem [shape: f32[4], index: 8, kind: input, shape index: {}]   ;;  %s6944_s9 = inlined_call_operand.vmem [shape: f32[4], index: 9, kind: input, shape index: {}]   ;;  %s6945_s10 = inlined_call_operand.vmem [shape: f32[4,25], index: 10, kind: input, shape index: {}]   ;;  %s6946_s11 = inlined_call_operand.vmem [shape: f32[4], index: 11, kind: input, shape index: {}]   ;;  %s6947_s12 = inlined_call_operand.vmem [shape: f32[4], index: 12, kind: input, shape index: {}]   ;;  %s6948_s13 = inlined_call_operand.hbm [shape: f32[2,8,16,16], index: 13, kind: output, shape index: {}]  }
   0x1   :  { %7092 = sst [smem:[#allocation113_spill]] %s6935_s0 }
   0x2   :  { %7093 = sst [smem:[#allocation114_spill]] %s6936_s1 }
   0x3   :  { %7094 = sst [smem:[#allocation115_spill]] %s6937_s2 }
   0x4   :  { %7095 = sst [smem:[#allocation116_spill]] %s6938_s3 }
   0x5   :  { %7096 = sst [smem:[#allocation117_spill]] %s6939_s4 }
   0x6   :  { %7097 = sst [smem:[#allocation118_spill]] %s6940_s5 }
   0x7   :  { %7098 = sst [smem:[#allocation119_spill]] %s6941_s6 }
   0x8   :  { %7099 = sst [smem:[#allocation120_spill]] %s6942_s7 }
   0x9   :  { %7100 = sst [smem:[#allocation121_spill]] %s6943_s8 }
   0xa   :  { %7101 = sst [smem:[#allocation122_spill]] %s6944_s9 }
   0xb   :  { %7102 = sst [smem:[#allocation123_spill]] %s6945_s10 }
   0xc   :  { %7103 = sst [smem:[#allocation124_spill]] %s6946_s11 }
   0xd   :  { %7104 = sst [smem:[#allocation125_spill]] %s6947_s12 }
   0xe   :  { %7105 = sst [smem:[#allocation126_spill]] %s6948_s13 }
   0xf   :  { %18 = vsyncpa [#allocation6], 0 }
  0x10   :  { %19 = vsyncpa [#allocation8], 0 }
  0x11   :  { %20 = vsyncpa [#allocation11], 0 }
  0x12   :  { %21 = vsyncpa [#allocation14], 0 }
  0x13   :  { %22 = vsyncpa [#allocation17], 0 }
  0x14   :  { %23 = vsyncpa [#allocation20], 0 }
  0x15   :  { %24 = vsyncpa [#allocation23], 0 }
  0x16   :  { %25 = vsyncpa [#allocation5], 0 }
  0x17   :  { %27 = vsyncpa [#allocation5 + $0x1], 0  ;;  %s4453_s25 = smov 0   ;;  %s4455_s26 = smov 0  }
  0x18   :  { %s4457_s27 = smov 0   ;;  %s4459_s28 = smov 0  }
  0x19   :  { %s4461_s29 = smov 0   ;;  %s4463_s30 = smov 0  }
  0x1a   :  { %s4465_s14 = smov 0   ;;  %s4467_s15 = smov 0  }
  0x1b LB: > { %7106 = sst [smem:[#allocation33_spill]] %s4331_s25  ;;  %s3535_s16 = sadd.s32 4294967295, %s4359_s15   ;;  %s4359_s15 = sphi %s4467_s15, %s33_s15   ;;  %s4355_s14 = sphi %s4465_s14, %s7420_s14   ;;  %s4351_s30 = sphi %s4463_s30, %s7419_s30   ;;  %s4347_s29 = sphi %s4461_s29, %s7418_s29   ;;  %s4343_s28 = sphi %s4459_s28, %s7417_s28   ;;  %s4339_s27 = sphi %s4457_s27, %s7416_s27   ;;  %s4335_s26 = sphi %s4455_s26, %s7415_s26   ;;  %s4331_s25 = sphi %s4453_s25, %s7414_s25  }
  0x1c   : > { %7107 = sst [smem:[#allocation34_spill]] %s4335_s26  ;;  %s3536_s17 = sadd.s32 4294967294, %s4359_s15  }
  0x1d   : > { %7108 = sst [smem:[#allocation35_spill]] %s4339_s27  ;;  %s42_s18 = sadd.s32 1, %s4351_s30 }
  0x1e   : > { %7109 = sst [smem:[#allocation36_spill]] %s4343_s28  ;;  %s45_s19 = sadd.s32 1, %s4355_s14 }
  0x1f   : > { %7110 = sst [smem:[#allocation37_spill]] %s4347_s29  ;;  %p43_p0 = scmp.ge.s32.totalorder %s42_s18, 2 }
  0x20   : > { %7111 = sst [smem:[#allocation38_spill]] %s4351_s30  ;;  %s332_s20 = sadd.s32 1, %s4339_s27 }
  0x21   : > { %7112 = sst [smem:[#allocation39_spill]] %s4355_s14  ;;  %p342_p1 = scmp.ne.s32.totalorder %s4339_s27, %s4335_s26 }
  0x22   : > { %7113 = sst [smem:[#allocation40_spill]] %s4359_s15  ;;  %p343_p2 = scmp.eq.s32.totalorder %s3535_s16, 3 }
  0x23   : > { %s7422_s18 = smov (%p43_p0, %s42_s18), 0  ;;  %s7424_s19 = smov (!%p43_p0, %s45_s19), %s4355_s14 }
  0x24   : > { %7114 = sst [smem:[#allocation41_spill]] %s7422_s18  ;;  %s328_s21 = ssub.s32 %s4351_s30, %s7422_s18 }
  0x25   : > { %p4505_p3 = por %p343_p2, %p342_p1  ;;  %p47_p4 = scmp.ge.s32.totalorder %s7424_s19, 2 }
  0x26   : > { %p348_p5 = scmp.ne.s32.totalorder %s4335_s26, %s4331_s25  ;;  %p349_p6 = scmp.eq.s32.totalorder %s3536_s17, 3 }
  0x27   : > { %s7115_s22 = scalar_select %p4505_p3, 1, 0 }
  0x28   : > { %p3537_p7 = scmp.ge.s32.totalorder %s4359_s15, 1  ;;  %s7426_s19 = smov (%p47_p4, %s7424_s19), 0 }
  0x29   : > { %7116 = sst [smem:[#allocation42_spill]] %s7115_s22  ;;  %p4514_p8 = por %p349_p6, %p348_p5 }
  0x2a   : > { %7117 = sst [smem:[#allocation43_spill]] %s7426_s19  ;;  %p356_p9 = scmp.lt.s32.totalorder %s4359_s15, 5 }
  0x2b   : > { %s7118_s23 = scalar_select %p4514_p8, 1, 0 }
  0x2c   : > { %s327_s24 = ssub.s32 %s4355_s14, %s7426_s19  ;;  %p4521_p10 = pnand %p3537_p7, %p356_p9 }
  0x2d   : > { %7119 = sst [smem:[#allocation44_spill]] %s7118_s23  ;;  %s329_s13 = sor.u32 %s328_s21, %s327_s24 }
  0x2e   : > { %s7120_s18 = scalar_select %p4521_p10, 1, 0 }
  0x2f   : > { %p330_p11 = scmp.eq.s32.totalorder %s329_s13, 0  ;;  %p4525_p12 = scmp.eq.s32.totalorder %s3535_s16, 0 }
  0x30   : > { %p3866_p13 = pneg %p4521_p10  ;;  %s7122_s2 = sld [smem:[#allocation115_spill]] }
  0x31   : > { %s7121_s30 = scalar_select %p4525_p12, 1, 0 }
  0x32   : > { %s4535_s15 = scalar_select %p330_p11, %s4339_s27, %s332_s20  }
  0x33   : > { %p4539_p0 = pnand %p4525_p12, %p3866_p13  ;;  %s7125_s4 = sld [smem:[#allocation117_spill]] }
  0x34   : > { %7123 = sst [smem:[#allocation45_spill]] %s4535_s15 }
  0x35   : > { %p4548_p2 = pneg %p4539_p0 }
  0x36   : > { %s380_s23 = sshll.u32 %s7122_s2, 4  ;;  %s381_s23 = int_to_ptr.vmem [resolvable:$true] %s380_s23 }
  0x37   : > { %s4057_s19 = scalar_lea.vmem %s381_s23, 16  ;;  %p4065_p6 = scmp.lt.s32.totalorder %s381_s23, %s381_s23 }
  0x38   : > { %p4058_p1 = scmp.ne.s32.totalorder %s381_s23, %s4057_s19  ;;  %p4066_p7 = scmp.lt.s32.totalorder %s4057_s19, %s4057_s19 }
  0x39   : > { %s402_s24 = sshll.u32 %s7125_s4, 4  ;;  %s403_s24 = int_to_ptr.vmem [resolvable:$true] %s402_s24 }
  0x3a   : > { %p4060_p4 = pnand %p4548_p2, %p4058_p1  ;;  %p4067_p9 = por %p4066_p7, %p4065_p6 }
  0x3c   : > { %p4061_p5 = pneg %p4060_p4 }
  0x3e   : > { %p4068_p11 = pnand %p4067_p9, %p4061_p5 }
  0x40   : > { %4071 = shalt.err (!%p4068_p11)
}
  0x41   : > { %s4361_s20 = smov [#allocation7]   ;;  %s7127_s6 = sld [smem:[#allocation119_spill]] }
  0x42   : > { %3872 = dma.vmem_to_smem (!%p4539_p0), %s381_s23, 16, %s4361_s20, [#allocation8]  }
  0x43   : > { %s4072_s2 = scalar_lea.vmem %s403_s24, 32  ;;  %p4080_p4 = scmp.lt.s32.totalorder %s403_s24, %s403_s24 }
  0x44   : > { %p4073_p13 = scmp.ne.s32.totalorder %s403_s24, %s4072_s2  ;;  %p4081_p3 = scmp.lt.s32.totalorder %s4072_s2, %s4072_s2 }
  0x46   : > { %p4075_p8 = pnand %p4073_p13, %p4548_p2  ;;  %p4082_p12 = por %p4081_p3, %p4080_p4 }
  0x47   : > { %s424_s16 = sshll.u32 %s7127_s6, 4  ;;  %s425_s16 = int_to_ptr.vmem [resolvable:$true] %s424_s16 }
  0x48   : > { %p4076_p1 = pneg %p4075_p8 }
  0x4a   : > { %p4083_p6 = pnand %p4082_p12, %p4076_p1 }
  0x4c   : > { %4086 = shalt.err (!%p4083_p6)
}
  0x4d   : > { %s4362_s19 = smov [#allocation10]   ;;  %s4087_s23 = scalar_lea.vmem %s425_s16, 16 }
  0x4e   : > { %3878 = dma.vmem_to_smem (!%p4539_p0), %s403_s24, 32, %s4362_s19, [#allocation11]  }
  0x4f   : > { %p4088_p5 = scmp.ne.s32.totalorder %s425_s16, %s4087_s23  ;;  %p4095_p11 = scmp.lt.s32.totalorder %s425_s16, %s425_s16 }
  0x50   : > { %p4096_p10 = scmp.lt.s32.totalorder %s4087_s23, %s4087_s23 }
  0x51   : > { %p4090_p7 = pnand %p4088_p5, %p4548_p2 }
  0x52   : > { %p4097_p13 = por %p4096_p10, %p4095_p11 }
  0x53   : > { %p4091_p9 = pneg %p4090_p7 }
  0x55   : > { %p4098_p8 = pnand %p4097_p13, %p4091_p9 }
  0x57   : > { %4101 = shalt.err (!%p4098_p8)
}
  0x58   : > { %s4363_s2 = smov [#allocation13]   ;;  %s7128_s8 = sld [smem:[#allocation121_spill]] }
  0x59   : > { %3884 = dma.vmem_to_smem (!%p4539_p0), %s425_s16, 16, %s4363_s2, [#allocation14]  }
  0x5a   : > { %s7129_s10 = sld [smem:[#allocation123_spill]] }
  0x5e   : > { %s446_s24 = sshll.u32 %s7128_s8, 4  ;;  %s447_s24 = int_to_ptr.vmem [resolvable:$true] %s446_s24 }
  0x5f   : > { %s4102_s6 = scalar_lea.vmem %s447_s24, 16  ;;  %p4110_p1 = scmp.lt.s32.totalorder %s447_s24, %s447_s24 }
  0x60   : > { %s468_s4 = sshll.u32 %s7129_s10, 4  ;;  %p4103_p3 = scmp.ne.s32.totalorder %s447_s24, %s4102_s6  ;;  %s469_s4 = int_to_ptr.vmem [resolvable:$true] %s468_s4 }
  0x61   : > { %p4111_p4 = scmp.lt.s32.totalorder %s4102_s6, %s4102_s6 }
  0x62   : > { %p4105_p10 = pnand %p4103_p3, %p4548_p2 }
  0x63   : > { %p4112_p6 = por %p4111_p4, %p4110_p1 }
  0x64   : > { %p4106_p12 = pneg %p4105_p10 }
  0x66   : > { %p4113_p5 = pnand %p4112_p6, %p4106_p12 }
  0x68   : > { %4116 = shalt.err (!%p4113_p5)
}
  0x69   : > { %s4364_s16 = smov [#allocation16]   ;;  %s4117_s23 = scalar_lea.vmem %s469_s4, 64 }
  0x6a   : > { %3890 = dma.vmem_to_smem (!%p4539_p0), %s447_s24, 16, %s4364_s16, [#allocation17]  }
  0x6b   : > { %p4118_p7 = scmp.ne.s32.totalorder %s469_s4, %s4117_s23  ;;  %p4125_p13 = scmp.lt.s32.totalorder %s469_s4, %s469_s4 }
  0x6c   : > { %p4126_p8 = scmp.lt.s32.totalorder %s4117_s23, %s4117_s23 }
  0x6d   : > { %p4120_p9 = pnand %p4118_p7, %p4548_p2 }
  0x6e   : > { %p4127_p3 = por %p4126_p8, %p4125_p13 }
  0x6f   : > { %p4121_p11 = pneg %p4120_p9 }
  0x71   : > { %p4128_p10 = pnand %p4127_p3, %p4121_p11 }
  0x73   : > { %4131 = shalt.err (!%p4128_p10)
}
  0x74   : > { %s4365_s6 = smov [#allocation19]   ;;  %s7130_s1 = sld [smem:[#allocation114_spill]] }
  0x75   : > { %3896 = dma.vmem_to_smem (!%p4539_p0), %s469_s4, 64, %s4365_s6, [#allocation20]  }
  0x76   : > { %s7131_s3 = sld [smem:[#allocation116_spill]] }
  0x7a   : > { %s369_s17 = sshll.u32 %s7130_s1, 4  ;;  %s370_s17 = int_to_ptr.vmem [resolvable:$true] %s369_s17 }
  0x7b   : > { %s4132_s16 = scalar_lea.vmem %s370_s17, 128  ;;  %p4140_p6 = scmp.lt.s32.totalorder %s370_s17, %s370_s17 }
  0x7c   : > { %s391_s19 = sshll.u32 %s7131_s3, 4  ;;  %p4133_p12 = scmp.ne.s32.totalorder %s370_s17, %s4132_s16  ;;  %s392_s19 = int_to_ptr.vmem [resolvable:$true] %s391_s19 }
  0x7d   : > { %p4141_p5 = scmp.lt.s32.totalorder %s4132_s16, %s4132_s16 }
  0x7e   : > { %p4135_p1 = pnand %p4133_p12, %p4548_p2 }
  0x7f   : > { %p4142_p7 = por %p4141_p5, %p4140_p6 }
  0x80   : > { %p4136_p4 = pneg %p4135_p1 }
  0x82   : > { %p4143_p9 = pnand %p4142_p7, %p4136_p4 }
  0x84   : > { %4146 = shalt.err (!%p4143_p9)
}
  0x85   : > { %s4366_s4 = smov [#allocation4]   ;;  %s4147_s23 = scalar_lea.vmem %s392_s19, 16 }
  0x86   : > { %3869 = dma.vmem_to_smem (!%p4539_p0), %s370_s17, 128, %s4366_s4, [#allocation6]  }
  0x87   : > { %p4148_p11 = scmp.ne.s32.totalorder %s392_s19, %s4147_s23  ;;  %p4155_p3 = scmp.lt.s32.totalorder %s392_s19, %s392_s19 }
  0x88   : > { %p4156_p10 = scmp.lt.s32.totalorder %s4147_s23, %s4147_s23 }
  0x89   : > { %p4150_p13 = pnand %p4148_p11, %p4548_p2 }
  0x8a   : > { %p4157_p12 = por %p4156_p10, %p4155_p3 }
  0x8b   : > { %p4151_p8 = pneg %p4150_p13 }
  0x8d   : > { %p4158_p1 = pnand %p4157_p12, %p4151_p8 }
  0x8f   : > { %4161 = shalt.err (!%p4158_p1)
}
  0x90   : > { %s4367_s6 = smov [#allocation9]   ;;  %s7132_s5 = sld [smem:[#allocation118_spill]] }
  0x91   : > { %3875 = dma.vmem_to_smem (!%p4539_p0), %s392_s19, 16, %s4367_s6, [#allocation8]  }
  0x92   : > { %s7133_s7 = sld [smem:[#allocation120_spill]] }
  0x96   : > { %s413_s17 = sshll.u32 %s7132_s5, 4  ;;  %s414_s17 = int_to_ptr.vmem [resolvable:$true] %s413_s17 }
  0x97   : > { %s4162_s4 = scalar_lea.vmem %s414_s17, 16  ;;  %p4170_p7 = scmp.lt.s32.totalorder %s414_s17, %s414_s17 }
  0x98   : > { %s435_s16 = sshll.u32 %s7133_s7, 4  ;;  %p4163_p4 = scmp.ne.s32.totalorder %s414_s17, %s4162_s4  ;;  %s436_s16 = int_to_ptr.vmem [resolvable:$true] %s435_s16 }
  0x99   : > { %p4171_p9 = scmp.lt.s32.totalorder %s4162_s4, %s4162_s4 }
  0x9a   : > { %p4165_p6 = pnand %p4163_p4, %p4548_p2 }
  0x9b   : > { %p4172_p11 = por %p4171_p9, %p4170_p7 }
  0x9c   : > { %p4166_p5 = pneg %p4165_p6 }
  0x9e   : > { %p4173_p13 = pnand %p4172_p11, %p4166_p5 }
  0xa0   : > { %4176 = shalt.err (!%p4173_p13)
}
  0xa1   : > { %s4368_s19 = smov [#allocation12]   ;;  %s4177_s23 = scalar_lea.vmem %s436_s16, 64 }
  0xa2   : > { %3881 = dma.vmem_to_smem (!%p4539_p0), %s414_s17, 16, %s4368_s19, [#allocation11]  }
  0xa3   : > { %p4178_p8 = scmp.ne.s32.totalorder %s436_s16, %s4177_s23  ;;  %p4185_p12 = scmp.lt.s32.totalorder %s436_s16, %s436_s16 }
  0xa4   : > { %p4186_p1 = scmp.lt.s32.totalorder %s4177_s23, %s4177_s23 }
  0xa5   : > { %p4180_p3 = pnand %p4178_p8, %p4548_p2 }
  0xa6   : > { %p4187_p4 = por %p4186_p1, %p4185_p12 }
  0xa7   : > { %p4181_p10 = pneg %p4180_p3 }
  0xa9   : > { %p4188_p6 = pnand %p4187_p4, %p4181_p10 }
  0xab   : > { %4191 = shalt.err (!%p4188_p6)
}
  0xac   : > { %s4369_s6 = smov [#allocation15]   ;;  %s7134_s9 = sld [smem:[#allocation122_spill]] }
  0xad   : > { %3887 = dma.vmem_to_smem (!%p4539_p0), %s436_s16, 64, %s4369_s6, [#allocation14]  }
  0xae   : > { %s7135_s11 = sld [smem:[#allocation124_spill]] }
  0xb2   : > { %s457_s17 = sshll.u32 %s7134_s9, 4  ;;  %s458_s17 = int_to_ptr.vmem [resolvable:$true] %s457_s17 }
  0xb3   : > { %s4192_s19 = scalar_lea.vmem %s458_s17, 16  ;;  %p4200_p11 = scmp.lt.s32.totalorder %s458_s17, %s458_s17 }
  0xb4   : > { %s479_s4 = sshll.u32 %s7135_s11, 4  ;;  %p4193_p5 = scmp.ne.s32.totalorder %s458_s17, %s4192_s19  ;;  %s480_s4 = int_to_ptr.vmem [resolvable:$true] %s479_s4 }
  0xb5   : > { %p4201_p13 = scmp.lt.s32.totalorder %s4192_s19, %s4192_s19 }
  0xb6   : > { %p4195_p7 = pnand %p4193_p5, %p4548_p2 }
  0xb7   : > { %p4202_p8 = por %p4201_p13, %p4200_p11 }
  0xb8   : > { %p4196_p9 = pneg %p4195_p7 }
  0xba   : > { %p4203_p3 = pnand %p4202_p8, %p4196_p9 }
  0xbc   : > { %4206 = shalt.err (!%p4203_p3)
}
  0xbd   : > { %s4370_s16 = smov [#allocation18]   ;;  %s4207_s23 = scalar_lea.vmem %s480_s4, 16 }
  0xbe   : > { %3893 = dma.vmem_to_smem (!%p4539_p0), %s458_s17, 16, %s4370_s16, [#allocation17]  }
  0xbf   : > { %p4208_p10 = scmp.ne.s32.totalorder %s480_s4, %s4207_s23  ;;  %p4215_p4 = scmp.lt.s32.totalorder %s480_s4, %s480_s4 }
  0xc0   : > { %p4216_p6 = scmp.lt.s32.totalorder %s4207_s23, %s4207_s23 }
  0xc1   : > { %p4210_p12 = pnand %p4208_p10, %p4548_p2 }
  0xc2   : > { %p4217_p5 = por %p4216_p6, %p4215_p4 }
  0xc3   : > { %p4211_p1 = pneg %p4210_p12 }
  0xc5   : > { %p4218_p7 = pnand %p4217_p5, %p4211_p1 }
  0xc7   : > { %4221 = shalt.err (!%p4218_p7)
}
  0xc8   : > { %s4371_s6 = smov [#allocation21]   ;;  %s7136_s12 = sld [smem:[#allocation125_spill]] }
  0xc9   : > { %3899 = dma.vmem_to_smem (!%p4539_p0), %s480_s4, 16, %s4371_s6, [#allocation20]  }
  0xce   : > { %s490_s17 = sshll.u32 %s7136_s12, 4  ;;  %s491_s17 = int_to_ptr.vmem [resolvable:$true] %s490_s17 }
  0xcf   : > { %s4222_s24 = scalar_lea.vmem %s491_s17, 16  ;;  %p4230_p8 = scmp.lt.s32.totalorder %s491_s17, %s491_s17 }
  0xd0   : > { %p4223_p9 = scmp.ne.s32.totalorder %s491_s17, %s4222_s24  ;;  %p4231_p3 = scmp.lt.s32.totalorder %s4222_s24, %s4222_s24 }
  0xd2   : > { %p4225_p11 = pnand %p4223_p9, %p4548_p2  ;;  %p4232_p10 = por %p4231_p3, %p4230_p8 }
  0xd4   : > { %p4226_p13 = pneg %p4225_p11 }
  0xd6   : > { %p4233_p12 = pnand %p4232_p10, %p4226_p13 }
  0xd8   : > { %4236 = shalt.err (!%p4233_p12)
}
  0xd9   : > { %s4372_s13 = smov [#allocation22]   ;;  %p7137_p1 = scmp.ne.s32.totalorder %s7120_s18, 0 }
  0xda   : > { %3902 = dma.vmem_to_smem (!%p4539_p0), %s491_s17, 16, %s4372_s13, [#allocation23]  }
  0xdb   : > { %511 = sbr.rel (%p7137_p1) target bundleno = 1453 (0x5ad), region = 72 }
  0xe2   : > { %p7138_p4 = scmp.ne.s32.totalorder %s7121_s30, 0 }
  0xe4   : > { %4298 = dma.done.wait (%p7138_p4), [#allocation6], 128  }
  0xe5   : > { %4300 = vsyncadd (%p7138_p4), [#allocation6], 4294967168 }
  0xe6   : > { %4302 = dma.done.wait (%p7138_p4), [#allocation8], 32  }
  0xe7   : > { %4304 = vsyncadd (%p7138_p4), [#allocation8], 4294967264 }
  0xe8   : > { %4306 = dma.done.wait (%p7138_p4), [#allocation11], 48  }
  0xe9   : > { %4308 = vsyncadd (%p7138_p4), [#allocation11], 4294967248 }
  0xea   : > { %4310 = dma.done.wait (%p7138_p4), [#allocation14], 80  }
  0xeb   : > { %4312 = vsyncadd (%p7138_p4), [#allocation14], 4294967216 }
  0xec   : > { %4314 = dma.done.wait (%p7138_p4), [#allocation17], 32  }
  0xed   : > { %4316 = vsyncadd (%p7138_p4), [#allocation17], 4294967264 }
  0xee   : > { %4318 = dma.done.wait (%p7138_p4), [#allocation20], 80  }
  0xef   : > { %4320 = vsyncadd (%p7138_p4), [#allocation20], 4294967216 }
  0xf0   : > { %4322 = dma.done.wait (%p7138_p4), [#allocation23], 16  }
  0xf1   : > { %4324 = vsyncadd (%p7138_p4), [#allocation23], 4294967280 }
  0xf2   : > { %561 = sfence }
  0xf3   : > { %p600_p0 = scmp.lt.s32.totalorder %s4347_s29, 1  ;;  %vm728_vm0 = vcmask 15360   ;;  %vm731_vm1 = vcmask 162960   ;;  %s4662_s18 = sshll.u32 %s4343_s28, 3  ;;  %v7033_v0 = vmov 0.0   ;;  %vm748_vm8 = vcmask 146448  }
  0xf4   : > { %7139 = sst [smem:[#allocation46_spill]] %s4662_s18  ;;  %1234 = vst.msk [vmem:[#allocation2 + $0x10] sm:$0xff] %vm728_vm0, %v7033_v0  ;;  %729 = vst.msk [vmem:[#allocation2] sm:$0xff] %vm728_vm0, %v7033_v0  ;;  %s4689_s21 = sld [smem:[#allocation4 + $0x1]]  ;;  %vm821_vm9 = vcmask 1046528   ;;  %vm903_vm10 = vcmask 1045504  }
  0xf5   : > { %730 = vst.msk [vmem:[#allocation2 + $0x8] sm:$0xff] %vm728_vm0, %v7033_v0  ;;  %1235 = vst.msk [vmem:[#allocation2 + $0x18] sm:$0xff] %vm728_vm0, %v7033_v0  ;;  %s601_s30 = scalar_select %p600_p0, %s4347_s29, 1  ;;  %vm985_vm11 = vcmask 1044480   ;;  %vm1067_vm12 = vcmask 1043456   ;;  %vm1676_vm13 = vcmask 1041408  }
  0xf6   : > { %1713 = vst.msk [vmem:[#allocation3] sm:$0xff] %vm728_vm0, %v7033_v0  ;;  %2125 = vst.msk [vmem:[#allocation3 + $0x10] sm:$0xff] %vm728_vm0, %v7033_v0  ;;  %s4691_s25 = sld [smem:[#allocation4 + $0x81]]  ;;  %s7140_s0 = sld [smem:[#allocation113_spill]]  ;;  %vm1714_vm14 = vcmask 11264   ;;  %vm1717_vm15 = vcmask 158864  }
  0xf7   : > { %2528 = vst.msk [vmem:[#allocation3 + $0x20] sm:$0xff] %vm728_vm0, %v7033_v0  ;;  %2931 = vst.msk [vmem:[#allocation3 + $0x30] sm:$0xff] %vm728_vm0, %v7033_v0  ;;  %s3815_s4 = smul.u32 192, %s601_s30  ;;  %s4693_s19 = sld [smem:[#allocation4 + $0x101]] }
  0xf8   : > { %1236 = vst.msk [vmem:[#allocation2 + $0x10] sm:$0xff] %vm731_vm1, %v7033_v0  ;;  %732 = vst.msk [vmem:[#allocation2] sm:$0xff] %vm731_vm1, %v7033_v0  ;;  %s4695_s16 = sld [smem:[#allocation4 + $0x181]]  ;;  %s4720_s6 = sld [smem:[#allocation4]] }
  0xf9   : > { %733 = vst.msk [vmem:[#allocation2 + $0x8] sm:$0xff] %vm731_vm1, %v7033_v0  ;;  %1237 = vst.msk [vmem:[#allocation2 + $0x18] sm:$0xff] %vm731_vm1, %v7033_v0  ;;  %s4697_s23 = sld [smem:[#allocation4 + $0x201]]  ;;  %s4723_s2 = sld [smem:[#allocation4 + $0x80]] }
  0xfa   : > { %1716 = vst.msk [vmem:[#allocation3] sm:$0xff] %vm731_vm1, %v7033_v0  ;;  %2127 = vst.msk [vmem:[#allocation3 + $0x10] sm:$0xff] %vm731_vm1, %v7033_v0  ;;  %s4702_s17 = sld [smem:[#allocation4 + $0x281]]  ;;  %v1166_v4 = vstv %s4689_s21  ;;  %s4733_s21 = sld [smem:[#allocation4 + $0x180]] }
  0xfb   : > { %2530 = vst.msk [vmem:[#allocation3 + $0x20] sm:$0xff] %vm731_vm1, %v7033_v0  ;;  %2933 = vst.msk [vmem:[#allocation3 + $0x30] sm:$0xff] %vm731_vm1, %v7033_v0  ;;  %s4707_s13 = sld [smem:[#allocation4 + $0x301]]  ;;  %s4817_s1 = sld [smem:[#allocation10 + $0x87]] }
  0xfc   : > { %s604_s20 = scalar_lea.vmem %s7140_s0, %s3815_s4  ;;  %s4712_s30 = sld [smem:[#allocation4 + $0x381]]  ;;  %v1170_v7 = vstv %s4691_s25 }
  0xfd   : > { %s4705_s24 = scalar_lea.vmem %s604_s20, %s4662_s18  ;;  %v1176_v8 = vstv %s4693_s19  ;;  %s4718_s4 = sld [smem:[#allocation7 + $0x1]] }
  0xfe   : > { %7141 = sst [smem:[#allocation47_spill]] %s4705_s24  ;;  %v630_v1 = vld [vmem:[%s4705_s24] sm:$0xff]  ;;  %v3570_v2 = vld [vmem:[%s4705_s24 + $0x18] sm:$0xff]  ;;  %v3573_v3 = vld [vmem:[%s4705_s24 + $0x30] sm:$0xff]  ;;  %v1182_v11 = vstv %s4695_s16  ;;  %s4725_s20 = sld [smem:[#allocation4 + $0x100]] }
  0xff   : > { %v3576_v5 = vld [vmem:[%s4705_s24 + $0x48] sm:$0xff]  ;;  %v1167_v6 = vmul.f32 %v1166_v4, %v630_v1  ;;  %v1171_v9 = vmul.f32 %v3570_v2, %v1170_v7  ;;  %v1177_v10 = vmul.f32 %v3573_v3, %v1176_v8  ;;  %v3571_v13 = vld [vmem:[%s4705_s24 + $0x20] sm:$0xff]  ;;  %v3582_v15 = vld [vmem:[%s4705_s24 + $0x78] sm:$0xff]  ;;  %v1188_v16 = vstv %s4697_s23  ;;  %s4735_s25 = sld [smem:[#allocation4 + $0x200]]  ;;  %s4737_s19 = sld [smem:[#allocation9 + $0x1]] }
 0x100   : > { %v631_v12 = vld [vmem:[%s4705_s24 + $0x8] sm:$0xff]  ;;  %v3579_v14 = vld [vmem:[%s4705_s24 + $0x60] sm:$0xff]  ;;  %v1194_v17 = vstv %s4702_s17  ;;  %v1183_v19 = vmul.f32 %v3576_v5, %v1182_v11  ;;  %s4739_s16 = sld [smem:[#allocation4 + $0x280]]  ;;  %v3574_v20 = vld [vmem:[%s4705_s24 + $0x38] sm:$0xff]  ;;  %v1172_v22 = vmul.f32 %v3571_v13, %v1170_v7  ;;  %s4815_s0 = sld [smem:[#allocation10 + $0x86]] }
 0x101   : > { %v1173_v18 = vadd.f32 %v1171_v9, %v1167_v6  ;;  %v1168_v21 = vmul.f32 %v1166_v4, %v631_v12  ;;  %v3585_v23 = vld [vmem:[%s4705_s24 + $0x90] sm:$0xff]  ;;  %v1189_v25 = vmul.f32 %v3579_v14, %v1188_v16  ;;  %v1195_v26 = vmul.f32 %v3582_v15, %v1194_v17  ;;  %s4743_s23 = sld [smem:[#allocation4 + $0x300]]  ;;  %v3588_v32 = vld [vmem:[%s4705_s24 + $0xa8] sm:$0xff]  ;;  %v3583_v45 = vld [vmem:[%s4705_s24 + $0x80] sm:$0xff]  ;;  %7158 = sst [smem:[#allocation62_spill]] %s4817_s1 }
 0x102   : > { %v1200_v27 = vstv %s4707_s13  ;;  %v1206_v28 = vstv %s4712_s30  ;;  %v661_v29 = vstv %s4720_s6  ;;  %v3577_v30 = vld [vmem:[%s4705_s24 + $0x50] sm:$0xff]  ;;  %v1178_v31 = vmul.f32 %v3574_v20, %v1176_v8  ;;  %s4752_s17 = sld [smem:[#allocation4 + $0x380]]  ;;  %s6961_s6 = smov 2  }
 0x103   : > { %v1179_v24 = vadd.f32 %v1177_v10, %v1173_v18  ;;  %v662_v34 = vmul.f32 %v661_v29, %v630_v1  ;;  %v665_v35 = vstv %s4723_s2  ;;  %v677_v39 = vstv %s4733_s21  ;;  %v3580_v40 = vld [vmem:[%s4705_s24 + $0x68] sm:$0xff]  ;;  %s4762_s13 = sld [smem:[#allocation7]]  ;;  %v3586_v61 = vld [vmem:[%s4705_s24 + $0x98] sm:$0xff]  ;;  %s4791_s2 = sld [smem:[#allocation10 + $0x1]] }
 0x104   : > { %v671_v36 = vstv %s4725_s20  ;;  %v666_v37 = vmul.f32 %v3570_v2, %v665_v35  ;;  %v1174_v41 = vadd.f32 %v1172_v22, %v1168_v21  ;;  %v1201_v43 = vmul.f32 %v3585_v23, %v1200_v27  ;;  %s4766_s30 = sld [smem:[#allocation9]]  ;;  %v3589_v7 = vld [vmem:[%s4705_s24 + $0xb0] sm:$0xff]  ;;  %s4793_s20 = sld [smem:[#allocation10 + $0x2]] }
 0x105   : > { %v1185_v33 = vadd.f32 %v1183_v19, %v1179_v24  ;;  %v672_v38 = vmul.f32 %v3573_v3, %v671_v36  ;;  %v683_v44 = vstv %s4735_s25  ;;  %v1184_v46 = vmul.f32 %v3577_v30, %v1182_v11  ;;  %s4795_s21 = sld [smem:[#allocation10 + $0x3]]  ;;  %s4797_s25 = sld [smem:[#allocation10 + $0x4]] }
 0x106   : > { %v1207_v47 = vmul.f32 %v3588_v32, %v1206_v28  ;;  %v1212_v48 = vstv %s4718_s4  ;;  %v668_v49 = vadd.f32 %v666_v37, %v662_v34  ;;  %v678_v50 = vmul.f32 %v3576_v5, %v677_v39  ;;  %s3567_s4 = sadd.s32 4294967292, %s4662_s18  ;;  %s4819_s3 = sld [smem:[#allocation10 + $0x88]] }
 0x107   : > { %v1191_v42 = vadd.f32 %v1189_v25, %v1185_v33  ;;  %v1216_v52 = vstv %s4737_s19  ;;  %v689_v53 = vstv %s4739_s16  ;;  %v1190_v54 = vmul.f32 %v3580_v40, %v1188_v16  ;;  %s4799_s19 = sld [smem:[#allocation10 + $0x6]]  ;;  %s4801_s16 = sld [smem:[#allocation10 + $0x7]] }
 0x108   : > { %v674_v55 = vadd.f32 %v672_v38, %v668_v49  ;;  %v684_v56 = vmul.f32 %v3579_v14, %v683_v44  ;;  %v1180_v57 = vadd.f32 %v1178_v31, %v1174_v41  ;;  %v1196_v58 = vmul.f32 %v3583_v45, %v1194_v17  ;;  %s4821_s5 = sld [smem:[#allocation10 + $0x89]]  ;;  %s4823_s7 = sld [smem:[#allocation10 + $0xd]] }
 0x109   : > { %v1197_v51 = vadd.f32 %v1195_v26, %v1191_v42  ;;  %v695_v60 = vstv %s4743_s23  ;;  %v663_v62 = vmul.f32 %v661_v29, %v631_v12  ;;  %v667_v63 = vmul.f32 %v3571_v13, %v665_v35  ;;  %7146 = sst [smem:[#allocation50_spill]] %s4791_s2  ;;  %s4803_s23 = sld [smem:[#allocation10 + $0x8]] }
 0x10a   : > { %v680_v1 = vadd.f32 %v678_v50, %v674_v55  ;;  %v690_v2 = vmul.f32 %v3582_v15, %v689_v53  ;;  %v1186_v3 = vadd.f32 %v1184_v46, %v1180_v57  ;;  %v673_v4 = vmul.f32 %v3574_v20, %v671_v36  ;;  %7147 = sst [smem:[#allocation51_spill]] %s4793_s20  ;;  %s4825_s8 = sld [smem:[#allocation10 + $0xe]] }
 0x10b   : > { %v1203_v59 = vadd.f32 %v1201_v43, %v1197_v51  ;;  %v701_v6 = vstv %s4752_s17  ;;  %v669_v8 = vadd.f32 %v667_v63, %v663_v62  ;;  %v679_v9 = vmul.f32 %v3577_v30, %v677_v39  ;;  %7148 = sst [smem:[#allocation52_spill]] %s4795_s21  ;;  %s4827_s9 = sld [smem:[#allocation10 + $0x10]] }
 0x10c   : > { %v686_v10 = vadd.f32 %v684_v56, %v680_v1  ;;  %v696_v11 = vmul.f32 %v3585_v23, %v695_v60  ;;  %v1192_v14 = vadd.f32 %v1190_v54, %v1186_v3  ;;  %v1202_v16 = vmul.f32 %v3586_v61, %v1200_v27  ;;  %7149 = sst [smem:[#allocation53_spill]] %s4797_s25  ;;  %s4805_s17 = sld [smem:[#allocation10 + $0x9]] }
 0x10d   : > { %v1209_v5 = vadd.f32 %v1207_v47, %v1203_v59  ;;  %v675_v18 = vadd.f32 %v673_v4, %v669_v8  ;;  %v685_v12 = vmul.f32 %v3580_v40, %v683_v44  ;;  %v702_v15 = vmul.f32 %v3588_v32, %v701_v6  ;;  %7150 = sst [smem:[#allocation54_spill]] %s4799_s19  ;;  %s4829_s10 = sld [smem:[#allocation10 + $0x11]] }
 0x10e   : > { %v692_v13 = vadd.f32 %v690_v2, %v686_v10  ;;  %v1198_v19 = vadd.f32 %v1196_v58, %v1192_v14  ;;  %v1208_v20 = vmul.f32 %v3589_v7, %v1206_v28  ;;  %v691_v24 = vmul.f32 %v3583_v45, %v689_v53  ;;  %7151 = sst [smem:[#allocation55_spill]] %s4801_s16  ;;  %s4833_s12 = sld [smem:[#allocation10 + $0x12]] }
 0x10f   : > { %v1213_v17 = vmul.f32 %v1212_v48, %v1209_v5  ;;  %v681_v22 = vadd.f32 %v679_v9, %v675_v18  ;;  %v707_v30 = vstv %s4762_s13  ;;  %v697_v23 = vmul.f32 %v3586_v61, %v695_v60  ;;  %7152 = sst [smem:[#allocation56_spill]] %s4803_s23  ;;  %s4807_s13 = sld [smem:[#allocation10 + $0x81]] }
 0x110   : > { %v698_v25 = vadd.f32 %v696_v11, %v692_v13  ;;  %v1204_v26 = vadd.f32 %v1202_v16, %v1198_v19  ;;  %v711_v35 = vstv %s4766_s30  ;;  %v703_v37 = vmul.f32 %v3589_v7, %v701_v6  ;;  %s4809_s30 = sld [smem:[#allocation10 + $0x82]]  ;;  %7159 = sst [smem:[#allocation63_spill]] %s4819_s3 }
 0x111   : > { %v1217_v21 = vadd.f32 %v1216_v52, %v1213_v17  ;;  %v687_v31 = vadd.f32 %v685_v12, %v681_v22  ;;  %v607_v49 = vlaneseq  ;;  %v610_v55 = vstv %s3567_s4  ;;  %s4811_s4 = sld [smem:[#allocation10 + $0x83]]  ;;  %7160 = sst [smem:[#allocation64_spill]] %s4821_s5 }
 0x112   : > { %v704_v33 = vadd.f32 %v702_v15, %v698_v25  ;;  %v1210_v34 = vadd.f32 %v1208_v20, %v1204_v26  ;;  %7153 = sst [smem:[#allocation57_spill]] %s4805_s17  ;;  %s4831_s11 = sld [smem:[#allocation10 + $0x8c]]  ;;  %v760_v18 = vstv %s4791_s2  ;;  %v774_v12 = vstv %s4793_s20 }
 0x113   : > { %v1219_v29 = vsub.f32 0.0, %v1217_v21  ;;  %v693_v36 = vadd.f32 %v691_v24, %v687_v31  ;;  %v4772_v54 = vshrl.u32 %v607_v49, 7  ;;  %7161 = sst [smem:[#allocation65_spill]] %s4823_s7  ;;  %s4835_s14 = sld [smem:[#allocation10 + $0x8d]]  ;;  %v788_v13 = vstv %s4795_s21 }
 0x114   : > { %v708_v38 = vmul.f32 %v707_v30, %v704_v33  ;;  %v1214_v39 = vmul.f32 %v1212_v48, %v1210_v34  ;;  %7162 = sst [smem:[#allocation66_spill]] %s4825_s8  ;;  %s4837_s15 = sld [smem:[#allocation10 + $0x8e]]  ;;  %v802_v15 = vstv %s4797_s25  ;;  %v830_v19 = vstv %s4799_s19 }
 0x115   : > { %v1221_v27 = vmul.f32 1.442695, %v1219_v29  ;;  %v699_v28 = vadd.f32 %v697_v23, %v693_v36  ;;  %7142 = vst [vmem:[#allocation48_spill] sm:$0xff] %v4772_v54  ;;  %v4776_v60 = vadd.s32 8, %v4772_v54  ;;  %7154 = sst [smem:[#allocation58_spill]] %s4807_s13  ;;  %s4839_s27 = sld [smem:[#allocation10 + $0x13]]  ;;  %v847_v20 = vstv %s4801_s16 }
 0x116   : > { %v712_v32 = vadd.f32 %v711_v35, %v708_v38  ;;  %v1218_v40 = vadd.f32 %v1216_v52, %v1214_v39  ;;  %v611_v52 = vadd.s32 %v610_v55, %v4772_v54  ;;  %7155 = sst [smem:[#allocation59_spill]] %s4809_s30  ;;  %s4841_s22 = sld [smem:[#allocation10 + $0x15]]  ;;  %v881_v22 = vstv %s4805_s17 }
 0x117   : > { %4017 = vpow2.f32 %v1221_v27  ;;  %v705_v41 = vadd.f32 %v703_v37, %v699_v28  ;;  %7143 = vst [vmem:[#allocation49_spill] sm:$0xff] %v4776_v60  ;;  %v612_v3 = vadd.s32 %v610_v55, %v4776_v60  ;;  %7156 = sst [smem:[#allocation60_spill]] %s4811_s4  ;;  %s4843_s28 = sld [smem:[#allocation10 + $0x90]]  ;;  %v1259_v24 = vstv %s4807_s13 }
 0x118   : > { %v714_v42 = vsub.f32 0.0, %v712_v32  ;;  %v1220_v43 = vsub.f32 0.0, %v1218_v40  ;;  %vm613_vm2 = vcmp.ge.s32.totalorder %v611_v52, 0  ;;  %vm615_vm3 = vcmp.lt.s32.totalorder %v611_v52, 16  ;;  %7163 = sst [smem:[#allocation67_spill]] %s4827_s9  ;;  %s4845_s29 = sld [smem:[#allocation10 + $0x16]] }
 0x119   : > { %v709_v44 = vmul.f32 %v707_v30, %v705_v41  ;;  %vm4778_vm4 = vmand %vm613_vm2, %vm615_vm3  ;;  %vm614_vm5 = vcmp.ge.s32.totalorder %v612_v3, 0  ;;  %vm616_vm6 = vcmp.lt.s32.totalorder %v612_v3, 16  ;;  %7164 = sst [smem:[#allocation68_spill]] %s4829_s10  ;;  %s4849_s18 = sld [smem:[#allocation10 + $0x17]]  ;;  %v1273_v25 = vstv %s4809_s30 }
 0x11a   : > { %v716_v45 = vmul.f32 1.442695, %v714_v42  ;;  %v1223_v46 = vmul.f32 1.442695, %v1220_v43  ;;  %vm618_vm7 = vmand %vm614_vm5, %vm616_vm6  ;;  %7165 = sst [smem:[#allocation69_spill]] %s4833_s12  ;;  %s4847_s26 = sld [smem:[#allocation10 + $0x91]]  ;;  %v1287_v26 = vstv %s4811_s4  ;;  %v1328_v30 = vstv %s4815_s0 }
 0x11b   : > { %v713_v47 = vadd.f32 %v711_v35, %v709_v44  ;;  %7166 = sst [smem:[#allocation70_spill]] %s4837_s15  ;;  %s4851_s24 = sld [smem:[#allocation10 + $0x92]]  ;;  %v1345_v31 = vstv %s4817_s1  ;;  %v1362_v23 = vstv %s4819_s3  ;;  %v1379_v33 = vstv %s4821_s5 }
 0x11c   : > { %4019 = vpow2.f32 %v716_v45  ;;  %7167 = sst [smem:[#allocation71_spill]] %s4839_s27  ;;  %s4853_s12 = sld [smem:[#allocation10 + $0x5]]  ;;  %v946_v34 = vstv %s4823_s7  ;;  %v963_v27 = vstv %s4825_s8  ;;  %v994_v35 = vstv %s4827_s9 }
 0x11d   : > { %4021 = vpow2.f32 %v1223_v46  ;;  %v715_v50 = vsub.f32 0.0, %v713_v47  ;;  %7168 = sst [smem:[#allocation72_spill]] %s4841_s22  ;;  %s4855_s27 = sld [smem:[#allocation10 + $0x93]]  ;;  %v1011_v36 = vstv %s4829_s10  ;;  %v1426_v38 = vstv %s4831_s11 }
 0x11e   : > { %7169 = sst [smem:[#allocation73_spill]] %s4845_s29  ;;  %s4857_s22 = sld [smem:[#allocation10 + $0x18]]  ;;  %v1443_v39 = vstv %s4835_s14  ;;  %v1460_v28 = vstv %s4837_s15  ;;  %v1490_v41 = vstv %s4843_s28  ;;  %vm1745_vm6 = vcmask 142352  }
 0x11f   : > { %v718_v53 = vmul.f32 1.442695, %v715_v50  ;;  %7171 = sst [smem:[#allocation75_spill]] %s4849_s18  ;;  %s4859_s29 = sld [smem:[#allocation10 + $0x95]] }
 0x120   : > { %7170 = sst [smem:[#allocation74_spill]] %s4847_s26  ;;  %s4861_s26 = sld [smem:[#allocation10 + $0xa]] }
 0x121   : > { %v4018_v51 = vpop.eup %4017  ;;  %4023 = vpow2.f32 %v718_v53  ;;  %7172 = sst [smem:[#allocation76_spill]] %s4851_s24  ;;  %s4863_s18 = sld [smem:[#allocation10 + $0x96]] }
 0x122   : > { %v1225_v48 = vadd.f32 1.0, %v4018_v51  ;;  %7173 = sst [smem:[#allocation77_spill]] %s4853_s12  ;;  %s4865_s24 = sld [smem:[#allocation10 + $0xf]] }
 0x123   : > { %7174 = sst [smem:[#allocation78_spill]] %s4855_s27  ;;  %s4868_s27 = sld [smem:[#allocation10 + $0x97]] }
 0x124   : > { %4025 = vrcp.f32 %v1225_v48  ;;  %7175 = sst [smem:[#allocation79_spill]] %s4857_s22  ;;  %s4886_s20 = sld [smem:[#allocation15]] }
 0x125   : > { %s4870_s22 = sld [smem:[#allocation10 + $0x14]]  ;;  %s4892_s25 = sld [smem:[#allocation15 + $0x80]]  ;;  %v7047_v51 = vstv %s4859_s29 }
 0x126   : > { %v4020_v56 = vpop.eup %4019  ;;  %7176 = sst [smem:[#allocation80_spill]] %s4861_s26  ;;  %s4894_s21 = sld [smem:[#allocation15 + $0x1]] }
 0x127   : > { %v4022_v57 = vpop.eup %4021  ;;  %v720_v58 = vadd.f32 1.0, %v4020_v56  ;;  %s4876_s26 = sld [smem:[#allocation10 + $0x85]]  ;;  %s4900_s17 = sld [smem:[#allocation15 + $0x81]]  ;;  %v7051_v55 = vstv %s4863_s18 }
 0x128   : > { %v1226_v59 = vadd.f32 1.0, %v4022_v57  ;;  %7177 = sst [smem:[#allocation81_spill]] %s4865_s24  ;;  %s4878_s24 = sld [smem:[#allocation10 + $0x98]] }
 0x129   : > { %4027 = vrcp.f32 %v720_v58  ;;  %s4902_s16 = sld [smem:[#allocation15 + $0x2]]  ;;  %s7185_s19 = sld [smem:[#allocation71_spill]]  ;;  %v7052_v52 = vstv %s4868_s27 }
 0x12a   : > { %4029 = vrcp.f32 %v1226_v59  ;;  %7179 = sst [smem:[#allocation83_spill]] %s4886_s20  ;;  %s4908_s30 = sld [smem:[#allocation10 + $0x8f]] }
 0x12b   : > { %v4024_v61 = vpop.eup %4023  ;;  %7178 = sst [smem:[#allocation82_spill]] %s4870_s22  ;;  %s4884_s22 = sld [smem:[#allocation10 + $0x8a]] }
 0x12c   : > { %v721_v1 = vadd.f32 1.0, %v4024_v61  ;;  %7180 = sst [smem:[#allocation84_spill]] %s4892_s25  ;;  %s7188_s13 = sld [smem:[#allocation74_spill]] }
 0x12d   : > { %7181 = sst [smem:[#allocation85_spill]] %s4894_s21  ;;  %s7189_s2 = sld [smem:[#allocation76_spill]] }
 0x12e   : > { %v4026_v62 = vpop.eup %4025  ;;  %4031 = vrcp.f32 %v721_v1  ;;  %7183 = sst [smem:[#allocation86_spill]] %s4900_s17  ;;  %s4914_s1 = sld [smem:[#allocation15 + $0x82]] }
 0x12f   : > { %v1231_v2 = vmul.f32 %v4026_v62, %v1217_v21  ;;  %v864_v21 = vstv %s4803_s23  ;;  %s7182_s23 = sld [smem:[#allocation69_spill]]  ;;  %7184 = sst [smem:[#allocation87_spill]] %s4902_s16 }
 0x130   : > { %s7191_s3 = sld [smem:[#allocation78_spill]]  ;;  %s7048_s9 = smov 126  }
 0x131   : > { %v1238_v4 = vsel %vm4778_vm4, %v1231_v2, 0.0  ;;  %s4916_s7 = sld [smem:[#allocation15 + $0x3]]  ;;  %s7219_s15 = smov 126  }
 0x132   : > { %1242 = vrot.lane.b32.xlu1 %v1238_v4, %s6961_s6  ;;  %v7054_v45 = vstv %s7188_s13  ;;  %s4378_s12 = smov 124   ;;  %s7230_s28 = sld [smem:[#allocation72_spill]] }
 0x133   : > { %v4028_v5 = vpop.eup %4027  ;;  %v7053_v46 = vstv %s7189_s2  ;;  %s7233_s14 = sld [smem:[#allocation73_spill]]  ;;  %s7303_s20 = sld [smem:[#allocation86_spill]] }
 0x134   : > { %v4030_v6 = vpop.eup %4029  ;;  %v726_v7 = vmul.f32 %v4028_v5, %v712_v32  ;;  %7192 = sst [smem:[#allocation71_spill]] %s4914_s1  ;;  %s4925_s1 = sld [smem:[#allocation15 + $0x83]] }
 0x135   : > { %v1232_v8 = vmul.f32 %v4030_v6, %v1218_v40  ;;  %v1028_v32 = vstv %s7182_s23  ;;  %s4923_s23 = sld [smem:[#allocation10 + $0x94]]  ;;  %s5803_s4 = sld [smem:[#allocation10 + $0x80]] }
 0x136   : > { %v738_v9 = vsel %vm4778_vm4, %v726_v7, 0.0  ;;  %v7050_v50 = vstv %s7191_s3  ;;  %s7305_s21 = sld [smem:[#allocation87_spill]]  ;;  %s5943_s0 = sld [smem:[#allocation12]] }
 0x137   : > { %742 = vrot.lane.b32.xlu0 %v738_v9, %s6961_s6  ;;  %v1239_v10 = vsel %vm618_vm7, %v1232_v8, 0.0  ;;  %7193 = sst [smem:[#allocation74_spill]] %s4916_s7  ;;  %s7039_s7 = smov 127  }
 0x138   : > { %v4032_v11 = vpop.eup %4031  ;;  %1244 = vrot.lane.b32.xlu1 %v1239_v10, %s6961_s6  ;;  %s7307_s25 = sld [smem:[#allocation71_spill]]  ;;  %s7316_s16 = sld [smem:[#allocation74_spill]] }
 0x139   : > { %v727_v14 = vmul.f32 %v4032_v11, %v713_v47  ;;  %s3608_s17 = sld [smem:[#allocation10 + $0xc]]  ;;  %s5947_s8 = sld [smem:[#allocation13]] }
 0x13a   : > { %7198 = sst [smem:[#allocation76_spill]] %s4925_s1  ;;  %s4377_s1 = smov 125  }
 0x13b   : > { %v739_v16 = vsel %vm618_vm7, %v727_v14, 0.0  ;;  %s5952_s10 = sld [smem:[#allocation12 + $0x1]]  ;;  %vm2063_vm7 = vcmask 123904  }
 0x13c   : > { %744 = vrot.lane.b32.xlu0 %v739_v16, %s6961_s6  ;;  %s4813_s6 = sld [smem:[#allocation10 + $0x84]]  ;;  %s5955_s5 = sld [smem:[#allocation13 + $0x1]] }
 0x13d   : > { %s5966_s11 = sld [smem:[#allocation15 + $0x101]] }
 0x142   : > { %7157 = sst [smem:[#allocation61_spill]] %s4813_s6  ;;  %v1301_v29 = vstv %s4813_s6 }
 0x143   : > { %s7247_s6 = sld [smem:[#allocation77_spill]] }
 0x1a4   : > { %v1243_v17 = vpop.permute.xlu1 %1242 }
 0x1a5   : > { %1248 = vst.msk [vmem:[#allocation2 + $0x10] sm:$0xff] %vm748_vm8, %v1243_v17 }
 0x1a9   : > { %v743_v37 = vpop.permute.xlu0 %742 }
 0x1aa   : > { %749 = vst.msk [vmem:[#allocation2] sm:$0xff] %vm748_vm8, %v743_v37  ;;  %v1245_v40 = vpop.permute.xlu1 %1244 }
 0x1ab   : > { %1249 = vst.msk [vmem:[#allocation2 + $0x18] sm:$0xff] %vm748_vm8, %v1245_v40 }
 0x1ac   : > { %v4944_v1 = vld [vmem:[#allocation2 + $0x10] sm:$0xff] }
 0x1ad   : > { %v4954_v6 = vmul.f32 %v1328_v30, %v4944_v1  ;;  %v4959_v7 = vmul.f32 %v1345_v31, %v4944_v1  ;;  %v4964_v8 = vmul.f32 %v1362_v23, %v4944_v1  ;;  %v4972_v11 = vmul.f32 %v1426_v38, %v4944_v1 }
 0x1ae   : > { %v745_v58 = vpop.permute.xlu0 %744  ;;  %v4977_v14 = vmul.f32 %v1443_v39, %v4944_v1  ;;  %v4982_v16 = vmul.f32 %v1460_v28, %v4944_v1  ;;  %v1260_v5 = vmul.f32 %v1259_v24, %v4944_v1  ;;  %v4997_v4 = vmul.f32 %v1273_v25, %v4944_v1 }
 0x1af   : > { %750 = vst.msk [vmem:[#allocation2 + $0x8] sm:$0xff] %vm748_vm8, %v745_v58  ;;  %v5002_v3 = vmul.f32 %v1287_v26, %v4944_v1  ;;  %v5007_v17 = vmul.f32 %v1301_v29, %v4944_v1  ;;  %v1333_v0 = vrot.slane %v4954_v6, 1  ;;  %v1350_v58 = vrot.slane %v4959_v7, 1 }
 0x1b0   : > { %v5016_v63 = vmul.f32 %v1379_v33, %v4944_v1  ;;  %v1431_v40 = vrot.slane %v4972_v11, 2  ;;  %v1448_v57 = vrot.slane %v4977_v14, 2  ;;  %v5024_v6 = vmul.f32 %v1490_v41, %v4944_v1 }
 0x1b1   : > { %v4967_v10 = vld [vmem:[#allocation2] sm:$0xff]  ;;  %v5041_v48 = vmul.f32 %v7054_v45, %v4944_v1  ;;  %v5046_v61 = vmul.f32 %v7053_v46, %v4944_v1  ;;  %v5059_v49 = vmul.f32 %v7050_v50, %v4944_v1  ;;  %v5064_v47 = vmul.f32 %v7047_v51, %v4944_v1 }
 0x1b2   : > { %v761_v37 = vmul.f32 %v760_v18, %v4967_v10  ;;  %v5026_v9 = vld [vmem:[#allocation2 + $0x18] sm:$0xff]  ;;  %v775_v56 = vmul.f32 %v774_v12, %v4967_v10  ;;  %v5036_v62 = vmul.f32 %v830_v19, %v4967_v10  ;;  %v5080_v44 = vmul.f32 %v7051_v55, %v4944_v1 }
 0x1b3   : > { %v5054_v53 = vmul.f32 %v1328_v30, %v5026_v9  ;;  %v5075_v30 = vmul.f32 %v864_v21, %v4967_v10  ;;  %v5085_v51 = vmul.f32 %v7052_v52, %v4944_v1  ;;  %v1261_v43 = vmul.f32 %v1259_v24, %v5026_v9 }
 0x1b4   : > { %765 = vrot.lane.b32.xlu0 %v761_v37, %s7039_s7  ;;  %v1465_v37 = vrot.slane %v4982_v16, 2  ;;  %v5097_v50 = vmul.f32 %v802_v15, %v4967_v10  ;;  %v5102_v55 = vmul.f32 %v1345_v31, %v5026_v9  ;;  %v5107_v52 = vmul.f32 %v1273_v25, %v5026_v9  ;;  %s5964_s7 = sld [smem:[#allocation15 + $0x100]] }
 0x1b5   : > { %v5118_v46 = vmul.f32 %v1301_v29, %v5026_v9  ;;  %v7055_v42 = vrot.slane %v5054_v53, 1  ;;  %v5127_v25 = vmul.f32 %v881_v22, %v4967_v10  ;;  %v5189_v45 = vmul.f32 %v1426_v38, %v5026_v9 }
 0x1b6   : > { %v5028_v2 = vld [vmem:[#allocation2 + $0x8] sm:$0xff]  ;;  %v5222_v7 = vmul.f32 %v1443_v39, %v5026_v9 }
 0x1b7   : > { %v762_v59 = vmul.f32 %v760_v18, %v5028_v2  ;;  %v5070_v18 = vmul.f32 %v847_v20, %v4967_v10  ;;  %v776_v31 = vmul.f32 %v774_v12, %v5028_v2  ;;  %v5138_v29 = vmul.f32 %v830_v19, %v5028_v2 }
 0x1b8   : > { %779 = vrot.lane.b32.xlu0 %v775_v56, %s7048_s9  ;;  %s7216_s9 = smov 127   ;;  %v789_v56 = vmul.f32 %v788_v13, %v4967_v10  ;;  %v5143_v12 = vmul.f32 %v847_v20, %v5028_v2  ;;  %v7056_v19 = vrot.slane %v5102_v55, 1  ;;  %v5160_v20 = vmul.f32 %v1379_v33, %v5026_v9 }
 0x1b9   : > { %767 = vrot.lane.b32.xlu1 %v762_v59, %s7216_s9  ;;  %v5112_v59 = vmul.f32 %v1287_v26, %v5026_v9  ;;  %v5132_v26 = vmul.f32 %v1362_v23, %v5026_v9  ;;  %v790_v23 = vmul.f32 %v788_v13, %v5028_v2  ;;  %v5165_v24 = vmul.f32 %v802_v15, %v5028_v2 }
 0x1ba   : > { %v947_v13 = vmul.f32 %v946_v34, %v4967_v10  ;;  %v5183_v33 = vsel %vm821_vm9, %v1333_v0, %v7055_v42  ;;  %v7063_v39 = vrot.slane %v5222_v7, 2  ;;  %v5246_v11 = vmul.f32 %v994_v35, %v5028_v2 }
 0x1bc   : > { %1264 = vrot.lane.b32.xlu0 %v1260_v5, %s7216_s9  ;;  %v5154_v5 = vmul.f32 %v864_v21, %v5028_v2  ;;  %v5178_v21 = vmul.f32 %v946_v34, %v5028_v2  ;;  %v951_v42 = vrot.slane %v947_v13, 2  ;;  %v7057_v34 = vrot.slane %v5189_v45, 2 }
 0x1bd   : > { %781 = vrot.lane.b32.xlu1 %v776_v31, %s7219_s15  ;;  %v5170_v31 = vmul.f32 %v881_v22, %v5028_v2  ;;  %v964_v22 = vmul.f32 %v963_v27, %v4967_v10  ;;  %v5211_v13 = vmul.f32 %v963_v27, %v5028_v2 }
 0x1be   : > { %v7059_v15 = vrot.slane %v5178_v21, 2  ;;  %v5229_v27 = vsel %vm903_vm10, %v1431_v40, %v7057_v34  ;;  %v1012_v40 = vmul.f32 %v1011_v36, %v4967_v10 }
 0x1bf   : > { %v968_v38 = vrot.slane %v964_v22, 2 }
 0x1c0   : > { %793 = vrot.lane.b32.xlu0 %v789_v56, %s4377_s1  ;;  %v5205_v56 = vsel %vm821_vm9, %v1350_v58, %v7056_v19  ;;  %v7058_v58 = vrot.slane %v5211_v13, 2  ;;  %v5235_v19 = vmul.f32 %v1460_v28, %v5026_v9  ;;  %v5254_v28 = vmul.f32 %v1011_v36, %v5028_v2 }
 0x1c1   : > { %1266 = vrot.lane.b32.xlu1 %v1261_v43, %s7216_s9  ;;  %v5217_v43 = vsel %vm903_vm10, %v951_v42, %v7059_v15  ;;  %v995_v42 = vmul.f32 %v994_v35, %v4967_v10  ;;  %v5266_v35 = vmul.f32 %v1490_v41, %v5026_v9  ;;  %v5273_v36 = vsel %vm903_vm10, %v1448_v57, %v7063_v39 }
 0x1c2   : > { %v7062_v22 = vrot.slane %v5235_v19, 2  ;;  %v1495_v41 = vrot.slane %v5024_v6, 3  ;;  %v1029_v57 = vmul.f32 %v1028_v32, %v4967_v10  ;;  %v7223_v6 = vstv %s7188_s13  ;;  %s3642_s13 = sld [smem:[#allocation10 + $0x8b]] }
 0x1c3   : > { %v999_v34 = vrot.slane %v995_v42, 3  ;;  %v7064_v15 = vrot.slane %v5266_v35, 3 }
 0x1c4   : > { %1278 = vrot.lane.b32.xlu0 %v4997_v4, %s7219_s15  ;;  %v5260_v4 = vsel %vm903_vm10, %v968_v38, %v7058_v58  ;;  %v1016_v38 = vrot.slane %v1012_v40, 3  ;;  %v7061_v58 = vrot.slane %v5254_v28, 3  ;;  %v5282_v42 = vsel %vm903_vm10, %v1465_v37, %v7062_v22 }
 0x1c5   : > { %795 = vrot.lane.b32.xlu1 %v790_v23, %s4377_s1  ;;  %v7060_v23 = vrot.slane %v5246_v11, 3  ;;  %v5304_v37 = vmul.f32 %v1028_v32, %v5028_v2  ;;  %v5309_v40 = vmul.f32 %v7223_v6, %v5026_v9  ;;  %v1033_v32 = vrot.slane %v1029_v57, 3 }
 0x1c6   : > { %v5299_v16 = vsel %vm985_vm11, %v1016_v38, %v7061_v58  ;;  %v5321_v38 = vsel %vm985_vm11, %v1495_v41, %v7064_v15  ;;  %v1512_v58 = vrot.slane %v5041_v48, 3  ;;  %v7231_v48 = vstv %s7189_s2  ;;  %s7251_s2 = sld [smem:[#allocation79_spill]] }
 0x1c7   : > { %v5294_v14 = vsel %vm985_vm11, %v999_v34, %v7060_v23  ;;  %v7225_v34 = vrot.slane %v5036_v62, 1  ;;  %v7065_v6 = vrot.slane %v5304_v37, 3  ;;  %v5342_v57 = vmul.f32 %v7231_v48, %v5026_v9 }
 0x1c8   : > { %807 = vrot.lane.b32.xlu0 %v5097_v50, %s4378_s12  ;;  %v7224_v50 = vrot.slane %v5138_v29, 1  ;;  %v1529_v15 = vrot.slane %v5046_v61, 3  ;;  %v7238_v48 = vrot.slane %v5075_v30, 1 }
 0x1c9   : > { %1280 = vrot.lane.b32.xlu1 %v5107_v52, %s7219_s15  ;;  %v7226_v52 = vstv %s7185_s19  ;;  %7232 = vst [vmem:[#allocation88_spill] sm:$0xff] %v5342_v57  ;;  %s5627_s19 = sld [smem:[#allocation10 + $0xb]] }
 0x1ca   : > { %v837_v23 = vsel %vm821_vm9, %v7225_v34, %v7224_v50  ;;  %v1046_v39 = vmul.f32 %v7226_v52, %v4967_v10  ;;  %v7227_v0 = vmov %v7226_v52  ;;  %v7228_v50 = vrot.slane %v5143_v12, 1 }
 0x1cb   : > { %v5332_v62 = vmul.f32 %v7227_v0, %v5028_v2  ;;  %v7229_v34 = vrot.slane %v5070_v18, 1  ;;  %v7234_v52 = vstv %s7191_s3  ;;  %v5355_v18 = vsel %vm985_vm11, %v1033_v32, %v7065_v6  ;;  %s7240_s3 = sld [smem:[#allocation75_spill]] }
 0x1cc   : > { %v5348_v22 = vmul.f32 %v7234_v52, %v5026_v9  ;;  %1292 = vrot.lane.b32.xlu0 %v5002_v3, %s4377_s1  ;;  %v7236_v0 = vrot.slane %v5309_v40, 3  ;;  %v1050_v61 = vrot.slane %v1046_v39, 3  ;;  %v7237_v3 = vrot.slane %v5154_v5, 1 }
 0x1cd   : > { %v854_v41 = vsel %vm821_vm9, %v7229_v34, %v7228_v50  ;;  %v7066_v34 = vrot.slane %v5332_v62, 3  ;;  %809 = vrot.lane.b32.xlu1 %v5165_v24, %s4378_s12  ;;  %v1546_v6 = vrot.slane %v5059_v49, 3  ;;  %v7239_v24 = vstv %s7230_s28  ;;  %s5968_s28 = sld [smem:[#allocation15 + $0x102]] }
 0x1ce   : > { %7235 = vst [vmem:[#allocation89_spill] sm:$0xff] %v5348_v22  ;;  %v5360_v50 = vsel %vm985_vm11, %v1512_v58, %v7236_v0  ;;  %v5370_v52 = vsel %vm821_vm9, %v7238_v48, %v7237_v3  ;;  %v1077_v0 = vmul.f32 %v7239_v24, %v4967_v10  ;;  %v7241_v30 = vmov %v7239_v24 }
 0x1cf   : > { %v5378_v39 = vsel %vm985_vm11, %v1050_v61, %v7066_v34  ;;  %v5386_v3 = vmul.f32 %v7241_v30, %v5028_v2  ;;  %v7243_v48 = vstv %s7233_s14  ;;  %v7244_v49 = vrot.slane %v5342_v57, 3  ;;  %s5970_s14 = sld [smem:[#allocation15 + $0x103]] }
 0x1d0   : > { %v1094_v32 = vmul.f32 %v7243_v48, %v4967_v10  ;;  %v7245_v61 = vrot.slane %v5348_v22, 3  ;;  %v7246_v24 = vmov %v7243_v48  ;;  %v7249_v30 = vstv %s4859_s29  ;;  %1306 = vrot.lane.b32.xlu0 %v5007_v17, %s4378_s12  ;;  %s7264_s29 = sld [smem:[#allocation80_spill]] }
 0x1d1   : > { %7242 = vst [vmem:[#allocation90_spill] sm:$0xff] %v5386_v3  ;;  %v5394_v58 = vsel %vm985_vm11, %v1529_v15, %v7244_v49  ;;  %v5404_v54 = vmul.f32 %v7246_v24, %v5028_v2  ;;  %v5409_v60 = vmul.f32 %v7249_v30, %v5026_v9  ;;  %v1081_v48 = vrot.slane %v1077_v0, 4  ;;  %1294 = vrot.lane.b32.xlu1 %v5112_v59, %s4377_s1 }
 0x1d2   : > { %v5399_v34 = vsel %vm985_vm11, %v1546_v6, %v7245_v61  ;;  %v7072_v15 = vrot.slane %v5386_v3, 4  ;;  %v1098_v49 = vrot.slane %v1094_v32, 4  ;;  %v1576_v22 = vrot.slane %v5064_v47, 4 }
 0x1d3   : > { %7248 = vst [vmem:[#allocation91_spill] sm:$0xff] %v5404_v54  ;;  %7250 = vst [vmem:[#allocation92_spill] sm:$0xff] %v5409_v60  ;;  %v7252_v24 = vstv %s7240_s3  ;;  %v7255_v59 = vstv %s4863_s18  ;;  %v1593_v61 = vrot.slane %v5080_v44, 4  ;;  %v7257_v6 = vstv %s7247_s6  ;;  %s7295_s18 = sld [smem:[#allocation84_spill]]  ;;  %s5972_s3 = sld [smem:[#allocation15 + $0x180]] }
 0x1d4   : > { %v1111_v30 = vmul.f32 %v7252_v24, %v4967_v10  ;;  %v7253_v17 = vmov %v7252_v24  ;;  %v5430_v47 = vsel %vm1067_vm12, %v1081_v48, %v7072_v15  ;;  %v5435_v32 = vmul.f32 %v7255_v59, %v5026_v9  ;;  %838 = vrot.lane.b32.xlu0 %v837_v23, %s7216_s9  ;;  %s5978_s6 = sld [smem:[#allocation15 + $0x181]] }
 0x1d5   : > { %v5425_v0 = vmul.f32 %v7253_v17, %v5028_v2  ;;  %v817_v24 = vmul.f32 %v7257_v6, %v4967_v10  ;;  %v7258_v57 = vrot.slane %v5404_v54, 4  ;;  %v7259_v3 = vrot.slane %v5409_v60, 4  ;;  %1308 = vrot.lane.b32.xlu1 %v5118_v46, %s4378_s12 }
 0x1d6   : > { %7256 = vst [vmem:[#allocation94_spill] sm:$0xff] %v5435_v32  ;;  %v1115_v15 = vrot.slane %v1111_v30, 4  ;;  %v7078_v44 = vrot.slane %v5435_v32, 4  ;;  %v5457_v54 = vmul.f32 %v7257_v6, %v5028_v2  ;;  %v7266_v30 = vstv %s4868_s27  ;;  %s7273_s27 = sld [smem:[#allocation81_spill]] }
 0x1d7   : > { %7254 = vst [vmem:[#allocation93_spill] sm:$0xff] %v5425_v0  ;;  %v5444_v17 = vsel %vm1067_vm12, %v1098_v49, %v7258_v57  ;;  %v5449_v48 = vsel %vm1067_vm12, %v1576_v22, %v7259_v3  ;;  %v7075_v59 = vrot.slane %v5425_v0, 4  ;;  %v822_v57 = vrot.slane %v817_v24, 1 }
 0x1d8   : > { %7260 = vst [vmem:[#allocation95_spill] sm:$0xff] %v5457_v54  ;;  %v7261_v49 = vstv %s7251_s2  ;;  %v5477_v24 = vmul.f32 %v7266_v30, %v5026_v9  ;;  %v1610_v6 = vrot.slane %v5085_v51, 4  ;;  %v5483_v46 = vsel %vm1067_vm12, %v1593_v61, %v7078_v44  ;;  %855 = vrot.lane.b32.xlu0 %v854_v41, %s7219_s15  ;;  %s5980_s2 = sld [smem:[#allocation15 + $0x182]] }
 0x1d9   : > { %v1128_v60 = vmul.f32 %v7261_v49, %v4967_v10  ;;  %v5467_v22 = vsel %vm1067_vm12, %v1115_v15, %v7075_v59  ;;  %v7263_v23 = vmov %v7261_v49  ;;  %7268 = vst [vmem:[#allocation99_spill] sm:$0xff] %v5483_v46  ;;  %v7080_v49 = vrot.slane %v5457_v54, 1 }
 0x1da   : > { %7262 = vst [vmem:[#allocation96_spill] sm:$0xff] %v5467_v22  ;;  %v5472_v3 = vmul.f32 %v7263_v23, %v5028_v2  ;;  %7267 = vst [vmem:[#allocation98_spill] sm:$0xff] %v5477_v24  ;;  %v7269_v59 = vstv %s4876_s26  ;;  %v7272_v32 = vstv %s4878_s24  ;;  %s7284_s26 = sld [smem:[#allocation82_spill]]  ;;  %s7297_s24 = sld [smem:[#allocation85_spill]] }
 0x1db   : > { %v1132_v15 = vrot.slane %v1128_v60, 4  ;;  %v1316_v0 = vmul.f32 %v7269_v59, %v4944_v1  ;;  %v7270_v30 = vmov %v7269_v59  ;;  %v1623_v61 = vmul.f32 %v7272_v32, %v4944_v1 }
 0x1dc   : > { %7265 = vst [vmem:[#allocation97_spill] sm:$0xff] %v5472_v3  ;;  %v5494_v51 = vmul.f32 %v7270_v30, %v5026_v9  ;;  %v5503_v60 = vsel %vm821_vm9, %v822_v57, %v7080_v49  ;;  %v7274_v44 = vmov %v7272_v32  ;;  %v7276_v30 = vstv %s7264_s29  ;;  %1336 = vrot.lane.b32.xlu0 %v5183_v33, %s7216_s9  ;;  %s5982_s29 = sld [smem:[#allocation15 + $0x183]] }
 0x1dd   : > { %v1320_v59 = vrot.slane %v1316_v0, 1  ;;  %v5508_v22 = vmul.f32 %v7274_v44, %v5026_v9  ;;  %v899_v23 = vmul.f32 %v7276_v30, %v4967_v10  ;;  %v7277_v32 = vrot.slane %v5138_v29, 1 }
 0x1de   : > { %7271 = vst [vmem:[#allocation100_spill] sm:$0xff] %v5494_v51  ;;  %v7278_v41 = vrot.slane %v5472_v3, 4  ;;  %v7279_v57 = vrot.slane %v5477_v24, 4  ;;  %v7082_v44 = vrot.slane %v5494_v51, 1  ;;  %v1627_v49 = vrot.slane %v1623_v61, 4 }
 0x1df   : > { %7275 = vst [vmem:[#allocation101_spill] sm:$0xff] %v5508_v22  ;;  %840 = vrot.lane.b32.xlu1 %v7277_v32, %s7216_s9  ;;  %v7280_v46 = vmov %v7276_v30  ;;  %v904_v32 = vrot.slane %v899_v23, 2  ;;  %v7290_v51 = vstv %s4908_s30  ;;  %s5786_s30 = sld [smem:[#allocation10]] }
 0x1e0   : > { %v5519_v54 = vsel %vm1067_vm12, %v1132_v15, %v7278_v41  ;;  %v5524_v0 = vsel %vm1067_vm12, %v1610_v6, %v7279_v57  ;;  %v5531_v29 = vmul.f32 %v7280_v46, %v5028_v2  ;;  %v7282_v15 = vstv %s4884_s22  ;;  %s7292_s22 = sld [smem:[#allocation83_spill]]  ;;  %872 = vrot.lane.b32.xlu0 %v5370_v52, %s4377_s1 }
 0x1e1   : > { %v1397_v41 = vmul.f32 %v7282_v15, %v4944_v1  ;;  %v5539_v24 = vsel %vm821_vm9, %v1320_v59, %v7082_v44  ;;  %v7283_v6 = vmov %v7282_v15  ;;  %v7286_v57 = vstv %s7273_s27  ;;  %s7392_s27 = smov 2  }
 0x1e2   : > { %7281 = vst [vmem:[#allocation102_spill] sm:$0xff] %v5531_v29  ;;  %v5544_v61 = vmul.f32 %v7283_v6, %v5026_v9  ;;  %v981_v46 = vmul.f32 %v7286_v57, %v4967_v10  ;;  %v7287_v30 = vmov %v7286_v57  ;;  %v7289_v15 = vrot.slane %v5508_v22, 4 }
 0x1e3   : > { %v5552_v23 = vmul.f32 %v7287_v30, %v5028_v2  ;;  %v7087_v6 = vrot.slane %v5531_v29, 2  ;;  %v1401_v44 = vrot.slane %v1397_v41, 2  ;;  %v1478_v3 = vmul.f32 %v7290_v51, %v4944_v1 }
 0x1e4   : > { %7285 = vst [vmem:[#allocation103_spill] sm:$0xff] %v5544_v61  ;;  %v5559_v59 = vsel %vm1067_vm12, %v1627_v49, %v7289_v15  ;;  %v7291_v57 = vrot.slane %v5143_v12, 1  ;;  %v986_v33 = vrot.slane %v981_v46, 3  ;;  %v7293_v49 = vmov %v7290_v51  ;;  %1353 = vrot.lane.b32.xlu0 %v5205_v56, %s7219_s15 }
 0x1e5   : > { %7288 = vst [vmem:[#allocation104_spill] sm:$0xff] %v5552_v23  ;;  %v5573_v15 = vmul.f32 %v7293_v49, %v5026_v9  ;;  %v5578_v41 = vsel %vm903_vm10, %v904_v32, %v7087_v6  ;;  %v1482_v51 = vrot.slane %v1478_v3, 3  ;;  %v7296_v12 = vstv %s7284_s26  ;;  %s7393_s26 = sld [smem:[#allocation47_spill]] }
 0x1e6   : > { %857 = vrot.lane.b32.xlu1 %v7291_v57, %s7219_s15  ;;  %v1063_v57 = vmul.f32 %v7296_v12, %v4967_v10  ;;  %v7298_v30 = vmov %v7296_v12  ;;  %v7300_v22 = vrot.slane %v5544_v61, 2  ;;  %v7301_v29 = vrot.slane %v5552_v23, 3 }
 0x1e7   : > { %7294 = vst [vmem:[#allocation105_spill] sm:$0xff] %v5573_v15  ;;  %v5586_v46 = vmul.f32 %v7298_v30, %v5028_v2  ;;  %v7304_v6 = vstv %s4923_s23  ;;  %v7309_v23 = vrot.slane %v5054_v53, 1  ;;  %s7318_s23 = sld [smem:[#allocation76_spill]] }
 0x1e8   : > { %v5591_v49 = vsel %vm903_vm10, %v1401_v44, %v7300_v22  ;;  %v5596_v32 = vsel %vm985_vm11, %v986_v33, %v7301_v29  ;;  %v1559_v12 = vmul.f32 %v7304_v6, %v4944_v1  ;;  %v1068_v30 = vrot.slane %v1063_v57, 4 }
 0x1e9   : > { %7299 = vst [vmem:[#allocation106_spill] sm:$0xff] %v5586_v46  ;;  %7302 = vst [vmem:[#allocation107_spill] sm:$0xff] %v5596_v32  ;;  %v7306_v44 = vmov %v7304_v6  ;;  %v7308_v33 = vstv %s7292_s22  ;;  %v7310_v6 = vrot.slane %v5573_v15, 3  ;;  %v7312_v22 = vstv %s7295_s18 }
 0x1ea   : > { %v5608_v29 = vmul.f32 %v7306_v44, %v5026_v9  ;;  %v1662_v3 = vmul.f32 %v7308_v33, %v4967_v10  ;;  %1338 = vrot.lane.b32.xlu1 %v7309_v23, %s7216_s9  ;;  %v1563_v57 = vrot.slane %v1559_v12, 4  ;;  %v1666_v61 = vmul.f32 %v7312_v22, %v4944_v1 }
 0x1eb   : > { %v5619_v52 = vsel %vm985_vm11, %v1482_v51, %v7310_v6  ;;  %v7313_v44 = vstv %s7297_s24  ;;  %v7314_v33 = vrot.slane %v5586_v46, 4  ;;  %v7317_v51 = vstv %s7303_s20 }
 0x1ec   : > { %7311 = vst [vmem:[#allocation108_spill] sm:$0xff] %v5619_v52  ;;  %v2074_v32 = vmul.f32 %v7313_v44, %v4967_v10  ;;  %v2078_v12 = vmul.f32 %v7317_v51, %v4944_v1  ;;  %v7319_v6 = vstv %s7292_s22  ;;  %v5641_v15 = vadd.f32 %v1666_v61, %v1662_v3  ;;  %s1705_s22 = sld [smem:[#allocation16]] }
 0x1ed   : > { %v5632_v53 = vsel %vm1067_vm12, %v1068_v30, %v7314_v33  ;;  %v1663_v22 = vmul.f32 %v7319_v6, %v5028_v2  ;;  %v7321_v44 = vstv %s7295_s18  ;;  %v7322_v46 = vstv %s7305_s21  ;;  %s6021_s18 = sld [smem:[#allocation16 + $0x1]] }
 0x1ee   : > { %7315 = vst [vmem:[#allocation109_spill] sm:$0xff] %v5632_v53  ;;  %7320 = vst [vmem:[#allocation110_spill] sm:$0xff] %v5641_v15  ;;  %v1667_v52 = vmul.f32 %v7321_v44, %v5026_v9  ;;  %v2477_v30 = vmul.f32 %v7322_v46, %v4967_v10  ;;  %v7323_v33 = vstv %s7307_s25  ;;  %v7324_v51 = vrot.slane %v5608_v29, 4 }
 0x1ef   : > { %v2481_v23 = vmul.f32 %v7323_v33, %v4944_v1  ;;  %v5659_v3 = vadd.f32 %v2078_v12, %v2074_v32  ;;  %v7326_v6 = vstv %s7297_s24  ;;  %v7327_v46 = vstv %s7303_s20  ;;  %s6023_s24 = sld [smem:[#allocation18]]  ;;  %s6026_s20 = sld [smem:[#allocation18 + $0x1]] }
 0x1f0   : > { %v5657_v61 = vsel %vm1067_vm12, %v1563_v57, %v7324_v51  ;;  %v2075_v44 = vmul.f32 %v7326_v6, %v5028_v2  ;;  %v2079_v15 = vmul.f32 %v7327_v46, %v5026_v9  ;;  %v7328_v33 = vrot.slane %v5154_v5, 1 }
 0x1f1   : > { %7325 = vst [vmem:[#allocation111_spill] sm:$0xff] %v5659_v3  ;;  %v5670_v53 = vadd.f32 %v1667_v52, %v1663_v22  ;;  %v5672_v56 = vadd.f32 %v2481_v23, %v2477_v30  ;;  %v7330_v57 = vstv %s7316_s16  ;;  %v7331_v32 = vstv %s7318_s23  ;;  %s6042_s16 = sld [smem:[#allocation18 + $0x3]] }
 0x1f2   : > { %874 = vrot.lane.b32.xlu1 %v7328_v33, %s4377_s1  ;;  %v2880_v51 = vmul.f32 %v7330_v57, %v4967_v10  ;;  %v2884_v12 = vmul.f32 %v7331_v32, %v4944_v1  ;;  %v5680_v6 = vadd.f32 %v2079_v15, %v2075_v44  ;;  %v7332_v46 = vstv %s7305_s21  ;;  %s6028_s21 = sld [smem:[#allocation16 + $0x2]] }
 0x1f3   : > { %7329 = vst [vmem:[#allocation112_spill] sm:$0xff] %v5672_v56  ;;  %v2478_v3 = vmul.f32 %v7332_v46, %v5028_v2  ;;  %v7333_v5 = vstv %s7307_s25  ;;  %v7334_v52 = vmov %v7330_v57  ;;  %v7335_v22 = vrot.slane %v5170_v31, 1  ;;  %s6033_s25 = sld [smem:[#allocation18 + $0x2]] }
 0x1f4   : > { %v2482_v33 = vmul.f32 %v7333_v5, %v5026_v9  ;;  %v2881_v23 = vmul.f32 %v7334_v52, %v5028_v2  ;;  %v7336_v30 = vrot.slane %v5127_v25, 1  ;;  %v1368_v32 = vrot.slane %v5132_v26, 1 }
 0x1f5   : > { %v5697_v56 = vadd.f32 %v2884_v12, %v2880_v51  ;;  %v7337_v15 = vstv %s7318_s23  ;;  %v7338_v5 = vrot.slane %v5102_v55, 1  ;;  %v912_v25 = vstv %s5627_s19  ;;  %s6035_s19 = sld [smem:[#allocation16 + $0x3]]  ;;  %s7398_s23 = sld [smem:[#allocation46_spill]] }
 0x1f6   : > { %v888_v57 = vsel %vm821_vm9, %v7336_v30, %v7335_v22  ;;  %v2885_v44 = vmul.f32 %v7337_v15, %v5026_v9  ;;  %v5703_v46 = vadd.f32 %v2482_v33, %v2478_v3  ;;  %v7339_v22 = vrot.slane %v4964_v8, 1 }
 0x1f7   : > { %889 = vrot.lane.b32.xlu0 %v888_v57, %s4378_s12  ;;  %1355 = vrot.lane.b32.xlu1 %v7338_v5, %s7219_s15  ;;  %v1384_v51 = vrot.slane %v5016_v63, 1  ;;  %v1385_v12 = vrot.slane %v5160_v20, 1  ;;  %v914_v30 = vmul.f32 %v912_v25, %v5028_v2  ;;  %v7340_v3 = vrot.slane %v5170_v31, 1 }
 0x1f8   : > { %v5708_v52 = vadd.f32 %v2885_v44, %v2881_v23  ;;  %v1369_v26 = vsel %vm821_vm9, %v7339_v22, %v1368_v32  ;;  %v913_v55 = vmul.f32 %v912_v25, %v4967_v10  ;;  %v929_v33 = vstv %s3608_s17 }
 0x1f9   : > { %v1386_v23 = vsel %vm821_vm9, %v1384_v51, %v1385_v12  ;;  %v918_v8 = vrot.slane %v914_v30, 2  ;;  %v931_v57 = vmul.f32 %v929_v33, %v5028_v2  ;;  %v1409_v63 = vstv %s3642_s13  ;;  %s3662_s13 = sld [smem:[#allocation19 + $0x2]] }
 0x1fa   : > { %v917_v20 = vrot.slane %v913_v55, 2  ;;  %v930_v15 = vmul.f32 %v929_v33, %v4967_v10  ;;  %v1410_v5 = vmul.f32 %v1409_v63, %v4944_v1  ;;  %v1411_v25 = vmul.f32 %v1409_v63, %v5026_v9 }
 0x1fb   : > { %1370 = vrot.lane.b32.xlu0 %v1369_v26, %s4377_s1  ;;  %891 = vrot.lane.b32.xlu1 %v7340_v3, %s4378_s12  ;;  %v935_v31 = vrot.slane %v931_v57, 2  ;;  %v7342_v3 = vrot.slane %v5189_v45, 2  ;;  %v7345_v45 = vrot.slane %v5235_v19, 2  ;;  %v7348_v19 = vrot.slane %v5266_v35, 3  ;;  %s3568_s17 = sadd.s32 4294967294, %s7398_s23  ;;  %s6187_s23 = sld [smem:[#allocation19 + $0x10]] }
 0x1fc   : > { %v919_v44 = vsel %vm903_vm10, %v917_v20, %v918_v8  ;;  %v934_v22 = vrot.slane %v930_v15, 2  ;;  %v1414_v51 = vrot.slane %v1410_v5, 2  ;;  %v1415_v30 = vrot.slane %v1411_v25, 2 }
 0x1fe   : > { %v936_v26 = vsel %vm903_vm10, %v934_v22, %v935_v31 }
 0x1ff   : > { %1387 = vrot.lane.b32.xlu0 %v1386_v23, %s4378_s12  ;;  %1372 = vrot.lane.b32.xlu1 %v1368_v32, %s4377_s1  ;;  %v1416_v32 = vsel %vm903_vm10, %v1414_v51, %v1415_v30  ;;  %v1253_v23 = vstv %s5803_s4  ;;  %v7360_v51 = vld [vmem:[#allocation96_spill] sm:$0xff]  ;;  %s3664_s4 = sld [smem:[#allocation19 + $0x4]] }
 0x203   : > { %920 = vrot.lane.b32.xlu0 %v919_v44, %s7216_s9  ;;  %1389 = vrot.lane.b32.xlu1 %v1385_v12, %s4378_s12  ;;  %v7341_v12 = vrot.slane %v5178_v21, 2  ;;  %v7344_v21 = vrot.slane %v5222_v7, 2  ;;  %v7347_v7 = vrot.slane %v5254_v28, 3  ;;  %v7350_v28 = vrot.slane %v5309_v40, 3 }
 0x207   : > { %937 = vrot.lane.b32.xlu0 %v936_v26, %s7219_s15  ;;  %922 = vrot.lane.b32.xlu1 %v918_v8, %s7216_s9 }
 0x20b   : > { %1417 = vrot.lane.b32.xlu0 %v1416_v32, %s7216_s9  ;;  %939 = vrot.lane.b32.xlu1 %v935_v31, %s7219_s15  ;;  %v7358_v31 = vld [vmem:[#allocation91_spill] sm:$0xff] }
 0x20c   : > { %v7359_v5 = vrot.slane %v7358_v31, 4 }
 0x20f   : > { %954 = vrot.lane.b32.xlu0 %v5217_v43, %s4377_s1  ;;  %1419 = vrot.lane.b32.xlu1 %v1415_v30, %s7216_s9  ;;  %v7343_v43 = vrot.slane %v5211_v13, 2  ;;  %v7346_v13 = vrot.slane %v5246_v11, 3  ;;  %v7361_v30 = vld [vmem:[#allocation92_spill] sm:$0xff] }
 0x210   : > { %v7362_v32 = vrot.slane %v7361_v30, 4 }
 0x213   : > { %1434 = vrot.lane.b32.xlu0 %v5229_v27, %s7219_s15  ;;  %956 = vrot.lane.b32.xlu1 %v7341_v12, %s4377_s1  ;;  %v7349_v27 = vrot.slane %v5304_v37, 3  ;;  %v7352_v37 = vld [vmem:[#allocation88_spill] sm:$0xff] }
 0x214   : > { %v7353_v40 = vrot.slane %v7352_v37, 3 }
 0x217   : > { %971 = vrot.lane.b32.xlu0 %v5260_v4, %s4378_s12  ;;  %1436 = vrot.lane.b32.xlu1 %v7342_v3, %s7219_s15 }
 0x21b   : > { %1451 = vrot.lane.b32.xlu0 %v5273_v36, %s4377_s1  ;;  %973 = vrot.lane.b32.xlu1 %v7343_v43, %s4378_s12  ;;  %v7351_v36 = vrot.slane %v5332_v62, 3  ;;  %v7363_v43 = vld [vmem:[#allocation99_spill] sm:$0xff] }
 0x21f   : > { %1468 = vrot.lane.b32.xlu0 %v5282_v42, %s4378_s12  ;;  %1453 = vrot.lane.b32.xlu1 %v7344_v21, %s4377_s1 }
 0x223   : > { %1002 = vrot.lane.b32.xlu0 %v5294_v14, %s7216_s9  ;;  %1470 = vrot.lane.b32.xlu1 %v7345_v45, %s4378_s12 }
 0x226   : > { %v766_v11 = vpop.permute.xlu0 %765 }
 0x227   : > { %1019 = vrot.lane.b32.xlu0 %v5299_v16, %s7219_s15  ;;  %1004 = vrot.lane.b32.xlu1 %v7346_v13, %s7216_s9  ;;  %v754_v16 = vstv %s5786_s30  ;;  %s3661_s30 = sld [smem:[#allocation19 + $0x1]] }
 0x228   : > { %v755_v62 = vmul.f32 %v754_v16, %v4967_v10  ;;  %v7356_v10 = vld [vmem:[#allocation90_spill] sm:$0xff] }
 0x229   : > { %v7357_v57 = vrot.slane %v7356_v10, 4 }
 0x22a   : > { %v780_v4 = vpop.permute.xlu0 %779 }
 0x22b   : > { %1498 = vrot.lane.b32.xlu0 %v5321_v38, %s7216_s9  ;;  %1021 = vrot.lane.b32.xlu1 %v7347_v7, %s7219_s15  ;;  %v5793_v35 = vpop.permute.xlu1 %767 }
 0x22e   : > { %v1265_v42 = vpop.permute.xlu0 %1264 }
 0x22f   : > { %1036 = vrot.lane.b32.xlu0 %v5355_v18, %s4377_s1  ;;  %1500 = vrot.lane.b32.xlu1 %v7348_v19, %s7216_s9  ;;  %v5800_v14 = vpop.permute.xlu1 %781  ;;  %v7366_v19 = vld [vmem:[#allocation94_spill] sm:$0xff] }
 0x232   : > { %v794_v38 = vpop.permute.xlu0 %793 }
 0x233   : > { %1515 = vrot.lane.b32.xlu0 %v5360_v50, %s7219_s15  ;;  %1038 = vrot.lane.b32.xlu1 %v7349_v27, %s4377_s1  ;;  %v5813_v18 = vpop.permute.xlu1 %1266  ;;  %v771_v50 = vadd.f32 %v766_v11, %v755_v62  ;;  %v7367_v27 = vrot.slane %v7366_v19, 4 }
 0x235   : > { %v785_v55 = vadd.f32 %v780_v4, %v771_v50  ;;  %v7368_v4 = vld [vmem:[#allocation97_spill] sm:$0xff] }
 0x237   : > { %1053 = vrot.lane.b32.xlu0 %v5378_v39, %s4378_s12  ;;  %1517 = vrot.lane.b32.xlu1 %v7350_v28, %s7219_s15  ;;  %v5820_v33 = vpop.permute.xlu1 %795  ;;  %v799_v8 = vadd.f32 %v794_v38, %v785_v55 }
 0x23b   : > { %1532 = vrot.lane.b32.xlu0 %v5394_v58, %s4377_s1  ;;  %1055 = vrot.lane.b32.xlu1 %v7351_v36, %s4378_s12  ;;  %v7354_v58 = vld [vmem:[#allocation89_spill] sm:$0xff]  ;;  %v5831_v20 = vpop.permute.xlu1 %1280  ;;  %v7369_v36 = vrot.slane %v7368_v4, 4 }
 0x23c   : > { %v7355_v39 = vrot.slane %v7354_v58, 3 }
 0x23f   : > { %1549 = vrot.lane.b32.xlu0 %v5399_v34, %s4378_s12  ;;  %1534 = vrot.lane.b32.xlu1 %v7353_v40, %s4377_s1  ;;  %v1279_v34 = vpop.permute.xlu0 %1278  ;;  %v5839_v26 = vpop.permute.xlu1 %809 }
 0x243   : > { %1084 = vrot.lane.b32.xlu0 %v5430_v47, %s7216_s9  ;;  %1551 = vrot.lane.b32.xlu1 %v7355_v39, %s4378_s12  ;;  %v808_v63 = vpop.permute.xlu0 %807  ;;  %v1254_v47 = vmul.f32 %v1253_v23, %v4944_v1  ;;  %v5846_v12 = vpop.permute.xlu1 %1294 }
 0x244   : > { %v813_v15 = vadd.f32 %v808_v63, %v799_v8 }
 0x245   : > { %v1270_v44 = vadd.f32 %v1265_v42, %v1254_v47 }
 0x247   : > { %1101 = vrot.lane.b32.xlu0 %v5444_v17, %s7219_s15  ;;  %1086 = vrot.lane.b32.xlu1 %v7357_v57, %s7216_s9  ;;  %v827_v17 = vadd.f32 %v5503_v60, %v813_v15  ;;  %v1293_v25 = vpop.permute.xlu0 %1292  ;;  %v1284_v22 = vadd.f32 %v1279_v34, %v1270_v44  ;;  %v7364_v60 = vld [vmem:[#allocation93_spill] sm:$0xff]  ;;  %v5854_v7 = vpop.permute.xlu1 %1308 }
 0x248   : > { %v7365_v21 = vrot.slane %v7364_v60, 4 }
 0x249   : > { %v1298_v1 = vadd.f32 %v1293_v25, %v1284_v22 }
 0x24b   : > { %1579 = vrot.lane.b32.xlu0 %v5449_v48, %s7216_s9  ;;  %1103 = vrot.lane.b32.xlu1 %v7359_v5, %s7219_s15  ;;  %v1307_v48 = vpop.permute.xlu0 %1306 }
 0x24c   : > { %v1312_v3 = vadd.f32 %v1307_v48, %v1298_v1 }
 0x24e   : > { %v1325_v45 = vadd.f32 %v5539_v24, %v1312_v3 }
 0x24f   : > { %1118 = vrot.lane.b32.xlu0 %v7360_v51, %s4377_s1  ;;  %1581 = vrot.lane.b32.xlu1 %v7362_v32, %s7216_s9  ;;  %v839_v13 = vpop.permute.xlu0 %838 }
 0x250   : > { %v844_v62 = vadd.f32 %v839_v13, %v827_v17 }
 0x251   : > { %v5861_v28 = vpop.permute.xlu1 %840 }
 0x253   : > { %1596 = vrot.lane.b32.xlu0 %v7363_v43, %s7219_s15  ;;  %1120 = vrot.lane.b32.xlu1 %v7365_v21, %s4377_s1  ;;  %v856_v11 = vpop.permute.xlu0 %855 }
 0x254   : > { %v861_v39 = vadd.f32 %v856_v11, %v844_v62 }
 0x257   : > { %1135 = vrot.lane.b32.xlu0 %v5519_v54, %s4378_s12  ;;  %1598 = vrot.lane.b32.xlu1 %v7367_v27, %s7219_s15  ;;  %v1337_v24 = vpop.permute.xlu0 %1336  ;;  %v7370_v54 = vld [vmem:[#allocation98_spill] sm:$0xff] }
 0x258   : > { %v5868_v42 = vpop.permute.xlu1 %857  ;;  %v7371_v37 = vrot.slane %v7370_v54, 4  ;;  %v1342_v57 = vadd.f32 %v1337_v24, %v1325_v45 }
 0x25b   : > { %1613 = vrot.lane.b32.xlu0 %v5524_v0, %s4377_s1  ;;  %1137 = vrot.lane.b32.xlu1 %v7369_v36, %s4378_s12  ;;  %v873_v40 = vpop.permute.xlu0 %872  ;;  %v7372_v0 = vld [vmem:[#allocation101_spill] sm:$0xff]  ;;  %v7374_v36 = vld [vmem:[#allocation107_spill] sm:$0xff] }
 0x25c   : > { %v5875_v38 = vpop.permute.xlu1 %1338  ;;  %v7373_v50 = vrot.slane %v7372_v0, 4  ;;  %v878_v55 = vadd.f32 %v873_v40, %v861_v39  ;;  %v7375_v39 = vld [vmem:[#allocation108_spill] sm:$0xff] }
 0x25f   : > { %1630 = vrot.lane.b32.xlu0 %v5559_v59, %s4378_s12  ;;  %1615 = vrot.lane.b32.xlu1 %v7371_v37, %s4377_s1  ;;  %v1354_v58 = vpop.permute.xlu0 %1353 }
 0x260   : > { %v1359_v15 = vadd.f32 %v1354_v58, %v1342_v57  ;;  %v756_v57 = vmul.f32 %v754_v16, %v5028_v2 }
 0x263   : > { %1632 = vrot.lane.b32.xlu1 %v7373_v50, %s4378_s12 }
 0x264   : > { %v5880_v34 = vpop.permute.xlu1 %874 }
 0x269   : > { %v890_v8 = vpop.permute.xlu0 %889  ;;  %v5882_v10 = vpop.permute.xlu1 %1355 }
 0x26a   : > { %v895_v59 = vadd.f32 %v890_v8, %v878_v55 }
 0x26c   : > { %v909_v63 = vadd.f32 %v5578_v41, %v895_v59 }
 0x26d   : > { %v1371_v47 = vpop.permute.xlu0 %1370  ;;  %v5885_v44 = vpop.permute.xlu1 %891 }
 0x26e   : > { %v1376_v31 = vadd.f32 %v1371_v47, %v1359_v15 }
 0x271   : > { %v1388_v5 = vpop.permute.xlu0 %1387  ;;  %v5887_v17 = vpop.permute.xlu1 %1372 }
 0x272   : > { %v1393_v25 = vadd.f32 %v1388_v5, %v1376_v31 }
 0x274   : > { %v1406_v22 = vadd.f32 %v5591_v49, %v1393_v25 }
 0x275   : > { %v921_v51 = vpop.permute.xlu0 %920  ;;  %v5890_v1 = vpop.permute.xlu1 %1389 }
 0x276   : > { %v926_v60 = vadd.f32 %v921_v51, %v909_v63  ;;  %v772_v63 = vadd.f32 %v5793_v35, %v756_v57  ;;  %v1255_v51 = vmul.f32 %v1253_v23, %v5026_v9  ;;  %v7376_v35 = vld [vmem:[#allocation95_spill] sm:$0xff]  ;;  %v7381_v57 = vld [vmem:[#allocation102_spill] sm:$0xff] }
 0x277   : > { %v7377_v16 = vrot.slane %v7376_v35, 1 }
 0x278   : > { %v786_v31 = vadd.f32 %v5800_v14, %v772_v63 }
 0x279   : > { %v938_v30 = vpop.permute.xlu0 %937  ;;  %v5892_v32 = vpop.permute.xlu1 %922 }
 0x27a   : > { %v943_v45 = vadd.f32 %v938_v30, %v926_v60  ;;  %v800_v5 = vadd.f32 %v5820_v33, %v786_v31 }
 0x27c   : > { %v814_v30 = vadd.f32 %v5839_v26, %v800_v5 }
 0x27d   : > { %v1418_v48 = vpop.permute.xlu0 %1417  ;;  %v5894_v3 = vpop.permute.xlu1 %939 }
 0x27e   : > { %v1423_v4 = vadd.f32 %v1418_v48, %v1406_v22  ;;  %v1271_v48 = vadd.f32 %v5813_v18, %v1255_v51 }
 0x280   : > { %v1285_v2 = vadd.f32 %v5831_v20, %v1271_v48 }
 0x281   : > { %v955_v41 = vpop.permute.xlu0 %954  ;;  %v5896_v43 = vpop.permute.xlu1 %1419 }
 0x282   : > { %v960_v19 = vadd.f32 %v955_v41, %v943_v45  ;;  %v1299_v14 = vadd.f32 %v5846_v12, %v1285_v2  ;;  %v7383_v2 = vld [vmem:[#allocation103_spill] sm:$0xff] }
 0x283   : > { %v7384_v35 = vrot.slane %v7383_v2, 2  ;;  %v1639_v2 = vstv %s5952_s10  ;;  %s3700_s10 = sld [smem:[#allocation19 + $0x84]] }
 0x284   : > { %v1313_v9 = vadd.f32 %v5854_v7, %v1299_v14 }
 0x285   : > { %v1435_v21 = vpop.permute.xlu0 %1434  ;;  %v5898_v13 = vpop.permute.xlu1 %956 }
 0x286   : > { %v1440_v37 = vadd.f32 %v1435_v21, %v1423_v4  ;;  %v828_v21 = vadd.f32 %v7377_v16, %v814_v30 }
 0x288   : > { %v845_v33 = vadd.f32 %v5861_v28, %v828_v21  ;;  %v7380_v28 = vld [vmem:[#allocation109_spill] sm:$0xff] }
 0x289   : > { %v972_v49 = vpop.permute.xlu0 %971  ;;  %v5900_v27 = vpop.permute.xlu1 %1436 }
 0x28a   : > { %v977_v11 = vadd.f32 %v972_v49, %v960_v19  ;;  %v862_v23 = vadd.f32 %v5868_v42, %v845_v33  ;;  %v7385_v33 = vld [vmem:[#allocation104_spill] sm:$0xff] }
 0x28c   : > { %v991_v24 = vadd.f32 %v7374_v36, %v977_v11  ;;  %v879_v26 = vadd.f32 %v5880_v34, %v862_v23  ;;  %v7382_v34 = vrot.slane %v7381_v57, 2 }
 0x28d   : > { %v1452_v54 = vpop.permute.xlu0 %1451  ;;  %v974_v40 = vpop.permute.xlu1 %973 }
 0x28e   : > { %v1457_v62 = vadd.f32 %v1452_v54, %v1440_v37  ;;  %v7378_v54 = vld [vmem:[#allocation100_spill] sm:$0xff]  ;;  %v896_v12 = vadd.f32 %v5885_v44, %v879_v26 }
 0x28f   : > { %v7379_v37 = vrot.slane %v7378_v54, 1 }
 0x290   : > { %v910_v63 = vadd.f32 %v7382_v34, %v896_v12 }
 0x291   : > { %v1469_v0 = vpop.permute.xlu0 %1468  ;;  %v1454_v50 = vpop.permute.xlu1 %1453 }
 0x292   : > { %v1474_v58 = vadd.f32 %v1469_v0, %v1457_v62  ;;  %v927_v5 = vadd.f32 %v5892_v32, %v910_v63 }
 0x294   : > { %v1487_v55 = vadd.f32 %v7375_v39, %v1474_v58 }
 0x295   : > { %v1003_v8 = vpop.permute.xlu0 %1002  ;;  %v1471_v59 = vpop.permute.xlu1 %1470 }
 0x296   : > { %v1008_v45 = vadd.f32 %v1003_v8, %v991_v24  ;;  %v1326_v24 = vadd.f32 %v7379_v37, %v1313_v9 }
 0x298   : > { %v1343_v58 = vadd.f32 %v5875_v38, %v1326_v24  ;;  %v944_v38 = vadd.f32 %v5894_v3, %v927_v5 }
 0x299   : > { %v1020_v47 = vpop.permute.xlu0 %1019  ;;  %v1005_v15 = vpop.permute.xlu1 %1004 }
 0x29a   : > { %v1025_v49 = vadd.f32 %v1020_v47, %v1008_v45  ;;  %v1360_v42 = vadd.f32 %v5882_v10, %v1343_v58  ;;  %v961_v48 = vadd.f32 %v5898_v13, %v944_v38 }
 0x29c   : > { %v1377_v31 = vadd.f32 %v5887_v17, %v1360_v42  ;;  %v978_v21 = vadd.f32 %v974_v40, %v961_v48 }
 0x29d   : > { %v1499_v25 = vpop.permute.xlu0 %1498  ;;  %v1022_v22 = vpop.permute.xlu1 %1021 }
 0x29e   : > { %v1504_v62 = vadd.f32 %v1499_v25, %v1487_v55  ;;  %v1394_v25 = vadd.f32 %v5890_v1, %v1377_v31  ;;  %v7386_v1 = vrot.slane %v7385_v33, 3 }
 0x2a0   : > { %v1407_v16 = vadd.f32 %v7384_v35, %v1394_v25 }
 0x2a1   : > { %v1037_v41 = vpop.permute.xlu0 %1036  ;;  %v1501_v60 = vpop.permute.xlu1 %1500 }
 0x2a2   : > { %v1042_v18 = vadd.f32 %v1037_v41, %v1025_v49  ;;  %v1424_v17 = vadd.f32 %v5896_v43, %v1407_v16  ;;  %v7387_v43 = vld [vmem:[#allocation105_spill] sm:$0xff] }
 0x2a4   : > { %v1441_v14 = vadd.f32 %v5900_v27, %v1424_v17 }
 0x2a5   : > { %v1516_v19 = vpop.permute.xlu0 %1515  ;;  %v1039_v11 = vpop.permute.xlu1 %1038 }
 0x2a6   : > { %v1521_v7 = vadd.f32 %v1516_v19, %v1504_v62  ;;  %v992_v19 = vadd.f32 %v7386_v1, %v978_v21  ;;  %v1458_v3 = vadd.f32 %v1454_v50, %v1441_v14 }
 0x2a8   : > { %v1009_v49 = vadd.f32 %v1005_v15, %v992_v19  ;;  %v1475_v13 = vadd.f32 %v1471_v59, %v1458_v3 }
 0x2a9   : > { %v1054_v4 = vpop.permute.xlu0 %1053  ;;  %v1518_v20 = vpop.permute.xlu1 %1517 }
 0x2aa   : > { %v1059_v36 = vadd.f32 %v1054_v4, %v1042_v18  ;;  %v1026_v23 = vadd.f32 %v1022_v22, %v1009_v49  ;;  %v7388_v4 = vrot.slane %v7387_v43, 3  ;;  %v7389_v22 = vld [vmem:[#allocation106_spill] sm:$0xff] }
 0x2ac   : > { %v1073_v0 = vadd.f32 %v7380_v28, %v1059_v36  ;;  %v1043_v18 = vadd.f32 %v1039_v11, %v1026_v23  ;;  %v1488_v36 = vadd.f32 %v7388_v4, %v1475_v13  ;;  %v7390_v11 = vrot.slane %v7389_v22, 4 }
 0x2ad   : > { %v1533_v39 = vpop.permute.xlu0 %1532  ;;  %v1056_v8 = vpop.permute.xlu1 %1055  ;;  %v2083_v22 = vstv %s5966_s11  ;;  %s3699_s11 = sld [smem:[#allocation19 + $0x83]] }
 0x2ae   : > { %v1538_v47 = vadd.f32 %v1533_v39, %v1521_v7  ;;  %v1060_v54 = vadd.f32 %v1056_v8, %v1043_v18  ;;  %v1505_v37 = vadd.f32 %v1501_v60, %v1488_v36  ;;  %v1144_v39 = vstv %s5943_s0  ;;  %s3663_s0 = sld [smem:[#allocation19 + $0x3]] }
 0x2af   : > { %v1148_v60 = vstv %s5947_s8  ;;  %s3698_s8 = sld [smem:[#allocation19 + $0x82]] }
 0x2b0   : > { %v1522_v59 = vadd.f32 %v1518_v20, %v1505_v37  ;;  %v1074_v12 = vadd.f32 %v7390_v11, %v1060_v54  ;;  %v2486_v11 = vstv %s5968_s28  ;;  %s3738_s28 = sld [smem:[#allocation19 + $0x102]] }
 0x2b1   : > { %v1550_v51 = vpop.permute.xlu0 %1549  ;;  %v1535_v44 = vpop.permute.xlu1 %1534 }
 0x2b2   : > { %v1555_v55 = vadd.f32 %v1550_v51, %v1538_v47  ;;  %v1539_v28 = vadd.f32 %v1535_v44, %v1522_v59  ;;  %v7391_v44 = vrot.slane %v5608_v29, 4 }
 0x2b4   : > { %v1568_v30 = vadd.f32 %v5657_v61, %v1555_v55 }
 0x2b5   : > { %v1085_v10 = vpop.permute.xlu0 %1084  ;;  %v1552_v41 = vpop.permute.xlu1 %1551 }
 0x2b6   : > { %v1090_v27 = vadd.f32 %v1085_v10, %v1073_v0  ;;  %v1556_v57 = vadd.f32 %v1552_v41, %v1539_v28 }
 0x2b8   : > { %v1569_v55 = vadd.f32 %v7391_v44, %v1556_v57  ;;  %v1689_v57 = vstv %s5972_s3  ;;  %s3739_s3 = sld [smem:[#allocation19 + $0x103]] }
 0x2b9   : > { %v1102_v32 = vpop.permute.xlu0 %1101  ;;  %v1087_v45 = vpop.permute.xlu1 %1086 }
 0x2ba   : > { %v1107_v15 = vadd.f32 %v1102_v32, %v1090_v27  ;;  %v1091_v58 = vadd.f32 %v1087_v45, %v1074_v12  ;;  %v1643_v45 = vstv %s5955_s5  ;;  %v2889_v12 = vstv %s5970_s14  ;;  %s3697_s5 = sld [smem:[#allocation19 + $0x81]] }
 0x2bb   : > { %s3777_s14 = sld [smem:[#allocation19 + $0x181]] }
 0x2bd   : > { %v1580_v61 = vpop.permute.xlu0 %1579  ;;  %v1104_v9 = vpop.permute.xlu1 %1103 }
 0x2be   : > { %v1108_v0 = vadd.f32 %v1104_v9, %v1091_v58  ;;  %v1585_v34 = vadd.f32 %v1580_v61, %v1568_v30 }
 0x2c1   : > { %v1119_v26 = vpop.permute.xlu0 %1118  ;;  %v1582_v40 = vpop.permute.xlu1 %1581 }
 0x2c2   : > { %v1124_v62 = vadd.f32 %v1119_v26, %v1107_v15  ;;  %v1586_v10 = vadd.f32 %v1582_v40, %v1569_v55 }
 0x2c5   : > { %v1597_v50 = vpop.permute.xlu0 %1596  ;;  %v1121_v24 = vpop.permute.xlu1 %1120 }
 0x2c6   : > { %v1125_v63 = vadd.f32 %v1121_v24, %v1108_v0  ;;  %v1602_v31 = vadd.f32 %v1597_v50, %v1585_v34  ;;  %v1671_v50 = vstv %s5964_s7  ;;  %s3737_s7 = sld [smem:[#allocation19 + $0x101]] }
 0x2c9   : > { %v1136_v7 = vpop.permute.xlu0 %1135  ;;  %v1599_v8 = vpop.permute.xlu1 %1598 }
 0x2ca   : > { %v1141_v42 = vadd.f32 %v1136_v7, %v1124_v62  ;;  %v1603_v17 = vadd.f32 %v1599_v8, %v1586_v10  ;;  %v2503_v10 = vstv %s5980_s2  ;;  %s3740_s2 = sld [smem:[#allocation19 + $0x104]] }
 0x2cc   : > { %v1145_v20 = vmul.f32 %v1144_v39, %v1141_v42 }
 0x2cd   : > { %v1614_v47 = vpop.permute.xlu0 %1613  ;;  %v1138_v51 = vpop.permute.xlu1 %1137 }
 0x2ce   : > { %v1149_v5 = vadd.f32 %v1148_v60, %v1145_v20  ;;  %v1142_v25 = vadd.f32 %v1138_v51, %v1125_v63  ;;  %v1619_v48 = vadd.f32 %v1614_v47, %v1602_v31 }
 0x2d0   : > { %v1151_v38 = vsub.f32 0.0, %v1149_v5  ;;  %v1146_v41 = vmul.f32 %v1144_v39, %v1142_v25 }
 0x2d1   : > { %v1631_v35 = vpop.permute.xlu0 %1630  ;;  %v1616_v21 = vpop.permute.xlu1 %1615 }
 0x2d2   : > { %v1153_v16 = vmul.f32 1.442695, %v1151_v38  ;;  %v1636_v30 = vadd.f32 %v1631_v35, %v1619_v48  ;;  %v1150_v32 = vadd.f32 %v1148_v60, %v1146_v41  ;;  %v1620_v1 = vadd.f32 %v1616_v21, %v1603_v17 }
 0x2d3   : > { %v2100_v48 = vstv %s5978_s6  ;;  %v2906_v41 = vstv %s5982_s29  ;;  %s3778_s6 = sld [smem:[#allocation19 + $0x182]]  ;;  %s3779_s29 = sld [smem:[#allocation19 + $0x183]] }
 0x2d4   : > { %4033 = vpow2.f32 %v1153_v16  ;;  %v1640_v14 = vmul.f32 %v1639_v2, %v1636_v30  ;;  %v1152_v33 = vsub.f32 0.0, %v1150_v32 }
 0x2d5   : > { %v1633_v29 = vpop.permute.xlu1 %1632 }
 0x2d6   : > { %v1644_v19 = vadd.f32 %v1643_v45, %v1640_v14  ;;  %v1155_v3 = vmul.f32 1.442695, %v1152_v33  ;;  %v1637_v49 = vadd.f32 %v1633_v29, %v1620_v1 }
 0x2d8   : > { %v1646_v61 = vsub.f32 0.0, %v1644_v19  ;;  %4035 = vpow2.f32 %v1155_v3  ;;  %v1641_v9 = vmul.f32 %v1639_v2, %v1637_v49 }
 0x2da   : > { %v1648_v13 = vmul.f32 1.442695, %v1646_v61  ;;  %v5961_v23 = vadd.f32 %v1643_v45, %v1641_v9 }
 0x2dc   : > { %4037 = vpow2.f32 %v1648_v13  ;;  %v1647_v18 = vsub.f32 0.0, %v5961_v23 }
 0x2de   : > { %v4034_v26 = vpop.eup %4033  ;;  %v1650_v43 = vmul.f32 1.442695, %v1647_v18 }
 0x2df   : > { %v1157_v40 = vadd.f32 1.0, %v4034_v26 }
 0x2e1   : > { %4039 = vrcp.f32 %v1157_v40 }
 0x2e2   : > { %4041 = vpow2.f32 %v1650_v43  ;;  %v4036_v4 = vpop.eup %4035 }
 0x2e3   : > { %v1158_v36 = vadd.f32 1.0, %v4036_v4 }
 0x2e5   : > { %4043 = vrcp.f32 %v1158_v36 }
 0x2e6   : > { %v4038_v54 = vpop.eup %4037 }
 0x2e7   : > { %v1652_v27 = vadd.f32 1.0, %v4038_v54 }
 0x2e9   : > { %4045 = vrcp.f32 %v1652_v27  ;;  %v3686_v27 = vld [vmem:[%s7393_s26 + $0x4] sm:$0xff] }
 0x2eb   : > { %v4040_v37 = vpop.eup %4039 }
 0x2ec   : > { %v4042_v15 = vpop.eup %4041  ;;  %v1163_v24 = vmul.f32 %v4040_v37, %v1149_v5  ;;  %v2047_v37 = vrot.slane %v3686_v27, 6 }
 0x2ed   : > { %v1653_v59 = vadd.f32 1.0, %v4042_v15  ;;  %v3724_v15 = vld [vmem:[%s7393_s26 + $0x1c] sm:$0xff] }
 0x2ee   : > { %v1672_v62 = vmul.f32 %v1671_v50, %v1163_v24  ;;  %v2084_v39 = vmul.f32 %v2083_v22, %v1163_v24  ;;  %v2487_v7 = vmul.f32 %v2486_v11, %v1163_v24  ;;  %v2890_v8 = vmul.f32 %v2889_v12, %v1163_v24 }
 0x2ef   : > { %4047 = vrcp.f32 %v1653_v59  ;;  %v4044_v28 = vpop.eup %4043  ;;  %v2452_v59 = vrot.slane %v3724_v15, 6 }
 0x2f0   : > { %v1677_v58 = vrot.slane %v1672_v62, 6  ;;  %v1164_v42 = vmul.f32 %v4044_v28, %v1150_v32  ;;  %v2088_v31 = vrot.slane %v2084_v39, 6  ;;  %v2491_v5 = vrot.slane %v2487_v7, 6 }
 0x2f1   : > { %v2894_v51 = vrot.slane %v2890_v8, 6 }
 0x2f2   : > { %1680 = vrot.lane.b32.xlu0 %v1677_v58, %s7392_s27  ;;  %v1673_v60 = vmul.f32 %v1671_v50, %v1164_v42  ;;  %v2085_v34 = vmul.f32 %v2083_v22, %v1164_v42  ;;  %v2488_v20 = vmul.f32 %v2486_v11, %v1164_v42  ;;  %v2891_v63 = vmul.f32 %v2889_v12, %v1164_v42  ;;  %v3764_v50 = vld [vmem:[%s7393_s26 + $0x34] sm:$0xff]  ;;  %v3804_v22 = vld [vmem:[%s7393_s26 + $0x4c] sm:$0xff]  ;;  %v7394_v42 = vld [vmem:[#allocation110_spill] sm:$0xff] }
 0x2f3   : > { %v4046_v0 = vpop.eup %4045  ;;  %v2855_v24 = vrot.slane %v3764_v50, 6  ;;  %v3258_v11 = vrot.slane %v3804_v22, 6  ;;  %v2927_v50 = vstv %s6042_s16  ;;  %s6175_s16 = sld [smem:[#allocation19 + $0xe]] }
 0x2f4   : > { %v1658_v47 = vmul.f32 %v4046_v0, %v1644_v19  ;;  %v1678_v44 = vrot.slane %v1673_v60, 6  ;;  %v2089_v55 = vrot.slane %v2085_v34, 6  ;;  %v2492_v25 = vrot.slane %v2488_v20, 6  ;;  %v7395_v20 = vld [vmem:[#allocation111_spill] sm:$0xff] }
 0x2f5   : > { %v2895_v38 = vrot.slane %v2891_v63, 6 }
 0x2f6   : > { %2091 = vrot.lane.b32.xlu0 %v2088_v31, %s7392_s27  ;;  %v1679_v2 = vsel %vm1676_vm13, %v1677_v58, %v1678_v44  ;;  %v2090_v35 = vsel %vm1676_vm13, %v2088_v31, %v2089_v55  ;;  %v2493_v16 = vsel %vm1676_vm13, %v2491_v5, %v2492_v25  ;;  %v1690_v17 = vmul.f32 %v1689_v57, %v1658_v47 }
 0x2f7   : > { %v2896_v21 = vsel %vm1676_vm13, %v2894_v51, %v2895_v38  ;;  %1682 = vrot.lane.b32.xlu1 %v1679_v2, %s7392_s27  ;;  %v2101_v32 = vmul.f32 %v2100_v48, %v1658_v47  ;;  %v2504_v45 = vmul.f32 %v2503_v10, %v1658_v47  ;;  %v2907_v14 = vmul.f32 %v2906_v41, %v1658_v47  ;;  %v7396_v38 = vld [vmem:[#allocation112_spill] sm:$0xff] }
 0x2f8   : > { %v1694_v49 = vrot.slane %v1690_v17, 6  ;;  %v1706_v47 = vstv %s1705_s22  ;;  %s3667_s22 = sld [smem:[#allocation19 + $0x7]] }
 0x2f9   : > { %v4048_v30 = vpop.eup %4047  ;;  %v2105_v61 = vrot.slane %v2101_v32, 6  ;;  %v2508_v9 = vrot.slane %v2504_v45, 6  ;;  %v2911_v13 = vrot.slane %v2907_v14, 6  ;;  %v2520_v32 = vstv %s6028_s21  ;;  %s6156_s21 = sld [smem:[#allocation19 + $0xb]] }
 0x2fa   : > { %v1659_v33 = vmul.f32 %v4048_v30, %v5961_v23  ;;  %2494 = vrot.lane.b32.xlu0 %v2491_v5, %s7392_s27 }
 0x2fb   : > { %2093 = vrot.lane.b32.xlu1 %v2090_v35, %s7392_s27 }
 0x2fc   : > { %v1691_v1 = vmul.f32 %v1689_v57, %v1659_v33  ;;  %v2102_v19 = vmul.f32 %v2100_v48, %v1659_v33  ;;  %v2505_v29 = vmul.f32 %v2503_v10, %v1659_v33  ;;  %v2908_v3 = vmul.f32 %v2906_v41, %v1659_v33 }
 0x2fd   : > { %v1710_v10 = vstv %s6023_s24  ;;  %s6150_s24 = sld [smem:[#allocation19 + $0x8]] }
 0x2fe   : > { %2897 = vrot.lane.b32.xlu0 %v2894_v51, %s7392_s27  ;;  %v1695_v18 = vrot.slane %v1691_v1, 6  ;;  %v2106_v26 = vrot.slane %v2102_v19, 6  ;;  %v2509_v40 = vrot.slane %v2505_v29, 6  ;;  %v2912_v23 = vrot.slane %v2908_v3, 6 }
 0x2ff   : > { %2496 = vrot.lane.b32.xlu1 %v2493_v16, %s7392_s27  ;;  %v2117_v51 = vstv %s6021_s18  ;;  %s3780_s18 = sld [smem:[#allocation19 + $0x184]] }
 0x300   : > { %v1696_v43 = vsel %vm1676_vm13, %v1694_v49, %v1695_v18  ;;  %v2107_v4 = vsel %vm1676_vm13, %v2105_v61, %v2106_v26  ;;  %v2510_v36 = vsel %vm1676_vm13, %v2508_v9, %v2509_v40  ;;  %v2913_v54 = vsel %vm1676_vm13, %v2911_v13, %v2912_v23 }
 0x301   : > { %v2524_v18 = vstv %s6033_s25  ;;  %v2923_v26 = vstv %s6035_s19  ;;  %s6158_s25 = sld [smem:[#allocation19 + $0xc]]  ;;  %s6168_s19 = sld [smem:[#allocation19 + $0xd]]  ;;  %vm2070_vm13 = vcmask 130048  }
 0x302   : > { %1697 = vrot.lane.b32.xlu0 %v1694_v49, %s7392_s27 }
 0x303   : > { %2899 = vrot.lane.b32.xlu1 %v2896_v21, %s7392_s27  ;;  %v2121_v21 = vstv %s6026_s20  ;;  %s6152_s20 = sld [smem:[#allocation19 + $0x9]] }
 0x306   : > { %2108 = vrot.lane.b32.xlu0 %v2105_v61, %s7392_s27 }
 0x307   : > { %1699 = vrot.lane.b32.xlu1 %v1696_v43, %s7392_s27 }
 0x30a   : > { %2511 = vrot.lane.b32.xlu0 %v2508_v9, %s7392_s27 }
 0x30b   : > { %2110 = vrot.lane.b32.xlu1 %v2107_v4, %s7392_s27 }
 0x30e   : > { %2914 = vrot.lane.b32.xlu0 %v2911_v13, %s7392_s27 }
 0x30f   : > { %2513 = vrot.lane.b32.xlu1 %v2510_v36, %s7392_s27 }
 0x312   : > { %2048 = vrot.lane.b32.xlu0 %v2047_v37, %s7392_s27 }
 0x313   : > { %2916 = vrot.lane.b32.xlu1 %v2913_v54, %s7392_s27 }
 0x316   : > { %2856 = vrot.lane.b32.xlu0 %v2855_v24, %s7392_s27 }
 0x317   : > { %2453 = vrot.lane.b32.xlu1 %v2452_v59, %s7392_s27 }
 0x31b   : > { %3259 = vrot.lane.b32.xlu1 %v3258_v11, %s7392_s27 }
 0x364   : > { %v1681_v12 = vpop.permute.xlu0 %1680 }
 0x365   : > { %v1686_v57 = vadd.f32 %v1681_v12, %v7394_v42 }
 0x368   : > { %v2092_v62 = vpop.permute.xlu0 %2091 }
 0x369   : > { %v1683_v28 = vpop.permute.xlu1 %1682  ;;  %v2097_v63 = vadd.f32 %v2092_v62, %v7395_v20 }
 0x36a   : > { %v1687_v5 = vadd.f32 %v1683_v28, %v5670_v53 }
 0x36c   : > { %v2495_v58 = vpop.permute.xlu0 %2494 }
 0x36d   : > { %v2094_v39 = vpop.permute.xlu1 %2093  ;;  %v2500_v48 = vadd.f32 %v2495_v58, %v7396_v38 }
 0x36e   : > { %v2098_v16 = vadd.f32 %v2094_v39, %v5680_v6  ;;  %v7397_v39 = vmov 0.0  }
 0x36f   : > { %1715 = vst.msk [vmem:[#allocation3 + $0x8] sm:$0xf] %vm1714_vm14, %v7397_v39  ;;  %2126 = vst.msk [vmem:[#allocation3 + $0x18] sm:$0xf] %vm1714_vm14, %v7397_v39 }
 0x370   : > { %v2898_v7 = vpop.permute.xlu0 %2897  ;;  %2529 = vst.msk [vmem:[#allocation3 + $0x28] sm:$0xf] %vm1714_vm14, %v7397_v39  ;;  %2932 = vst.msk [vmem:[#allocation3 + $0x38] sm:$0xf] %vm1714_vm14, %v7397_v39 }
 0x371   : > { %v2497_v8 = vpop.permute.xlu1 %2496  ;;  %v2903_v14 = vadd.f32 %v2898_v7, %v5697_v56  ;;  %1718 = vst.msk [vmem:[#allocation3 + $0x8] sm:$0xf] %vm1717_vm15, %v7397_v39  ;;  %2128 = vst.msk [vmem:[#allocation3 + $0x18] sm:$0xf] %vm1717_vm15, %v7397_v39 }
 0x372   : > { %v2501_v19 = vadd.f32 %v2497_v8, %v5703_v46  ;;  %2531 = vst.msk [vmem:[#allocation3 + $0x28] sm:$0xf] %vm1717_vm15, %v7397_v39  ;;  %2934 = vst.msk [vmem:[#allocation3 + $0x38] sm:$0xf] %vm1717_vm15, %v7397_v39 }
 0x374   : > { %v1698_v0 = vpop.permute.xlu0 %1697 }
 0x375   : > { %v1703_v60 = vadd.f32 %v1698_v0, %v1686_v57  ;;  %v2900_v34 = vpop.permute.xlu1 %2899  ;;  %v620_v0 = vstv %s3568_s17  ;;  %s6189_s17 = sld [smem:[#allocation19 + $0x11]] }
 0x376   : > { %v2904_v56 = vadd.f32 %v2900_v34, %v5708_v52 }
 0x377   : > { %v1707_v55 = vmul.f32 %v1706_v47, %v1703_v60  ;;  %v7399_v60 = vld [vmem:[#allocation49_spill] sm:$0xff] }
 0x378   : > { %v2109_v31 = vpop.permute.xlu0 %2108  ;;  %v622_v34 = vadd.s32 %v620_v0, %v7399_v60  ;;  %v2973_v60 = vstv %s3778_s6  ;;  %s6282_s6 = sld [smem:[#allocation19 + $0x106]] }
 0x379   : > { %v2114_v44 = vadd.f32 %v2109_v31, %v2097_v63  ;;  %v1700_v25 = vpop.permute.xlu1 %1699  ;;  %v1711_v17 = vadd.f32 %v1710_v10, %v1707_v55 }
 0x37a   : > { %v1704_v41 = vadd.f32 %v1700_v25, %v1687_v5  ;;  %vm624_vm0 = vcmp.ge.s32.totalorder %v622_v34, 0  ;;  %vm626_vm1 = vcmp.lt.s32.totalorder %v622_v34, 16 }
 0x37b   : > { %v2118_v2 = vmul.f32 %v2117_v51, %v2114_v44  ;;  %v1725_v13 = vrot.slane %v1711_v17, 2  ;;  %vm6080_vm2 = vmand %vm624_vm0, %vm626_vm1  ;;  %v7402_v44 = vld [vmem:[#allocation48_spill] sm:$0xff] }
 0x37c   : > { %v2512_v35 = vpop.permute.xlu0 %2511  ;;  %v1708_v30 = vmul.f32 %v1706_v47, %v1704_v41  ;;  %v621_v55 = vadd.s32 %v620_v0, %v7402_v44  ;;  %v2578_v0 = vstv %s3739_s3  ;;  %s6268_s3 = sld [smem:[#allocation19 + $0x8b]] }
 0x37d   : > { %v2517_v53 = vadd.f32 %v2512_v35, %v2500_v48  ;;  %v2111_v45 = vpop.permute.xlu1 %2110  ;;  %v2122_v29 = vadd.f32 %v2121_v21, %v2118_v2 }
 0x37e   : > { %v1712_v33 = vadd.f32 %v1710_v10, %v1708_v30  ;;  %v2115_v1 = vadd.f32 %v2111_v45, %v2098_v16  ;;  %vm623_vm3 = vcmp.ge.s32.totalorder %v621_v55, 0  ;;  %vm625_vm4 = vcmp.lt.s32.totalorder %v621_v55, 16 }
 0x37f   : > { %v2521_v6 = vmul.f32 %v2520_v32, %v2517_v53  ;;  %v2131_v4 = vrot.slane %v2122_v29, 2  ;;  %vm627_vm5 = vmand %vm623_vm3, %vm625_vm4 }
 0x380   : > { %v2915_v3 = vpop.permute.xlu0 %2914  ;;  %v1726_v49 = vrot.slane %v1712_v33, 2  ;;  %v2119_v61 = vmul.f32 %v2117_v51, %v2115_v1 }
 0x381   : > { %v2920_v9 = vadd.f32 %v2915_v3, %v2903_v14  ;;  %v2514_v40 = vpop.permute.xlu1 %2513  ;;  %v2525_v36 = vadd.f32 %v2524_v18, %v2521_v6 }
 0x382   : > { %v2123_v23 = vadd.f32 %v2121_v21, %v2119_v61  ;;  %v2518_v43 = vadd.f32 %v2514_v40, %v2501_v19  ;;  %1730 = vrot.lane.b32.xlu0 %v1726_v49, %s7219_s15  ;;  %v1727_v46 = vsel %vm903_vm10, %v1725_v13, %v1726_v49 }
 0x383   : > { %v2924_v27 = vmul.f32 %v2923_v26, %v2920_v9  ;;  %v2534_v11 = vrot.slane %v2525_v36, 2 }
 0x384   : > { %v2132_v54 = vrot.slane %v2123_v23, 2  ;;  %v2522_v37 = vmul.f32 %v2520_v32, %v2518_v43  ;;  %v6071_v57 = vpop.permute.xlu0 %2048 }
 0x385   : > { %v2917_v15 = vpop.permute.xlu1 %2916  ;;  %v2928_v12 = vadd.f32 %v2927_v50, %v2924_v27 }
 0x386   : > { %v2526_v24 = vadd.f32 %v2524_v18, %v2522_v37  ;;  %v2921_v59 = vadd.f32 %v2917_v15, %v2904_v56  ;;  %2136 = vrot.lane.b32.xlu1 %v2132_v54, %s7219_s15  ;;  %v2133_v22 = vsel %vm903_vm10, %v2131_v4, %v2132_v54  ;;  %v1762_v18 = vstv %s3662_s13  ;;  %s6198_s13 = sld [smem:[#allocation19 + $0x12]] }
 0x387   : > { %v2937_v7 = vrot.slane %v2928_v12, 2  ;;  %v1778_v4 = vstv %s3664_s4  ;;  %v2167_v37 = vstv %s3698_s8  ;;  %s6210_s4 = sld [smem:[#allocation19 + $0x15]]  ;;  %s6226_s8 = sld [smem:[#allocation19 + $0x17]] }
 0x388   : > { %v2535_v62 = vrot.slane %v2526_v24, 2  ;;  %v2925_v28 = vmul.f32 %v2923_v26, %v2921_v59  ;;  %v6076_v63 = vpop.permute.xlu0 %2856  ;;  %v1754_v26 = vstv %s3661_s30  ;;  %v2183_v24 = vstv %s3700_s10  ;;  %s6202_s30 = sld [smem:[#allocation19 + $0x13]]  ;;  %s6231_s10 = sld [smem:[#allocation19 + $0x18]] }
 0x389   : > { %v6074_v20 = vpop.permute.xlu1 %2453  ;;  %v2159_v59 = vstv %s3697_s5  ;;  %s6243_s5 = sld [smem:[#allocation19 + $0x87]] }
 0x38a   : > { %v2929_v52 = vadd.f32 %v2927_v50, %v2925_v28  ;;  %2539 = vrot.lane.b32.xlu0 %v2535_v62, %s7219_s15  ;;  %v2536_v58 = vsel %vm903_vm10, %v2534_v11, %v2535_v62  ;;  %v2562_v62 = vstv %s3737_s7  ;;  %v2175_v28 = vstv %s3699_s11  ;;  %s6245_s7 = sld [smem:[#allocation19 + $0x86]]  ;;  %s6254_s11 = sld [smem:[#allocation19 + $0x89]] }
 0x38c   : > { %v2938_v8 = vrot.slane %v2929_v52, 2 }
 0x38d   : > { %v6078_v47 = vpop.permute.xlu1 %3259 }
 0x38e   : > { %2942 = vrot.lane.b32.xlu1 %v2938_v8, %s7219_s15  ;;  %1728 = vrot.lane.b32.xlu0 %v1727_v46, %s7219_s15  ;;  %v2939_v42 = vsel %vm903_vm10, %v2937_v7, %v2938_v8  ;;  %v1770_v46 = vstv %s3663_s0  ;;  %v2570_v7 = vstv %s3738_s28  ;;  %s6212_s0 = sld [smem:[#allocation19 + $0x16]]  ;;  %s6258_s28 = sld [smem:[#allocation19 + $0x88]] }
 0x38f   : > { %v2965_v8 = vstv %s3777_s14  ;;  %s6266_s14 = sld [smem:[#allocation19 + $0x8c]] }
 0x392   : > { %2134 = vrot.lane.b32.xlu1 %v2133_v22, %s7219_s15  ;;  %2537 = vrot.lane.b32.xlu0 %v2536_v58, %s7219_s15 }
 0x396   : > { %2940 = vrot.lane.b32.xlu1 %v2939_v42, %s7219_s15 }
 0x3f4   : > { %v1731_v5 = vpop.permute.xlu0 %1730 }
 0x3f5   : > { %v1735_v51 = vsel %vm6080_vm2, %v1731_v5, 0.0  ;;  %v2586_v5 = vstv %s3740_s2  ;;  %s6287_s2 = sld [smem:[#allocation19 + $0x186]] }
 0x3f6   : > { %1740 = vrot.lane.b32.xlu1 %v1735_v51, %s7392_s27  ;;  %v2981_v51 = vstv %s3779_s29  ;;  %s6299_s29 = sld [smem:[#allocation19 + $0x107]] }
 0x3f8   : > { %v2137_v25 = vpop.permute.xlu1 %2136 }
 0x3f9   : > { %v2141_v38 = vsel %vm6080_vm2, %v2137_v25, 0.0 }
 0x3fa   : > { %2146 = vrot.lane.b32.xlu1 %v2141_v38, %s7392_s27  ;;  %v1810_v38 = vstv %s3667_s22  ;;  %s6312_s22 = sld [smem:[#allocation19 + $0x108]] }
 0x3fc   : > { %v2540_v48 = vpop.permute.xlu0 %2539 }
 0x3fd   : > { %v2544_v10 = vsel %vm6080_vm2, %v2540_v48, 0.0  ;;  %v2989_v48 = vstv %s3780_s18  ;;  %s6318_s18 = sld [smem:[#allocation19 + $0x188]] }
 0x3fe   : > { %2549 = vrot.lane.b32.xlu0 %v2544_v10, %s7392_s27 }
 0x400   : > { %v2943_v41 = vpop.permute.xlu1 %2942  ;;  %v1729_v2 = vpop.permute.xlu0 %1728 }
 0x401   : > { %v2947_v35 = vsel %vm6080_vm2, %v2943_v41, 0.0  ;;  %v1734_v16 = vsel %vm627_vm5, %v1729_v2, 0.0 }
 0x402   : > { %2952 = vrot.lane.b32.xlu1 %v2947_v35, %s7392_s27  ;;  %1738 = vrot.lane.b32.xlu0 %v1734_v16, %s7392_s27 }
 0x404   : > { %v2135_v21 = vpop.permute.xlu1 %2134  ;;  %v2538_v30 = vpop.permute.xlu0 %2537 }
 0x405   : > { %v2140_v53 = vsel %vm627_vm5, %v2135_v21, 0.0  ;;  %v2543_v17 = vsel %vm627_vm5, %v2538_v30, 0.0  ;;  %v1823_v30 = vstv %s6150_s24  ;;  %s6326_s24 = sld [smem:[#allocation19 + $0x109]] }
 0x406   : > { %2144 = vrot.lane.b32.xlu0 %v2140_v53, %s7392_s27  ;;  %2547 = vrot.lane.b32.xlu1 %v2543_v17, %s7392_s27  ;;  %v1836_v53 = vstv %s6152_s20  ;;  %s6332_s20 = sld [smem:[#allocation19 + $0x189]] }
 0x408   : > { %v2941_v32 = vpop.permute.xlu1 %2940 }
 0x409   : > { %v2946_v45 = vsel %vm627_vm5, %v2941_v32, 0.0 }
 0x40a   : > { %2950 = vrot.lane.b32.xlu0 %v2946_v45, %s7392_s27  ;;  %s3666_s27 = sld [smem:[#allocation19 + $0x6]] }
 0x410   : > { %v1797_v25 = vstv %s3666_s27  ;;  %s6301_s27 = sld [smem:[#allocation19 + $0x187]] }
 0x468   : > { %v1741_v14 = vpop.permute.xlu1 %1740 }
 0x469   : > { %1746 = vst.msk [vmem:[#allocation3 + $0x8] sm:$0xf] %vm1745_vm6, %v1741_v14 }
 0x46c   : > { %v2147_v33 = vpop.permute.xlu1 %2146 }
 0x46d   : > { %2151 = vst.msk [vmem:[#allocation3 + $0x18] sm:$0xf] %vm1745_vm6, %v2147_v33  ;;  %v1860_v33 = vstv %s6156_s21  ;;  %s6342_s21 = sld [smem:[#allocation19 + $0x10b]] }
 0x470   : > { %v6101_v1 = vld [vmem:[#allocation3 + $0x8] sm:$0xf]  ;;  %v2550_v19 = vpop.permute.xlu0 %2549 }
 0x471   : > { %2554 = vst.msk [vmem:[#allocation3 + $0x28] sm:$0xf] %vm1745_vm6, %v2550_v19  ;;  %v2052_v29 = vadd.f32 %v6071_v57, %v6101_v1  ;;  %v1799_v2 = vmul.f32 %v1797_v25, %v6101_v1  ;;  %v1812_v35 = vmul.f32 %v1810_v38, %v6101_v1  ;;  %v1873_v19 = vstv %s6158_s25  ;;  %s6347_s25 = sld [smem:[#allocation19 + $0x18b]] }
 0x473   : > { %2057 = vrot.lane.b32.xlu0 %v2052_v29, %s7219_s15  ;;  %v1803_v29 = vrot.slane %v1799_v2, 1 }
 0x474   : > { %v6106_v3 = vld [vmem:[#allocation3 + $0x18] sm:$0xf]  ;;  %v2953_v49 = vpop.permute.xlu1 %2952  ;;  %v1739_v6 = vpop.permute.xlu0 %1738 }
 0x475   : > { %2957 = vst.msk [vmem:[#allocation3 + $0x38] sm:$0xf] %vm1745_vm6, %v2953_v49  ;;  %v2457_v61 = vadd.f32 %v6074_v20, %v6106_v3  ;;  %v1825_v49 = vmul.f32 %v1823_v30, %v6101_v1 }
 0x476   : > { %1744 = vst.msk [vmem:[#allocation3] sm:$0xff] %vm748_vm8, %v1739_v6  ;;  %v1838_v6 = vmul.f32 %v1836_v53, %v6101_v1 }
 0x477   : > { %2462 = vrot.lane.b32.xlu1 %v2457_v61, %s7219_s15 }
 0x478   : > { %v2548_v9 = vpop.permute.xlu1 %2547  ;;  %v2145_v13 = vpop.permute.xlu0 %2144 }
 0x479   : > { %2553 = vst.msk [vmem:[#allocation3 + $0x20] sm:$0xff] %vm748_vm8, %v2548_v9  ;;  %2150 = vst.msk [vmem:[#allocation3 + $0x10] sm:$0xff] %vm748_vm8, %v2145_v13 }
 0x47c   : > { %v2951_v23 = vpop.permute.xlu0 %2950 }
 0x47d   : > { %v6114_v40 = vld [vmem:[#allocation3] sm:$0xff]  ;;  %2956 = vst.msk [vmem:[#allocation3 + $0x30] sm:$0xff] %vm748_vm8, %v2951_v23  ;;  %vm2061_vm8 = vcmask 130050  }
 0x47e   : > { %v1763_v43 = vmul.f32 %v1762_v18, %v6114_v40  ;;  %v1755_v56 = vmul.f32 %v1754_v26, %v6114_v40  ;;  %v1779_v36 = vmul.f32 %v1778_v4, %v6114_v40  ;;  %v1771_v54 = vmul.f32 %v1770_v46, %v6114_v40 }
 0x47f   : > { %v2051_v50 = vadd.f32 %v6071_v57, %v6114_v40  ;;  %v1798_v10 = vmul.f32 %v1797_v25, %v6114_v40  ;;  %v1811_v41 = vmul.f32 %v1810_v38, %v6114_v40  ;;  %v1824_v45 = vmul.f32 %v1823_v30, %v6114_v40 }
 0x480   : > { %1765 = vrot.lane.b32.xlu1 %v1763_v43, %s7219_s15  ;;  %1757 = vrot.lane.b32.xlu0 %v1755_v56, %s7216_s9  ;;  %v6123_v27 = vld [vmem:[#allocation3 + $0x10] sm:$0xff]  ;;  %v6134_v12 = vld [vmem:[#allocation3 + $0x20] sm:$0xff]  ;;  %v1837_v14 = vmul.f32 %v1836_v53, %v6114_v40  ;;  %v1861_v61 = vmul.f32 %v1860_v33, %v6114_v40  ;;  %v1874_v9 = vmul.f32 %v1873_v19, %v6114_v40  ;;  %v1829_v56 = vrot.slane %v1825_v49, 1 }
 0x481   : > { %v2168_v15 = vmul.f32 %v2167_v37, %v6123_v27  ;;  %v2184_v22 = vmul.f32 %v2183_v24, %v6123_v27  ;;  %v2160_v11 = vmul.f32 %v2159_v59, %v6123_v27  ;;  %v2563_v52 = vmul.f32 %v2562_v62, %v6134_v12 }
 0x482   : > { %v2176_v58 = vmul.f32 %v2175_v28, %v6123_v27  ;;  %v2571_v42 = vmul.f32 %v2570_v7, %v6134_v12  ;;  %v2579_v34 = vmul.f32 %v2578_v0, %v6134_v12  ;;  %v2587_v44 = vmul.f32 %v2586_v5, %v6134_v12 }
 0x483   : > { %v2456_v16 = vadd.f32 %v6074_v20, %v6123_v27  ;;  %v1802_v17 = vrot.slane %v1798_v10, 1  ;;  %v1815_v32 = vrot.slane %v1811_v41, 1  ;;  %v1816_v20 = vrot.slane %v1812_v35, 1 }
 0x484   : > { %1781 = vrot.lane.b32.xlu1 %v1779_v36, %s4378_s12  ;;  %1773 = vrot.lane.b32.xlu0 %v1771_v54, %s4377_s1  ;;  %v6140_v39 = vld [vmem:[#allocation3 + $0x30] sm:$0xff]  ;;  %v1828_v26 = vrot.slane %v1824_v45, 1  ;;  %v1841_v23 = vrot.slane %v1837_v14, 1  ;;  %v1862_v43 = vmul.f32 %v1860_v33, %v6101_v1  ;;  %v1842_v4 = vrot.slane %v1838_v6, 1 }
 0x485   : > { %v2966_v57 = vmul.f32 %v2965_v8, %v6140_v39  ;;  %v2974_v31 = vmul.f32 %v2973_v60, %v6140_v39  ;;  %v2982_v55 = vmul.f32 %v2981_v51, %v6140_v39  ;;  %v2990_v21 = vmul.f32 %v2989_v48, %v6140_v39 }
 0x486   : > { %v1804_v13 = vsel %vm821_vm9, %v1802_v17, %v1803_v29  ;;  %v1817_v18 = vsel %vm821_vm9, %v1815_v32, %v1816_v20  ;;  %v1875_v46 = vmul.f32 %v1873_v19, %v6101_v1  ;;  %v1886_v36 = vstv %s6168_s19  ;;  %s6358_s19 = sld [smem:[#allocation19 + $0x10c]] }
 0x487   : > { %v1865_v54 = vrot.slane %v1861_v61, 2  ;;  %v1887_v37 = vmul.f32 %v1886_v36, %v6114_v40  ;;  %v1843_v24 = vsel %vm821_vm9, %v1841_v23, %v1842_v4  ;;  %v1878_v59 = vrot.slane %v1874_v9, 2 }
 0x488   : > { %2055 = vrot.lane.b32.xlu1 %v2051_v50, %s7219_s15  ;;  %2170 = vrot.lane.b32.xlu0 %v2168_v15, %s7219_s15  ;;  %v1899_v50 = vstv %s6175_s16  ;;  %v1830_v15 = vsel %vm821_vm9, %v1828_v26, %v1829_v56  ;;  %v1888_v62 = vmul.f32 %v1886_v36, %v6101_v1  ;;  %v1879_v28 = vrot.slane %v1875_v46, 2  ;;  %s6360_s16 = sld [smem:[#allocation19 + $0x18c]] }
 0x489   : > { %v1891_v7 = vrot.slane %v1887_v37, 2  ;;  %v1923_v8 = vstv %s6187_s23  ;;  %v1962_v48 = vstv %s6202_s30  ;;  %v2025_v23 = vstv %s6231_s10  ;;  %s6370_s23 = sld [smem:[#allocation19 + $0x8d]]  ;;  %s7403_s30 = sld [smem:[#allocation34_spill]] }
 0x48a   : > { %v1924_v60 = vmul.f32 %v1923_v8, %v6114_v40  ;;  %v1925_v51 = vmul.f32 %v1923_v8, %v6101_v1  ;;  %v1963_v35 = vmul.f32 %v1962_v48, %v6114_v40  ;;  %v1964_v32 = vmul.f32 %v1962_v48, %v6101_v1  ;;  %s6404_s10 = sld [smem:[#allocation19 + $0x18e]] }
 0x48b   : > { %v2026_v46 = vmul.f32 %v2025_v23, %v6114_v40  ;;  %v2241_v8 = vstv %s6254_s11  ;;  %s6419_s11 = sld [smem:[#allocation19 + $0x110]] }
 0x48c   : > { %2186 = vrot.lane.b32.xlu0 %v2184_v22, %s4378_s12  ;;  %2162 = vrot.lane.b32.xlu1 %v2160_v11, %s7216_s9  ;;  %v1900_v22 = vmul.f32 %v1899_v50, %v6114_v40  ;;  %v1866_v11 = vrot.slane %v1862_v43, 2  ;;  %v1928_v41 = vrot.slane %v1924_v60, 3  ;;  %v1929_v30 = vrot.slane %v1925_v51, 3 }
 0x48d   : > { %v1967_v20 = vrot.slane %v1963_v35, 3  ;;  %v1968_v61 = vrot.slane %v1964_v32, 3  ;;  %v2278_v51 = vstv %s6266_s14  ;;  %s6433_s14 = sld [smem:[#allocation19 + $0x91]] }
 0x48e   : > { %v1904_v0 = vrot.slane %v1900_v22, 2  ;;  %v1930_v33 = vsel %vm985_vm11, %v1928_v41, %v1929_v30  ;;  %v2280_v30 = vmul.f32 %v2278_v51, %v6106_v3 }
 0x48f   : > { %v1969_v56 = vsel %vm985_vm11, %v1967_v20, %v1968_v61  ;;  %v3008_v20 = vstv %s6287_s2  ;;  %s6452_s2 = sld [smem:[#allocation19 + $0x111]] }
 0x490   : > { %2565 = vrot.lane.b32.xlu0 %v2563_v52, %s7216_s9  ;;  %2178 = vrot.lane.b32.xlu1 %v2176_v58, %s4377_s1  ;;  %v1901_v52 = vmul.f32 %v1899_v50, %v6101_v1  ;;  %v1867_v58 = vsel %vm903_vm10, %v1865_v54, %v1866_v11  ;;  %v2027_v50 = vmul.f32 %v2025_v23, %v6101_v1  ;;  %v2030_v11 = vrot.slane %v2026_v46, 4 }
 0x491   : > { %v3021_v46 = vstv %s6301_s27  ;;  %s6463_s27 = sld [smem:[#allocation19 + $0x92]] }
 0x492   : > { %v1905_v5 = vrot.slane %v1901_v52, 2 }
 0x494   : > { %2573 = vrot.lane.b32.xlu0 %v2571_v42, %s7219_s15  ;;  %2968 = vrot.lane.b32.xlu1 %v2966_v57, %s7216_s9  ;;  %v1936_v42 = vstv %s6189_s17  ;;  %v1880_v57 = vsel %vm903_vm10, %v1878_v59, %v1879_v28  ;;  %v1906_v10 = vsel %vm903_vm10, %v1904_v0, %v1905_v5  ;;  %v2215_v59 = vstv %s6243_s5  ;;  %s6374_s17 = sld [smem:[#allocation19 + $0x10d]] }
 0x495   : > { %v2228_v0 = vstv %s6258_s28  ;;  %s6428_s28 = sld [smem:[#allocation19 + $0x190]] }
 0x496   : > { %v2229_v5 = vmul.f32 %v2228_v0, %v6123_v27  ;;  %v2230_v48 = vmul.f32 %v2228_v0, %v6106_v3 }
 0x498   : > { %2581 = vrot.lane.b32.xlu0 %v2579_v34, %s4377_s1  ;;  %2976 = vrot.lane.b32.xlu1 %v2974_v31, %s7219_s15  ;;  %v1937_v34 = vmul.f32 %v1936_v42, %v6114_v40  ;;  %v1892_v31 = vrot.slane %v1888_v62, 2  ;;  %v2216_v62 = vmul.f32 %v2215_v59, %v6123_v27  ;;  %v2234_v32 = vrot.slane %v2230_v48, 1 }
 0x49a   : > { %v1893_v25 = vsel %vm903_vm10, %v1891_v7, %v1892_v31  ;;  %v1941_v2 = vrot.slane %v1937_v34, 3  ;;  %v2220_v34 = vrot.slane %v2216_v62, 1 }
 0x49c   : > { %2589 = vrot.lane.b32.xlu0 %v2587_v44, %s4378_s12  ;;  %2984 = vrot.lane.b32.xlu1 %v2982_v55, %s4377_s1  ;;  %v1938_v44 = vmul.f32 %v1936_v42, %v6101_v1  ;;  %v1949_v55 = vstv %s6198_s13  ;;  %s6383_s13 = sld [smem:[#allocation19 + $0x18d]] }
 0x49d   : > { %v1950_v38 = vmul.f32 %v1949_v55, %v6114_v40  ;;  %v1951_v17 = vmul.f32 %v1949_v55, %v6101_v1 }
 0x49e   : > { %v1942_v53 = vrot.slane %v1938_v44, 3  ;;  %v2265_v44 = vstv %s6268_s3 }
 0x49f   : > { %v1954_v29 = vrot.slane %v1950_v38, 3  ;;  %v1955_v6 = vrot.slane %v1951_v17, 3  ;;  %v2243_v38 = vmul.f32 %v2241_v8, %v6106_v3  ;;  %v2266_v41 = vmul.f32 %v2265_v44, %v6123_v27 }
 0x4a0   : > { %2460 = vrot.lane.b32.xlu0 %v2456_v16, %s7219_s15  ;;  %2992 = vrot.lane.b32.xlu1 %v2990_v21, %s4378_s12  ;;  %v1986_v16 = vstv %s6210_s4  ;;  %v1999_v21 = vstv %s6212_s0  ;;  %v1943_v19 = vsel %vm985_vm11, %v1941_v2, %v1942_v53  ;;  %v6308_v53 = vld [vmem:[#allocation3 + $0x28] sm:$0xf]  ;;  %s6388_s4 = sld [smem:[#allocation19 + $0x8e]] }
 0x4a1   : > { %v1987_v45 = vmul.f32 %v1986_v16, %v6114_v40  ;;  %v2000_v14 = vmul.f32 %v1999_v21, %v6114_v40  ;;  %v1988_v49 = vmul.f32 %v1986_v16, %v6101_v1  ;;  %v2001_v9 = vmul.f32 %v1999_v21, %v6101_v1  ;;  %s6398_s0 = sld [smem:[#allocation19 + $0x10e]] }
 0x4a2   : > { %v1956_v43 = vsel %vm985_vm11, %v1954_v29, %v1955_v6  ;;  %v2233_v21 = vrot.slane %v2229_v5, 1  ;;  %v2247_v17 = vrot.slane %v2243_v38, 1  ;;  %v2270_v61 = vrot.slane %v2266_v41, 2 }
 0x4a3   : > { %v2004_v4 = vrot.slane %v2000_v14, 4  ;;  %v1992_v36 = vrot.slane %v1988_v49, 4  ;;  %v2005_v37 = vrot.slane %v2001_v9, 4  ;;  %v2605_v14 = vstv %s6282_s6  ;;  %s6446_s6 = sld [smem:[#allocation19]] }
 0x4a4   : > { %1805 = vrot.lane.b32.xlu0 %v1804_v13, %s7216_s9  ;;  %1818 = vrot.lane.b32.xlu1 %v1817_v18, %s7219_s15  ;;  %v2012_v13 = vstv %s6226_s8  ;;  %v1991_v18 = vrot.slane %v1987_v45, 4  ;;  %v2267_v45 = vmul.f32 %v2265_v44, %v6106_v3  ;;  %v2606_v29 = vmul.f32 %v2605_v14, %v6134_v12  ;;  %s597_s8 = sand.u32 1, %s7403_s30  }
 0x4a5   : > { %v2013_v26 = vmul.f32 %v2012_v13, %v6114_v40  ;;  %v2014_v54 = vmul.f32 %v2012_v13, %v6101_v1  ;;  %v2202_v40 = vstv %s6245_s7  ;;  %v2006_v22 = vsel %vm1067_vm12, %v2004_v4, %v2005_v37  ;;  %s3564_s5 = sshll.u32 %s597_s8, 6  ;;  %s6415_s7 = sld [smem:[#allocation19 + $0x90]] }
 0x4a6   : > { %v2203_v28 = vmul.f32 %v2202_v40, %v6123_v27  ;;  %v2031_v1 = vrot.slane %v2027_v50, 4  ;;  %v2204_v7 = vmul.f32 %v2202_v40, %v6106_v3  ;;  %v2235_v6 = vsel %vm821_vm9, %v2233_v21, %v2234_v32  ;;  %s6435_s3 = scalar_lea.vmem [#allocation24], %s3564_s5  ;;  %s6563_s5 = sld [smem:[#allocation19 + $0x196]] }
 0x4a7   : > { %v2018_v52 = vrot.slane %v2014_v54, 4  ;;  %v3009_v9 = vmul.f32 %v3008_v20, %v6140_v39  ;;  %v2284_v13 = vrot.slane %v2280_v30, 2  ;;  %v2618_v4 = vstv %s6299_s29  ;;  %s6454_s29 = sld [smem:[#allocation19 + $0x191]] }
 0x4a8   : > { %1831 = vrot.lane.b32.xlu0 %v1830_v15, %s4377_s1  ;;  %1844 = vrot.lane.b32.xlu1 %v1843_v24, %s4378_s12  ;;  %v1993_v15 = vsel %vm1067_vm12, %v1991_v18, %v1992_v36  ;;  %v2017_v24 = vrot.slane %v2013_v26, 4  ;;  %v2032_v60 = vsel %vm1067_vm12, %v2030_v11, %v2031_v1  ;;  %v2207_v31 = vrot.slane %v2203_v28, 1 }
 0x4a9   : > { %v2607_v18 = vmul.f32 %v2605_v14, %v6308_v53  ;;  %v2271_v26 = vrot.slane %v2267_v45, 2  ;;  %v3013_v54 = vrot.slane %v3009_v9, 1  ;;  %v2619_v37 = vmul.f32 %v2618_v4, %v6134_v12 }
 0x4aa   : > { %v2019_v42 = vsel %vm1067_vm12, %v2017_v24, %v2018_v52  ;;  %v3022_v50 = vmul.f32 %v3021_v46, %v6140_v39  ;;  %v3034_v28 = vstv %s6318_s18  ;;  %v3047_v5 = vstv %s6332_s20  ;;  %s6471_s18 = sld [smem:[#allocation19 + $0x80]]  ;;  %s6480_s20 = sld [smem:[#allocation19 + $0x192]] }
 0x4ab   : > { %v2272_v36 = vsel %vm903_vm10, %v2270_v61, %v2271_v26  ;;  %v2623_v1 = vrot.slane %v2619_v37, 1  ;;  %v3071_v21 = vstv %s6347_s25  ;;  %v2681_v61 = vstv %s6358_s19  ;;  %s6487_s25 = sld [smem:[#allocation19 + $0x113]] }
 0x4ac   : > { %1868 = vrot.lane.b32.xlu0 %v1867_v58, %s7216_s9  ;;  %1881 = vrot.lane.b32.xlu1 %v1880_v57, %s7219_s15  ;;  %v2217_v58 = vmul.f32 %v2215_v59, %v6106_v3  ;;  %v2242_v57 = vmul.f32 %v2241_v8, %v6123_v27  ;;  %v2620_v59 = vmul.f32 %v2618_v4, %v6308_v53  ;;  %v2644_v8 = vstv %s6326_s24  ;;  %s6473_s24 = sld [smem:[#allocation19 + $0x100]]  ;;  %s6496_s19 = sld [smem:[#allocation19 + $0x193]] }
 0x4ad   : > { %v2646_v38 = vmul.f32 %v2644_v8, %v6308_v53  ;;  %v3072_v45 = vmul.f32 %v3071_v21, %v6140_v39  ;;  %v3084_v9 = vstv %s6360_s16  ;;  %v2682_v26 = vmul.f32 %v2681_v61, %v6134_v12  ;;  %s6501_s16 = sld [smem:[#allocation19 + $0x95]] }
 0x4ae   : > { %v2221_v55 = vrot.slane %v2217_v58, 1  ;;  %v2246_v16 = vrot.slane %v2242_v57, 1  ;;  %v3026_v58 = vrot.slane %v3022_v50, 1  ;;  %v2683_v4 = vmul.f32 %v2681_v61, %v6308_v53 }
 0x4af   : > { %v2650_v14 = vrot.slane %v2646_v38, 1  ;;  %v2694_v50 = vstv %s6374_s17  ;;  %v3110_v38 = vstv %s6404_s10  ;;  %s6511_s17 = sld [smem:[#allocation19 + $0x195]]  ;;  %s6535_s10 = sld [smem:[#allocation19 + $0x180]] }
 0x4b0   : > { %1894 = vrot.lane.b32.xlu0 %v1893_v25, %s4377_s1  ;;  %1907 = vrot.lane.b32.xlu1 %v1906_v10, %s4378_s12  ;;  %v2208_v25 = vrot.slane %v2204_v7, 1  ;;  %v2279_v10 = vmul.f32 %v2278_v51, %v6123_v27  ;;  %v2222_v2 = vsel %vm821_vm9, %v2220_v34, %v2221_v55  ;;  %v2248_v49 = vsel %vm821_vm9, %v2246_v16, %v2247_v17 }
 0x4b1   : > { %v3035_v7 = vmul.f32 %v3034_v28, %v6140_v39 }
 0x4b2   : > { %v2209_v35 = vsel %vm821_vm9, %v2207_v31, %v2208_v25  ;;  %v2645_v31 = vmul.f32 %v2644_v8, %v6134_v12  ;;  %v3048_v25 = vmul.f32 %v3047_v5, %v6140_v39 }
 0x4b3   : > { %v3039_v55 = vrot.slane %v3035_v7, 1  ;;  %v2304_v7 = vstv %s6388_s4  ;;  %s6523_s4 = sld [smem:[#allocation19 + $0x116]] }
 0x4b4   : > { %1931 = vrot.lane.b32.xlu0 %v1930_v33, %s7216_s9  ;;  %1944 = vrot.lane.b32.xlu1 %v1943_v19, %s7219_s15  ;;  %v6314_v33 = vld [vmem:[#allocation3 + $0x38] sm:$0xf]  ;;  %v2283_v19 = vrot.slane %v2279_v10, 2  ;;  %v3052_v32 = vrot.slane %v3048_v25, 1  ;;  %v2707_v25 = vstv %s6398_s0  ;;  %s6532_s0 = sld [smem:[#allocation19 + $0x5]] }
 0x4b5   : > { %v3010_v23 = vmul.f32 %v3008_v20, %v6314_v33  ;;  %v3023_v40 = vmul.f32 %v3021_v46, %v6314_v33  ;;  %v3049_v41 = vmul.f32 %v3047_v5, %v6314_v33  ;;  %v3073_v20 = vmul.f32 %v3071_v21, %v6314_v33 }
 0x4b6   : > { %v3086_v46 = vmul.f32 %v3084_v9, %v6314_v33  ;;  %v2306_v5 = vmul.f32 %v2304_v7, %v6106_v3  ;;  %v2709_v21 = vmul.f32 %v2707_v25, %v6308_v53 }
 0x4b7   : > { %v3014_v24 = vrot.slane %v3010_v23, 1  ;;  %v3027_v57 = vrot.slane %v3023_v40, 1  ;;  %v3085_v23 = vmul.f32 %v3084_v9, %v6140_v39  ;;  %v2695_v40 = vmul.f32 %v2694_v50, %v6134_v12 }
 0x4b8   : > { %1957 = vrot.lane.b32.xlu0 %v1956_v43, %s4377_s1  ;;  %1970 = vrot.lane.b32.xlu1 %v1969_v56, %s4378_s12  ;;  %v2285_v43 = vsel %vm903_vm10, %v2283_v19, %v2284_v13  ;;  %v2610_v56 = vrot.slane %v2606_v29, 1  ;;  %v3053_v29 = vrot.slane %v3049_v41, 1  ;;  %v2708_v41 = vmul.f32 %v2707_v25, %v6134_v12 }
 0x4b9   : > { %v3015_v52 = vsel %vm821_vm9, %v3013_v54, %v3014_v24  ;;  %v3028_v44 = vsel %vm821_vm9, %v3026_v58, %v3027_v57  ;;  %v2686_v24 = vrot.slane %v2682_v26, 2  ;;  %v2699_v57 = vrot.slane %v2695_v40, 2 }
 0x4ba   : > { %v3054_v13 = vsel %vm821_vm9, %v3052_v32, %v3053_v29  ;;  %v2713_v9 = vrot.slane %v2709_v21, 2  ;;  %v3134_v26 = vstv %s6428_s28  ;;  %v3160_v21 = vstv %s6480_s20  ;;  %s6589_s28 = sld [smem:[#allocation19 + $0x98]]  ;;  %s3746_s20 = sld [smem:[#allocation19 + $0x10a]] }
 0x4bc   : > { %1994 = vrot.lane.b32.xlu0 %v1993_v15, %s7216_s9  ;;  %2007 = vrot.lane.b32.xlu1 %v2006_v22, %s7219_s15  ;;  %v2611_v15 = vrot.slane %v2607_v18, 1  ;;  %v2631_v22 = vstv %s6312_s22  ;;  %v3076_v18 = vrot.slane %v3072_v45, 2  ;;  %s6465_s22 = sld [smem:[#allocation19 + $0x112]] }
 0x4bd   : > { %v2632_v62 = vmul.f32 %v2631_v22, %v6134_v12  ;;  %v2633_v0 = vmul.f32 %v2631_v22, %v6308_v53 }
 0x4be   : > { %v2612_v11 = vsel %vm821_vm9, %v2610_v56, %v2611_v15  ;;  %v3077_v56 = vrot.slane %v3073_v20, 2  ;;  %v2712_v20 = vrot.slane %v2708_v41, 2 }
 0x4bf   : > { %v2636_v34 = vrot.slane %v2632_v62, 1  ;;  %v2637_v48 = vrot.slane %v2633_v0, 1  ;;  %v3090_v62 = vrot.slane %v3086_v46, 2  ;;  %v2305_v0 = vmul.f32 %v2304_v7, %v6123_v27 }
 0x4c0   : > { %2020 = vrot.lane.b32.xlu0 %v2019_v42, %s4377_s1  ;;  %2033 = vrot.lane.b32.xlu1 %v2032_v60, %s4378_s12  ;;  %v2624_v42 = vrot.slane %v2620_v59, 1  ;;  %v3036_v60 = vmul.f32 %v3034_v28, %v6314_v33  ;;  %v3078_v15 = vsel %vm903_vm10, %v3076_v18, %v3077_v56  ;;  %v3089_v59 = vrot.slane %v3085_v23, 2 }
 0x4c1   : > { %v2638_v30 = vsel %vm821_vm9, %v2636_v34, %v2637_v48  ;;  %v2696_v28 = vmul.f32 %v2694_v50, %v6308_v53  ;;  %v2341_v56 = vstv %s6433_s14  ;;  %v1750_v50 = vstv %s6446_s6  ;;  %s6608_s14 = sld [smem:[#allocation19 + $0xa]]  ;;  %s6614_s6 = sld [smem:[#allocation19 + $0x197]] }
 0x4c2   : > { %v2625_v51 = vsel %vm821_vm9, %v2623_v1, %v2624_v42  ;;  %v3040_v10 = vrot.slane %v3036_v60, 1  ;;  %v3091_v42 = vsel %vm903_vm10, %v3089_v59, %v3090_v62  ;;  %v2343_v59 = vmul.f32 %v2341_v56, %v6106_v3 }
 0x4c4   : > { %2223 = vrot.lane.b32.xlu0 %v2222_v2, %s7219_s15  ;;  %2210 = vrot.lane.b32.xlu1 %v2209_v35, %s7216_s9  ;;  %v2668_v2 = vstv %s6342_s21  ;;  %v2649_v35 = vrot.slane %v2645_v31, 1  ;;  %v3041_v17 = vsel %vm821_vm9, %v3039_v55, %v3040_v10  ;;  %v2700_v31 = vrot.slane %v2696_v28, 2  ;;  %s6485_s21 = sld [smem:[#allocation19 + $0x93]] }
 0x4c5   : > { %v2669_v16 = vmul.f32 %v2668_v2, %v6134_v12  ;;  %v2670_v19 = vmul.f32 %v2668_v2, %v6308_v53  ;;  %v2309_v10 = vrot.slane %v2305_v0, 2  ;;  %v3111_v2 = vmul.f32 %v3110_v38, %v6140_v39 }
 0x4c6   : > { %v2701_v48 = vsel %vm903_vm10, %v2699_v57, %v2700_v31  ;;  %v2744_v28 = vstv %s6452_s2  ;;  %v2757_v57 = vstv %s6465_s22  ;;  %s6639_s2 = sld [smem:[#allocation19 + $0x118]]  ;;  %s3741_s22 = sld [smem:[#allocation19 + $0x105]] }
 0x4c7   : > { %v2745_v7 = vmul.f32 %v2744_v28, %v6134_v12  ;;  %v2758_v25 = vmul.f32 %v2757_v57, %v6134_v12 }
 0x4c8   : > { %2249 = vrot.lane.b32.xlu0 %v2248_v49, %s4378_s12  ;;  %2236 = vrot.lane.b32.xlu1 %v2235_v6, %s4377_s1  ;;  %v2651_v49 = vsel %vm821_vm9, %v2649_v35, %v2650_v14  ;;  %v2673_v6 = vrot.slane %v2669_v16, 2  ;;  %v2310_v16 = vrot.slane %v2306_v5, 2 }
 0x4c9   : > { %v2749_v41 = vrot.slane %v2745_v7, 3 }
 0x4ca   : > { %v2311_v29 = vsel %vm903_vm10, %v2309_v10, %v2310_v16  ;;  %v2759_v16 = vmul.f32 %v2757_v57, %v6308_v53  ;;  %v6568_v57 = vld [vmem:[#allocation3] sm:$0xff] }
 0x4cc   : > { %2286 = vrot.lane.b32.xlu0 %v2285_v43, %s7219_s15  ;;  %2273 = vrot.lane.b32.xlu1 %v2272_v36, %s7216_s9  ;;  %v2674_v43 = vrot.slane %v2670_v19, 2  ;;  %v2291_v36 = vstv %s6370_s23  ;;  %v2731_v19 = vstv %s6419_s11  ;;  %s6507_s23 = sld [smem:[#allocation19 + $0x115]]  ;;  %s6587_s11 = sld [smem:[#allocation19 + $0x117]] }
 0x4cd   : > { %v2292_v37 = vmul.f32 %v2291_v36, %v6123_v27  ;;  %v2293_v22 = vmul.f32 %v2291_v36, %v6106_v3  ;;  %v2733_v18 = vmul.f32 %v2731_v19, %v6308_v53 }
 0x4ce   : > { %v2675_v54 = vsel %vm903_vm10, %v2673_v6, %v2674_v43  ;;  %v2732_v6 = vmul.f32 %v2731_v19, %v6134_v12  ;;  %v3135_v43 = vmul.f32 %v3134_v26, %v6140_v39 }
 0x4cf   : > { %v2296_v1 = vrot.slane %v2292_v37, 2  ;;  %v2297_v60 = vrot.slane %v2293_v22, 2 }
 0x4d0   : > { %2613 = vrot.lane.b32.xlu0 %v2612_v11, %s7216_s9  ;;  %3016 = vrot.lane.b32.xlu1 %v3015_v52, %s7216_s9  ;;  %v2687_v11 = vrot.slane %v2683_v4, 2  ;;  %v3097_v52 = vstv %s6383_s13  ;;  %v2714_v4 = vsel %vm903_vm10, %v2712_v20, %v2713_v9  ;;  %v2736_v36 = vrot.slane %v2732_v6, 3  ;;  %s6513_s13 = sld [smem:[#allocation19 + $0x96]] }
 0x4d1   : > { %v3098_v58 = vmul.f32 %v3097_v52, %v6140_v39  ;;  %v3099_v34 = vmul.f32 %v3097_v52, %v6314_v33  ;;  %v3139_v62 = vrot.slane %v3135_v43, 3  ;;  %v3147_v52 = vstv %s6454_s29  ;;  %s6641_s29 = sld [smem:[#allocation19 + $0x198]] }
 0x4d2   : > { %v2688_v8 = vsel %vm903_vm10, %v2686_v24, %v2687_v11  ;;  %v3136_v24 = vmul.f32 %v3134_v26, %v6314_v33  ;;  %v3149_v31 = vmul.f32 %v3147_v52, %v6314_v33  ;;  %v2762_v20 = vrot.slane %v2758_v25, 3 }
 0x4d3   : > { %v3102_v55 = vrot.slane %v3098_v58, 2  ;;  %v3103_v35 = vrot.slane %v3099_v34, 2  ;;  %v2746_v34 = vmul.f32 %v2744_v28, %v6308_v53  ;;  %v3173_v6 = vstv %s6496_s19  ;;  %s3711_s19 = sld [smem:[#allocation19 + $0x8f]] }
 0x4d4   : > { %2626 = vrot.lane.b32.xlu0 %v2625_v51, %s7219_s15  ;;  %3029 = vrot.lane.b32.xlu1 %v3028_v44, %s7219_s15  ;;  %v2298_v44 = vsel %vm903_vm10, %v2296_v1, %v2297_v60  ;;  %v3140_v0 = vrot.slane %v3136_v24, 3  ;;  %v2347_v60 = vrot.slane %v2343_v59, 3  ;;  %v3162_v43 = vmul.f32 %v3160_v21, %v6314_v33 }
 0x4d5   : > { %v3104_v45 = vsel %vm903_vm10, %v3102_v55, %v3103_v35 }
 0x4d8   : > { %2639 = vrot.lane.b32.xlu0 %v2638_v30, %s4377_s1  ;;  %3042 = vrot.lane.b32.xlu1 %v3041_v17, %s4377_s1  ;;  %v3112_v30 = vmul.f32 %v3110_v38, %v6314_v33  ;;  %v2328_v17 = vstv %s6415_s7  ;;  %v2558_v38 = vstv %s6473_s24  ;;  %s6566_s7 = sld [smem:[#allocation19 + $0x97]]  ;;  %s3706_s24 = sld [smem:[#allocation19 + $0x8a]] }
 0x4d9   : > { %v2329_v14 = vmul.f32 %v2328_v17, %v6123_v27  ;;  %v2330_v61 = vmul.f32 %v2328_v17, %v6106_v3  ;;  %v3153_v17 = vrot.slane %v3149_v31, 3  ;;  %v2961_v31 = vstv %s6535_s10  ;;  %s7404_s10 = sld [smem:[#allocation37_spill]] }
 0x4db   : > { %v2333_v23 = vrot.slane %v2329_v14, 3  ;;  %v2334_v37 = vrot.slane %v2330_v61, 3 }
 0x4dc   : > { %2652 = vrot.lane.b32.xlu0 %v2651_v49, %s4378_s12  ;;  %3055 = vrot.lane.b32.xlu1 %v3054_v13, %s4378_s12  ;;  %v3115_v49 = vrot.slane %v3111_v2, 2  ;;  %v3116_v13 = vrot.slane %v3112_v30, 2  ;;  %v2750_v30 = vrot.slane %v2746_v34, 3 }
 0x4dd   : > { %v2335_v11 = vsel %vm985_vm11, %v2333_v23, %v2334_v37  ;;  %v2763_v23 = vrot.slane %v2759_v16, 3 }
 0x4de   : > { %v3117_v46 = vsel %vm903_vm10, %v3115_v49, %v3116_v13  ;;  %v3161_v49 = vmul.f32 %v3160_v21, %v6140_v39  ;;  %v2751_v61 = vsel %vm985_vm11, %v2749_v41, %v2750_v30 }
 0x4df   : > { %v2764_v59 = vsel %vm985_vm11, %v2762_v20, %v2763_v23 }
 0x4e0   : > { %2676 = vrot.lane.b32.xlu0 %v2675_v54, %s7216_s9  ;;  %3079 = vrot.lane.b32.xlu1 %v3078_v15, %s7216_s9  ;;  %v2342_v54 = vmul.f32 %v2341_v56, %v6123_v27  ;;  %v2737_v15 = vrot.slane %v2733_v18, 3  ;;  %v2391_v18 = vstv %s6501_s16  ;;  %v2794_v56 = vstv %s6507_s23  ;;  %s6790_s16 = sld [smem:[#allocation19 + $0x18f]]  ;;  %s6807_s23 = sld [smem:[#allocation19 + $0x94]] }
 0x4e1   : > { %v2795_v41 = vmul.f32 %v2794_v56, %v6134_v12 }
 0x4e2   : > { %v2738_v1 = vsel %vm985_vm11, %v2736_v36, %v2737_v15  ;;  %v2346_v58 = vrot.slane %v2342_v54, 3  ;;  %v3197_v36 = vstv %s6511_s17  ;;  %v2404_v54 = vstv %s6513_s13  ;;  %s6813_s17 = sld [smem:[#allocation19 + $0x114]] }
 0x4e3   : > { %s6817_s13 = sld [smem:[#allocation19 + $0x194]] }
 0x4e4   : > { %2689 = vrot.lane.b32.xlu0 %v2688_v8, %s7219_s15  ;;  %3092 = vrot.lane.b32.xlu1 %v3091_v42, %s7219_s15  ;;  %v3148_v8 = vmul.f32 %v3147_v52, %v6140_v39  ;;  %v2354_v42 = vstv %s6463_s27  ;;  %v2348_v10 = vsel %vm985_vm11, %v2346_v58, %v2347_v60  ;;  %v3166_v58 = vrot.slane %v3162_v43, 3  ;;  %s3701_s27 = sld [smem:[#allocation19 + $0x85]] }
 0x4e5   : > { %v2058_v51 = vpop.permute.xlu0 %2057  ;;  %v2355_v55 = vmul.f32 %v2354_v42, %v6123_v27  ;;  %v2356_v35 = vmul.f32 %v2354_v42, %v6106_v3  ;;  %v1786_v42 = vstv %s6532_s0  ;;  %v3210_v43 = vstv %s6563_s5  ;;  %s6838_s0 = sld [smem:[#allocation22 + $0x1]]  ;;  %s6841_s5 = sld [smem:[#allocation21 + $0x3]] }
 0x4e6   : > { %2064 = vst.msk [vmem:[%s6435_s3 + $0x6] sm:$0x3] %vm2063_vm7, %v2058_v51  ;;  %v3152_v2 = vrot.slane %v3148_v8, 3  ;;  %v3175_v8 = vmul.f32 %v3173_v6, %v6314_v33 }
 0x4e7   : > { %v2360_v26 = vrot.slane %v2356_v35, 3 }
 0x4e8   : > { %2299 = vrot.lane.b32.xlu0 %v2298_v44, %s4377_s1  ;;  %2702 = vrot.lane.b32.xlu1 %v2701_v48, %s4377_s1  ;;  %v2155_v44 = vstv %s6471_s18  ;;  %v3141_v48 = vsel %vm985_vm11, %v3139_v62, %v3140_v0  ;;  %v3154_v9 = vsel %vm985_vm11, %v3152_v2, %v3153_v17  ;;  %v2807_v62 = vstv %s6523_s4  ;;  %v6583_v17 = vld [vmem:[#allocation3 + $0x18] sm:$0xf]  ;;  %s3781_s18 = sld [smem:[#allocation19 + $0x185]]  ;;  %s3721_s4 = sld [smem:[#allocation21 + $0x1]] }
 0x4e9   : > { %v2463_v32 = vpop.permute.xlu1 %2462  ;;  %v1751_v0 = vmul.f32 %v6568_v57, %v1750_v50  ;;  %v3179_v30 = vrot.slane %v3175_v8, 3  ;;  %v2809_v8 = vmul.f32 %v2807_v62, %v6308_v53 }
 0x4ea   : > { %3726 = vst.msk [vmem:[%s6435_s3 + $0xe] sm:$0x3] %vm2063_vm7, %v2463_v32  ;;  %v2367_v32 = vstv %s6485_s21  ;;  %s6760_s21 = sld [smem:[#allocation19 + $0x18a]] }
 0x4eb   : > { %v2368_v13 = vmul.f32 %v2367_v32, %v6123_v27 }
 0x4ec   : > { %3105 = vrot.lane.b32.xlu0 %v3104_v45, %s4377_s1  ;;  %2312 = vrot.lane.b32.xlu1 %v2311_v29, %s4378_s12  ;;  %v2770_v45 = vstv %s6487_s25  ;;  %v2359_v29 = vrot.slane %v2355_v55, 3  ;;  %v2559_v55 = vmul.f32 %v2558_v38, %v6134_v12  ;;  %v2393_v38 = vmul.f32 %v6583_v17, %v2391_v18  ;;  %s3751_s25 = sld [smem:[#allocation19 + $0x10f]] }
 0x4ed   : > { %v2372_v52 = vrot.slane %v2368_v13, 3  ;;  %v2772_v7 = vmul.f32 %v2770_v45, %v6308_v53 }
 0x4ee   : > { %v2361_v24 = vsel %vm985_vm11, %v2359_v29, %v2360_v26  ;;  %v2962_v29 = vmul.f32 %v2961_v31, %v6140_v39 }
 0x4ef   : > { %v2776_v50 = vrot.slane %v2772_v7, 3 }
 0x4f0   : > { %2715 = vrot.lane.b32.xlu0 %v2714_v4, %s4378_s12  ;;  %3118 = vrot.lane.b32.xlu1 %v3117_v46, %s4378_s12  ;;  %v2156_v4 = vmul.f32 %v2155_v44, %v6123_v27  ;;  %v2369_v46 = vmul.f32 %v2367_v32, %v6106_v3  ;;  %v3174_v3 = vmul.f32 %v3173_v6, %v6140_v39  ;;  %v2799_v6 = vrot.slane %v2795_v41, 4  ;;  %v6643_v41 = vld [vmem:[#allocation3 + $0x8] sm:$0xf] }
 0x4f1   : > { %v2796_v32 = vmul.f32 %v2794_v56, %v6308_v53  ;;  %v2417_v56 = vstv %s6566_s7  ;;  %s6843_s7 = sld [smem:[#allocation21 + $0x2]] }
 0x4f2   : > { %v6489_v40 = vpop.permute.xlu1 %1765  ;;  %v6491_v22 = vpop.permute.xlu0 %1757  ;;  %v2373_v34 = vrot.slane %v2369_v46, 3  ;;  %v3178_v21 = vrot.slane %v3174_v3, 3 }
 0x4f3   : > { %v2800_v23 = vrot.slane %v2796_v32, 4  ;;  %v2419_v32 = vmul.f32 %v6583_v17, %v2417_v56 }
 0x4f4   : > { %2336 = vrot.lane.b32.xlu0 %v2335_v11, %s7216_s9  ;;  %2739 = vrot.lane.b32.xlu1 %v2738_v1, %s7216_s9  ;;  %v3165_v11 = vrot.slane %v3161_v49, 3  ;;  %v2771_v1 = vmul.f32 %v2770_v45, %v6134_v12  ;;  %v2374_v35 = vsel %vm985_vm11, %v2372_v52, %v2373_v34  ;;  %v6618_v52 = vld [vmem:[#allocation3 + $0x20] sm:$0xff]  ;;  %v2430_v34 = vstv %s6589_s28  ;;  %s6847_s28 = sld [smem:[#allocation22 + $0x2]] }
 0x4f6   : > { %v6515_v5 = vpop.permute.xlu1 %1781  ;;  %v6517_v51 = vpop.permute.xlu0 %1773  ;;  %v2775_v16 = vrot.slane %v2771_v1, 3 }
 0x4f8   : > { %3142 = vrot.lane.b32.xlu0 %v3141_v48, %s7216_s9  ;;  %2349 = vrot.lane.b32.xlu1 %v2348_v10, %s7219_s15  ;;  %v3167_v48 = vsel %vm985_vm11, %v3165_v11, %v3166_v58  ;;  %v2392_v10 = vmul.f32 %v2391_v18, %v6123_v27  ;;  %v1760_v27 = vadd.f32 %v6491_v22, %v1751_v0  ;;  %v6599_v18 = vld [vmem:[#allocation3 + $0x10] sm:$0xff] }
 0x4f9   : > { %v2777_v13 = vsel %vm985_vm11, %v2775_v16, %v2776_v50  ;;  %v3180_v22 = vsel %vm985_vm11, %v3178_v21, %v3179_v30  ;;  %v2405_v26 = vmul.f32 %v6599_v18, %v2404_v54  ;;  %v2801_v11 = vsel %vm1067_vm12, %v2799_v6, %v2800_v23  ;;  %v6623_v58 = vld [vmem:[#allocation3 + $0x30] sm:$0xff] }
 0x4fa   : > { %v2056_v14 = vpop.permute.xlu1 %2055  ;;  %v2171_v19 = vpop.permute.xlu0 %2170  ;;  %v2396_v49 = vrot.slane %v2392_v10, 4  ;;  %v3211_v7 = vmul.f32 %v6623_v58, %v3210_v43  ;;  %v1787_v0 = vmul.f32 %v6568_v57, %v1786_v42 }
 0x4fb   : > { %2062 = vst.msk [vmem:[%s6435_s3 - $0x2] sm:$0xfc] %vm2061_vm8, %v2056_v14  ;;  %v3198_v14 = vmul.f32 %v3197_v36, %v6140_v39  ;;  %v2397_v39 = vrot.slane %v2393_v38, 4  ;;  %v2409_v3 = vrot.slane %v2405_v26, 4 }
 0x4fc   : > { %2752 = vrot.lane.b32.xlu0 %v2751_v61, %s7219_s15  ;;  %3155 = vrot.lane.b32.xlu1 %v3154_v9, %s7219_s15  ;;  %v3199_v61 = vmul.f32 %v3197_v36, %v6314_v33  ;;  %v3215_v30 = vrot.slane %v3211_v7, 4  ;;  %v1791_v38 = vrot.slane %v1787_v0, 1 }
 0x4fd   : > { %v3202_v36 = vrot.slane %v3198_v14, 4  ;;  %v2813_v14 = vrot.slane %v2809_v8, 4 }
 0x4fe   : > { %v2163_v37 = vpop.permute.xlu1 %2162  ;;  %v2187_v15 = vpop.permute.xlu0 %2186 }
 0x4ff   : > { %v2165_v28 = vadd.f32 %v2163_v37, %v2156_v4  ;;  %v1768_v4 = vadd.f32 %v6489_v40, %v1760_v27  ;;  %v2406_v37 = vmul.f32 %v6583_v17, %v2404_v54  ;;  %v2808_v40 = vmul.f32 %v6618_v52, %v2807_v62 }
 0x500   : > { %2362 = vrot.lane.b32.xlu0 %v2361_v24, %s4377_s1  ;;  %2765 = vrot.lane.b32.xlu1 %v2764_v59, %s4377_s1  ;;  %v2398_v59 = vsel %vm1067_vm12, %v2396_v49, %v2397_v39  ;;  %v1849_v27 = vstv %s6608_s14  ;;  %v2431_v39 = vmul.f32 %v6599_v18, %v2430_v34  ;;  %s7405_s14 = sld [smem:[#allocation36_spill]] }
 0x501   : > { %v2173_v60 = vadd.f32 %v2171_v19, %v2165_v28  ;;  %v3203_v28 = vrot.slane %v3199_v61, 4  ;;  %v1776_v31 = vadd.f32 %v6517_v51, %v1768_v4  ;;  %v2812_v62 = vrot.slane %v2808_v40, 4 }
 0x502   : > { %v2179_v44 = vpop.permute.xlu1 %2178  ;;  %v2566_v25 = vpop.permute.xlu0 %2565  ;;  %v2418_v51 = vmul.f32 %v6599_v18, %v2417_v56 }
 0x503   : > { %v2181_v2 = vadd.f32 %v2179_v44, %v2173_v60  ;;  %v2568_v45 = vadd.f32 %v2566_v25, %v2559_v55  ;;  %v2820_v60 = vstv %s6587_s11  ;;  %v3204_v44 = vsel %vm1067_vm12, %v3202_v36, %v3203_v28  ;;  %s6845_s11 = sld [smem:[#allocation22 + $0x3]] }
 0x504   : > { %3168 = vrot.lane.b32.xlu0 %v3167_v48, %s4377_s1  ;;  %2375 = vrot.lane.b32.xlu1 %v2374_v35, %s4378_s12  ;;  %v2410_v55 = vrot.slane %v2406_v37, 4  ;;  %v3212_v25 = vmul.f32 %v3210_v43, %v6314_v33  ;;  %v2821_v35 = vmul.f32 %v6618_v52, %v2820_v60  ;;  %v2422_v61 = vrot.slane %v2418_v51, 4 }
 0x505   : > { %v6592_v12 = vadd.f32 %v2187_v15, %v2181_v2  ;;  %v1788_v2 = vmul.f32 %v6643_v41, %v1786_v42  ;;  %v2822_v42 = vmul.f32 %v2820_v60, %v6308_v53  ;;  %v2814_v26 = vsel %vm1067_vm12, %v2812_v62, %v2813_v14 }
 0x506   : > { %v2969_v19 = vpop.permute.xlu1 %2968  ;;  %v2574_v20 = vpop.permute.xlu0 %2573  ;;  %v2411_v50 = vsel %vm1067_vm12, %v2409_v3, %v2410_v55  ;;  %v2423_v43 = vrot.slane %v2419_v32, 4  ;;  %v2432_v36 = vmul.f32 %v6583_v17, %v2430_v34  ;;  %v2833_v37 = vstv %s6639_s2 }
 0x507   : > { %v2576_v9 = vadd.f32 %v2574_v20, %v2568_v45  ;;  %v2971_v46 = vadd.f32 %v2969_v19, %v2962_v29  ;;  %v1784_v45 = vadd.f32 %v6515_v5, %v1776_v31  ;;  %v3216_v19 = vrot.slane %v3212_v25, 4 }
 0x508   : > { %2778 = vrot.lane.b32.xlu0 %v2777_v13, %s4378_s12  ;;  %3181 = vrot.lane.b32.xlu1 %v3180_v22, %s4378_s12  ;;  %v3223_v29 = vstv %s6614_s6  ;;  %v1792_v6 = vrot.slane %v1788_v2, 1  ;;  %v2826_v56 = vrot.slane %v2822_v42, 4  ;;  %v2435_v3 = vrot.slane %v2431_v39, 4  ;;  %s3811_s6 = sshll.u32 %s7404_s10, 4 }
 0x509   : > { %v3224_v13 = vmul.f32 %v6623_v58, %v3223_v29  ;;  %v3217_v5 = vsel %vm1067_vm12, %v3215_v30, %v3216_v19  ;;  %v3225_v4 = vmul.f32 %v3223_v29, %v6314_v33  ;;  %v2834_v7 = vmul.f32 %v6618_v52, %v2833_v37  ;;  %s3293_s2 = sadd.s32 %s7405_s14, %s3811_s6 }
 0x50a   : > { %v2977_v15 = vpop.permute.xlu1 %2976  ;;  %v2582_v24 = vpop.permute.xlu0 %2581  ;;  %v1793_v23 = vsel %vm821_vm9, %v1791_v38, %v1792_v6  ;;  %v1851_v60 = vmul.f32 %v6643_v41, %v1849_v27  ;;  %v2436_v31 = vrot.slane %v2432_v36, 4  ;;  %v3262_v36 = vadd.f32 %v6623_v58, %v6078_v47 }
 0x50b   : > { %v2979_v1 = vadd.f32 %v2977_v15, %v2971_v46  ;;  %v2584_v54 = vadd.f32 %v2582_v24, %v2576_v9  ;;  %v2825_v9 = vrot.slane %v2821_v35, 4  ;;  %v1795_v46 = vadd.f32 %v1793_v23, %v1784_v45 }
 0x50c   : > { %2399 = vrot.lane.b32.xlu0 %v2398_v59, %s7216_s9  ;;  %2802 = vrot.lane.b32.xlu1 %v2801_v11, %s7216_s9  ;;  %v3236_v15 = vstv %s6641_s29  ;;  %v2424_v11 = vsel %vm1067_vm12, %v2422_v61, %v2423_v43  ;;  %v3228_v40 = vrot.slane %v3224_v13, 4  ;;  %v3229_v0 = vrot.slane %v3225_v4, 4  ;;  %s3296_s29 = sshll.u32 %s6435_s3, 4  ;;  %s6866_s29 = int_to_ptr.vmem [resolvable:$true] %s3296_s29 }
 0x50d   : > { %v2827_v28 = vsel %vm1067_vm12, %v2825_v9, %v2826_v56  ;;  %v3237_v8 = vmul.f32 %v6623_v58, %v3236_v15  ;;  %v3238_v55 = vmul.f32 %v3236_v15, %v6314_v33  ;;  %v2437_v51 = vsel %vm1067_vm12, %v2435_v3, %v2436_v31 }
 0x50e   : > { %v2985_v48 = vpop.permute.xlu1 %2984  ;;  %v2590_v10 = vpop.permute.xlu0 %2589  ;;  %v2838_v35 = vrot.slane %v2834_v7, 4  ;;  %v2859_v13 = vadd.f32 %v6618_v52, %v6076_v63 }
 0x50f   : > { %v2987_v16 = vadd.f32 %v2985_v48, %v2979_v1  ;;  %v6650_v21 = vadd.f32 %v2590_v10, %v2584_v54  ;;  %v1850_v1 = vmul.f32 %v6568_v57, %v1849_v27  ;;  %v3230_v10 = vsel %vm1067_vm12, %v3228_v40, %v3229_v0 }
 0x510   : > { %3205 = vrot.lane.b32.xlu0 %v3204_v44, %s7216_s9  ;;  %2412 = vrot.lane.b32.xlu1 %v2411_v50, %s7219_s15  ;;  %s6680_s9 = sld [smem:[#allocation19 + $0xf]]  ;;  %v2835_v44 = vmul.f32 %v2833_v37, %v6308_v53  ;;  %v1855_v50 = vrot.slane %v1851_v60, 2  ;;  %v3242_v32 = vrot.slane %v3238_v55, 4  ;;  %v3263_v37 = vadd.f32 %v6078_v47, %v6314_v33 }
 0x511   : > { %v1854_v62 = vrot.slane %v1850_v1, 2 }
 0x512   : > { %v2993_v20 = vpop.permute.xlu1 %2992  ;;  %v2461_v49 = vpop.permute.xlu0 %2460  ;;  %v2839_v38 = vrot.slane %v2835_v44, 4 }
 0x513   : > { %v6661_v22 = vadd.f32 %v2993_v20, %v2987_v16  ;;  %3725 = vst.msk [vmem:[%s6435_s3 + $0x6] sm:$0xfc] %vm2061_vm8, %v2461_v49  ;;  %v3241_v16 = vrot.slane %v3237_v8, 4  ;;  %v1856_v27 = vsel %vm903_vm10, %v1854_v62, %v1855_v50  ;;  %v3688_v50 = vld [vmem:[%s7393_s26 + $0x64] sm:$0xff] }
 0x514   : > { %2815 = vrot.lane.b32.xlu0 %v2814_v26, %s7219_s15  ;;  %3218 = vrot.lane.b32.xlu1 %v3217_v5, %s7219_s15  ;;  %v2840_v19 = vsel %vm1067_vm12, %v2838_v35, %v2839_v38  ;;  %v2860_v26 = vadd.f32 %v6076_v63, %v6308_v53 }
 0x515   : > { %v3243_v29 = vsel %vm1067_vm12, %v3241_v16, %v3242_v32 }
 0x516   : > { %v1819_v24 = vpop.permute.xlu1 %1818  ;;  %v1806_v59 = vpop.permute.xlu0 %1805  ;;  %v1912_v20 = vstv %s6680_s9  ;;  %s3812_s9 = sshll.u32 %s3293_s2, 7 }
 0x517   : > { %v1808_v54 = vadd.f32 %v1806_v59, %v1795_v46  ;;  %v1913_v49 = vmul.f32 %v6568_v57, %v1912_v20  ;;  %v1914_v5 = vmul.f32 %v6643_v41, %v1912_v20 }
 0x518   : > { %2425 = vrot.lane.b32.xlu0 %v2424_v11, %s4377_s1  ;;  %2828 = vrot.lane.b32.xlu1 %v2827_v28, %s4377_s1 }
 0x519   : > { %v1821_v34 = vadd.f32 %v1819_v24, %v1808_v54  ;;  %v1917_v23 = vrot.slane %v1913_v49, 3  ;;  %v1918_v4 = vrot.slane %v1914_v5, 3 }
 0x51a   : > { %v1845_v25 = vpop.permute.xlu1 %1844  ;;  %v1832_v48 = vpop.permute.xlu0 %1831 }
 0x51b   : > { %v1834_v2 = vadd.f32 %v1832_v48, %v1821_v34  ;;  %v1919_v63 = vsel %vm985_vm11, %v1917_v23, %v1918_v4  ;;  %v2594_v4 = vstv %s3741_s22 }
 0x51c   : > { %3231 = vrot.lane.b32.xlu0 %v3230_v10, %s4377_s1  ;;  %2438 = vrot.lane.b32.xlu1 %v2437_v51, %s4378_s12  ;;  %s3680_s1 = sld [smem:[#allocation19 + $0x14]] }
 0x51d   : > { %v1847_v30 = vadd.f32 %v1845_v25, %v1834_v2 }
 0x51e   : > { %v1882_v42 = vpop.permute.xlu1 %1881  ;;  %v1869_v45 = vpop.permute.xlu0 %1868 }
 0x51f   : > { %v1858_v14 = vadd.f32 %v1856_v27, %v1847_v30 }
 0x520   : > { %2841 = vrot.lane.b32.xlu0 %v2840_v19, %s4378_s12  ;;  %3244 = vrot.lane.b32.xlu1 %v3243_v29, %s4378_s12  ;;  %s2040_s12 = sld [smem:[#allocation22]] }
 0x521   : > { %v1871_v6 = vadd.f32 %v1869_v45, %v1858_v14 }
 0x522   : > { %v1908_v61 = vpop.permute.xlu1 %1907  ;;  %v1895_v9 = vpop.permute.xlu0 %1894  ;;  %v1975_v24 = vstv %s3680_s1  ;;  %s7406_s1 = sld [smem:[#allocation42_spill]] }
 0x523   : > { %v1884_v39 = vadd.f32 %v1882_v42, %v1871_v6  ;;  %v1976_v28 = vmul.f32 %v6568_v57, %v1975_v24  ;;  %v1977_v1 = vmul.f32 %v6643_v41, %v1975_v24 }
 0x524   : > { %2863 = vrot.lane.b32.xlu0 %v2859_v13, %s7219_s15  ;;  %2865 = vrot.lane.b32.xlu1 %v2860_v26, %s7219_s15 }
 0x525   : > { %v1897_v43 = vadd.f32 %v1895_v9, %v1884_v39  ;;  %v1980_v7 = vrot.slane %v1976_v28, 4  ;;  %v1981_v8 = vrot.slane %v1977_v1, 4  ;;  %v6753_v1 = vld [vmem:[#allocation3 + $0x38] sm:$0xf] }
 0x526   : > { %v1945_v56 = vpop.permute.xlu1 %1944  ;;  %v1932_v46 = vpop.permute.xlu0 %1931  ;;  %v2041_v35 = vstv %s2040_s12 }
 0x527   : > { %v1910_v15 = vadd.f32 %v1908_v61, %v1897_v43  ;;  %v1982_v60 = vsel %vm1067_vm12, %v1980_v7, %v1981_v8  ;;  %v2191_v61 = vstv %s3701_s27  ;;  %s7407_s27 = sld [smem:[#allocation126_spill]] }
 0x528   : > { %3266 = vrot.lane.b32.xlu0 %v3262_v36, %s7219_s15  ;;  %3268 = vrot.lane.b32.xlu1 %v3263_v37, %s7219_s15  ;;  %s2037_s15 = sld [smem:[#allocation21]]  ;;  %v2192_v9 = vmul.f32 %v6599_v18, %v2191_v61  ;;  %v2193_v13 = vmul.f32 %v6583_v17, %v2191_v61  ;;  %v2595_v36 = vmul.f32 %v6618_v52, %v2594_v4  ;;  %p7409_p6 = scmp.ne.s32.totalorder %s7406_s1, 0 }
 0x529   : > { %v1921_v53 = vadd.f32 %v1919_v63, %v1910_v15  ;;  %v6745_v15 = vld [vmem:[#allocation3 + $0x28] sm:$0xf] }
 0x52a   : > { %v1971_v59 = vpop.permute.xlu1 %1970  ;;  %v1958_v11 = vpop.permute.xlu0 %1957  ;;  %v2196_v39 = vrot.slane %v2192_v9, 1  ;;  %v2197_v23 = vrot.slane %v2193_v13, 1  ;;  %v2596_v63 = vmul.f32 %v6745_v15, %v2594_v4  ;;  %v3060_v9 = vstv %s6760_s21 }
 0x52b   : > { %v1934_v40 = vadd.f32 %v1932_v46, %v1921_v53 }
 0x52c   : > { %v2198_v46 = vsel %vm821_vm9, %v2196_v39, %v2197_v23  ;;  %v3061_v39 = vmul.f32 %v6623_v58, %v3060_v9 }
 0x52d   : > { %v1947_v54 = vadd.f32 %v1945_v56, %v1934_v40  ;;  %v2200_v37 = vadd.f32 %v2198_v46, %v6592_v12  ;;  %v2599_v40 = vrot.slane %v2595_v36, 1  ;;  %v2600_v12 = vrot.slane %v2596_v63, 1  ;;  %s7408_s22 = smov %s7407_s27 }
 0x52e   : > { %v2008_v3 = vpop.permute.xlu1 %2007  ;;  %v1995_v47 = vpop.permute.xlu0 %1994  ;;  %v2038_v10 = vstv %s2037_s15  ;;  %v3062_v46 = vmul.f32 %v6753_v1, %v3060_v9  ;;  %v3065_v63 = vrot.slane %v3061_v39, 2 }
 0x52f   : > { %v1960_v33 = vadd.f32 %v1958_v11, %v1947_v54  ;;  %v2997_v11 = vstv %s3781_s18  ;;  %v2601_v8 = vsel %vm821_vm9, %v2599_v40, %v2600_v12  ;;  %s6883_s18 = scalar_lea.sflag [#allocation5], %s597_s8 }
 0x530   : > { %v2998_v28 = vmul.f32 %v6623_v58, %v2997_v11  ;;  %v2999_v54 = vmul.f32 %v6753_v1, %v2997_v11 }
 0x531   : > { %v1973_v0 = vadd.f32 %v1971_v59, %v1960_v33 }
 0x532   : > { %v2034_v34 = vpop.permute.xlu1 %2033  ;;  %v2021_v31 = vpop.permute.xlu0 %2020  ;;  %v3002_v33 = vrot.slane %v2998_v28, 1 }
 0x533   : > { %v1984_v44 = vadd.f32 %v1982_v60, %v1973_v0  ;;  %v2254_v0 = vstv %s3706_s24  ;;  %v2603_v60 = vadd.f32 %v2601_v8, %v6650_v21  ;;  %v2317_v8 = vstv %s3711_s19  ;;  %s4237_s24 = scalar_lea.vmem %s6866_s29, 1024 }
 0x534   : > { %p4238_p2 = scmp.ne.s32.totalorder %s6866_s29, %s4237_s24 }
 0x535   : > { %v1997_v55 = vadd.f32 %v1995_v47, %v1984_v44 }
 0x536   : > { %v2211_v57 = vpop.permute.xlu1 %2210  ;;  %v2224_v25 = vpop.permute.xlu0 %2223  ;;  %p4239_p5 = pnand %p4238_p2, %p7409_p6 }
 0x537   : > { %v2010_v48 = vadd.f32 %v2008_v3, %v1997_v55  ;;  %v2213_v59 = vadd.f32 %v2211_v57, %v2200_v37 }
 0x538   : > { %p4240_p7 = pneg %p4239_p5 }
 0x539   : > { %v2023_v41 = vadd.f32 %v2021_v31, %v2010_v48  ;;  %v2226_v47 = vadd.f32 %v2224_v25, %v2213_v59  ;;  %v3003_v31 = vrot.slane %v2999_v54, 1  ;;  %v2256_v25 = vmul.f32 %v6583_v17, %v2254_v0 }
 0x53a   : > { %v2237_v62 = vpop.permute.xlu1 %2236  ;;  %v6715_v2 = vpop.permute.xlu0 %2249 }
 0x53b   : > { %v2036_v51 = vadd.f32 %v2034_v34, %v2023_v41  ;;  %v2255_v34 = vmul.f32 %v6599_v18, %v2254_v0  ;;  %v2239_v57 = vadd.f32 %v2237_v62, %v2226_v47  ;;  %v2657_v41 = vstv %s3746_s20  ;;  %s4379_s20 = smov [#allocation24]  }
 0x53c   : > { %v2260_v13 = vrot.slane %v2256_v25, 2  ;;  %s4241_s21 = sshll.u32 %s4379_s20, 4  ;;  %s4242_s21 = int_to_ptr.vmem [resolvable:$false] %s4241_s21 }
 0x53d   : > { %v2039_v16 = vmul.f32 %v2038_v10, %v2036_v51  ;;  %v3004_v10 = vsel %vm821_vm9, %v3002_v33, %v3003_v31  ;;  %v2658_v51 = vmul.f32 %v6618_v52, %v2657_v41  ;;  %v2252_v62 = vadd.f32 %v6715_v2, %v2239_v57  ;;  %p4244_p9 = scmp.lt.s32.totalorder %s6866_s29, %s4242_s21 }
 0x53e   : > { %v6718_v30 = vpop.permute.xlu1 %2273  ;;  %v6720_v38 = vpop.permute.xlu0 %2286  ;;  %v2720_v33 = vstv %s3751_s25  ;;  %s4243_s25 = scalar_lea.vmem %s4242_s21, 2048 }
 0x53f   : > { %v2042_v32 = vadd.f32 %v2041_v35, %v2039_v16  ;;  %v3006_v35 = vadd.f32 %v3004_v10, %v6661_v22  ;;  %v2259_v16 = vrot.slane %v2255_v34, 2  ;;  %v2662_v23 = vrot.slane %v2658_v51, 2  ;;  %p4245_p11 = scmp.lt.s32.totalorder %s4243_s25, %s4237_s24 }
 0x540   : > { %v2721_v0 = vmul.f32 %v6618_v52, %v2720_v33  ;;  %v3123_v10 = vstv %s6790_s16 }
 0x541   : > { %v2068_v42 = vadd.f32 %v3688_v50, %v2042_v32  ;;  %v2659_v50 = vmul.f32 %v6745_v15, %v2657_v41  ;;  %v2261_v4 = vsel %vm903_vm10, %v2259_v16, %v2260_v13  ;;  %p4246_p13 = por %p4245_p11, %p4244_p9 }
 0x542   : > { %v6722_v27 = vpop.permute.xlu1 %3016  ;;  %v2614_v45 = vpop.permute.xlu0 %2613  ;;  %v2725_v51 = vrot.slane %v2721_v0, 3 }
 0x543   : > { %3689 = vst.msk [vmem:[%s6435_s3 + $0x20] sm:$0xff] %vm2070_vm13, %v2068_v42  ;;  %v2616_v48 = vadd.f32 %v2614_v45, %v2603_v60  ;;  %v3019_v45 = vadd.f32 %v6722_v27, %v3006_v35  ;;  %v2663_v36 = vrot.slane %v2659_v50, 2  ;;  %v2263_v27 = vadd.f32 %v2261_v4, %v2252_v62  ;;  %p4247_p8 = pnand %p4246_p13, %p4240_p7 }
 0x544   : > { %v2380_v4 = vstv %s6807_s23 }
 0x545   : > { %v2664_v59 = vsel %vm903_vm10, %v2662_v23, %v2663_v36  ;;  %v2276_v54 = vadd.f32 %v6718_v30, %v2263_v27  ;;  %v2722_v30 = vmul.f32 %v6745_v15, %v2720_v33  ;;  %v2381_v36 = vmul.f32 %v6599_v18, %v2380_v4 }
 0x546   : > { %v6726_v14 = vpop.permute.xlu1 %3029  ;;  %v2627_v19 = vpop.permute.xlu0 %2626 }
 0x547   : > { %v2629_v21 = vadd.f32 %v2627_v19, %v2616_v48  ;;  %v3032_v22 = vadd.f32 %v6726_v14, %v3019_v45  ;;  %v2289_v31 = vadd.f32 %v6720_v38, %v2276_v54  ;;  %v2319_v48 = vmul.f32 %v6583_v17, %v2317_v8 }
 0x54a   : > { %v6728_v29 = vpop.permute.xlu1 %3042  ;;  %v2640_v20 = vpop.permute.xlu0 %2639 }
 0x54b   : > { %v2642_v61 = vadd.f32 %v2640_v20, %v2629_v21  ;;  %v3045_v20 = vadd.f32 %v6728_v29, %v3032_v22  ;;  %v3124_v21 = vmul.f32 %v6623_v58, %v3123_v10 }
 0x54e   : > { %v6730_v49 = vpop.permute.xlu1 %3055  ;;  %v2653_v6 = vpop.permute.xlu0 %2652 }
 0x54f   : > { %v2655_v19 = vadd.f32 %v2653_v6, %v2642_v61  ;;  %v3058_v11 = vadd.f32 %v6730_v49, %v3045_v20  ;;  %v3066_v6 = vrot.slane %v3062_v46, 2  ;;  %v2318_v49 = vmul.f32 %v6599_v18, %v2317_v8 }
 0x551   : > { %v2666_v14 = vadd.f32 %v2664_v59, %v2655_v19  ;;  %v3067_v12 = vsel %vm903_vm10, %v3065_v63, %v3066_v6  ;;  %v2322_v35 = vrot.slane %v2318_v49, 3 }
 0x552   : > { %v6734_v26 = vpop.permute.xlu1 %3079  ;;  %v6736_v5 = vpop.permute.xlu0 %2676  ;;  %v3069_v47 = vadd.f32 %v3067_v12, %v3058_v11  ;;  %v2783_v11 = vstv %s6813_s17  ;;  %v3186_v12 = vstv %s6817_s13 }
 0x553   : > { %v2679_v29 = vadd.f32 %v6736_v5, %v2666_v14  ;;  %v2382_v14 = vmul.f32 %v6583_v17, %v2380_v4  ;;  %v3187_v18 = vmul.f32 %v6623_v58, %v3186_v12  ;;  %v3188_v17 = vmul.f32 %v6753_v1, %v3186_v12 }
 0x554   : > { %v3082_v41 = vadd.f32 %v6734_v26, %v3069_v47  ;;  %v2726_v26 = vrot.slane %v2722_v30, 3  ;;  %v2785_v47 = vmul.f32 %v6745_v15, %v2783_v11 }
 0x556   : > { %v6738_v43 = vpop.permute.xlu1 %3092  ;;  %v6740_v56 = vpop.permute.xlu0 %2689  ;;  %v2727_v61 = vsel %vm985_vm11, %v2725_v51, %v2726_v26 }
 0x557   : > { %v2692_v57 = vadd.f32 %v6740_v56, %v2679_v29  ;;  %v3095_v56 = vadd.f32 %v6738_v43, %v3082_v41  ;;  %v3128_v43 = vrot.slane %v3124_v21, 3  ;;  %v2385_v29 = vrot.slane %v2381_v36, 4 }
 0x55a   : > { %v6748_v53 = vpop.permute.xlu1 %2702  ;;  %v6750_v24 = vpop.permute.xlu0 %2299 }
 0x55b   : > { %v2705_v5 = vadd.f32 %v6748_v53, %v2692_v57  ;;  %v2302_v25 = vadd.f32 %v6750_v24, %v2289_v31  ;;  %v2323_v53 = vrot.slane %v2319_v48, 3  ;;  %v3125_v24 = vmul.f32 %v6753_v1, %v3123_v10 }
 0x55c   : > { %v3191_v57 = vrot.slane %v3187_v18, 4 }
 0x55d   : > { %v2324_v9 = vsel %vm985_vm11, %v2322_v35, %v2323_v53  ;;  %v3129_v22 = vrot.slane %v3125_v24, 3 }
 0x55e   : > { %v6756_v3 = vpop.permute.xlu1 %2312  ;;  %v6758_v7 = vpop.permute.xlu0 %3105 }
 0x55f   : > { %v2315_v50 = vadd.f32 %v6756_v3, %v2302_v25  ;;  %v3108_v45 = vadd.f32 %v6758_v7, %v3095_v56  ;;  %v3130_v7 = vsel %vm985_vm11, %v3128_v43, %v3129_v22  ;;  %v2443_v56 = vstv %s3721_s4 }
 0x561   : > { %v2326_v23 = vadd.f32 %v2324_v9, %v2315_v50 }
 0x562   : > { %v6765_v44 = vpop.permute.xlu1 %3118  ;;  %v6767_v55 = vpop.permute.xlu0 %2715 }
 0x563   : > { %v2718_v62 = vadd.f32 %v6767_v55, %v2705_v5  ;;  %v3121_v55 = vadd.f32 %v6765_v44, %v3108_v45  ;;  %v2784_v44 = vmul.f32 %v6618_v52, %v2783_v11  ;;  %v2386_v52 = vrot.slane %v2382_v14, 4 }
 0x564   : > { %v2446_v45 = vstv %s6838_s0 }
 0x565   : > { %v2729_v39 = vadd.f32 %v2727_v61, %v2718_v62  ;;  %v3132_v59 = vadd.f32 %v3130_v7, %v3121_v55  ;;  %v2788_v49 = vrot.slane %v2784_v44, 4  ;;  %v3252_v7 = vstv %s6845_s11 }
 0x566   : > { %v6774_v32 = vpop.permute.xlu1 %2739  ;;  %v6776_v42 = vpop.permute.xlu0 %2336 }
 0x567   : > { %v2339_v19 = vadd.f32 %v6776_v42, %v2326_v23  ;;  %v2742_v20 = vadd.f32 %v6774_v32, %v2729_v39  ;;  %v2846_v39 = vstv %s6843_s7 }
 0x56a   : > { %v2350_v37 = vpop.permute.xlu1 %2349  ;;  %v6785_v2 = vpop.permute.xlu0 %3142 }
 0x56b   : > { %v2352_v63 = vadd.f32 %v2350_v37, %v2339_v19  ;;  %v3145_v6 = vadd.f32 %v6785_v2, %v3132_v59  ;;  %v3768_v59 = vld [vmem:[%s7393_s26 + $0x94] sm:$0xff] }
 0x56e   : > { %v6792_v28 = vpop.permute.xlu1 %3155  ;;  %v2753_v40 = vpop.permute.xlu0 %2752 }
 0x56f   : > { %v2755_v54 = vadd.f32 %v2753_v40, %v2742_v20  ;;  %v3158_v32 = vadd.f32 %v6792_v28, %v3145_v6  ;;  %v2789_v40 = vrot.slane %v2785_v47, 4  ;;  %v3192_v28 = vrot.slane %v3188_v17, 4 }
 0x571   : > { %v2790_v41 = vsel %vm1067_vm12, %v2788_v49, %v2789_v40  ;;  %v3193_v1 = vsel %vm1067_vm12, %v3191_v57, %v3192_v28 }
 0x572   : > { %v2766_v60 = vpop.permute.xlu1 %2765  ;;  %v2363_v34 = vpop.permute.xlu0 %2362 }
 0x573   : > { %v2365_v42 = vadd.f32 %v2363_v34, %v2352_v63  ;;  %v2768_v37 = vadd.f32 %v2766_v60, %v2755_v54  ;;  %v2387_v34 = vsel %vm1067_vm12, %v2385_v29, %v2386_v52  ;;  %v3808_v63 = vld [vmem:[%s7393_s26 + $0xac] sm:$0xff] }
 0x576   : > { %v2376_v38 = vpop.permute.xlu1 %2375  ;;  %v3169_v16 = vpop.permute.xlu0 %3168 }
 0x577   : > { %v2378_v0 = vadd.f32 %v2376_v38, %v2365_v42  ;;  %v3171_v31 = vadd.f32 %v3169_v16, %v3158_v32 }
 0x579   : > { %v2389_v58 = vadd.f32 %v2387_v34, %v2378_v0 }
 0x57a   : > { %v3182_v3 = vpop.permute.xlu1 %3181  ;;  %v2779_v13 = vpop.permute.xlu0 %2778 }
 0x57b   : > { %v2781_v2 = vadd.f32 %v2779_v13, %v2768_v37  ;;  %v3184_v48 = vadd.f32 %v3182_v3, %v3171_v31  ;;  %v3728_v3 = vld [vmem:[%s7393_s26 + $0x7c] sm:$0xff]  ;;  %v3249_v13 = vstv %s6841_s5  ;;  %s6871_s26 = scalar_lea.hbm %s7407_s27, %s3812_s9 }
 0x57d   : > { %v2792_v60 = vadd.f32 %v2790_v41, %v2781_v2  ;;  %v3195_v35 = vadd.f32 %v3193_v1, %v3184_v48 }
 0x57e   : > { %v2803_v46 = vpop.permute.xlu1 %2802  ;;  %v2400_v27 = vpop.permute.xlu0 %2399 }
 0x57f   : > { %v2402_v5 = vadd.f32 %v2400_v27, %v2389_v58  ;;  %v2805_v21 = vadd.f32 %v2803_v46, %v2792_v60  ;;  %v2849_v46 = vstv %s6847_s28 }
 0x582   : > { %v2413_v33 = vpop.permute.xlu1 %2412  ;;  %v3206_v8 = vpop.permute.xlu0 %3205 }
 0x583   : > { %v2415_v51 = vadd.f32 %v2413_v33, %v2402_v5  ;;  %v3208_v38 = vadd.f32 %v3206_v8, %v3195_v35 }
 0x586   : > { %v3219_v15 = vpop.permute.xlu1 %3218  ;;  %v2816_v30 = vpop.permute.xlu0 %2815 }
 0x587   : > { %v3221_v26 = vadd.f32 %v3219_v15, %v3208_v38  ;;  %v2818_v53 = vadd.f32 %v2816_v30, %v2805_v21 }
 0x58a   : > { %v2829_v25 = vpop.permute.xlu1 %2828  ;;  %v2426_v10 = vpop.permute.xlu0 %2425 }
 0x58b   : > { %v2428_v16 = vadd.f32 %v2426_v10, %v2415_v51  ;;  %v2831_v61 = vadd.f32 %v2829_v25, %v2818_v53 }
 0x58e   : > { %v2439_v50 = vpop.permute.xlu1 %2438  ;;  %v3232_v62 = vpop.permute.xlu0 %3231 }
 0x58f   : > { %v2441_v24 = vadd.f32 %v2439_v50, %v2428_v16  ;;  %v3234_v43 = vadd.f32 %v3232_v62, %v3221_v26 }
 0x591   : > { %v2444_v9 = vmul.f32 %v2443_v56, %v2441_v24 }
 0x592   : > { %v3245_v55 = vpop.permute.xlu1 %3244  ;;  %v2842_v23 = vpop.permute.xlu0 %2841 }
 0x593   : > { %v2447_v22 = vadd.f32 %v2446_v45, %v2444_v9  ;;  %v3247_v19 = vadd.f32 %v3245_v55, %v3234_v43  ;;  %v2844_v4 = vadd.f32 %v2842_v23, %v2831_v61 }
 0x595   : > { %v2472_v36 = vadd.f32 %v3728_v3, %v2447_v22  ;;  %v3250_v27 = vmul.f32 %v3249_v13, %v3247_v19  ;;  %v2847_v20 = vmul.f32 %v2846_v39, %v2844_v4 }
 0x596   : > { %v2866_v11 = vpop.permute.xlu1 %2865  ;;  %v2864_v44 = vpop.permute.xlu0 %2863 }
 0x597   : > { %3729 = vst.msk [vmem:[%s6435_s3 + $0x28] sm:$0xff] %vm2070_vm13, %v2472_v36  ;;  %v3253_v14 = vadd.f32 %v3252_v7, %v3250_v27  ;;  %v2850_v6 = vadd.f32 %v2849_v46, %v2847_v20 }
 0x598   : > { %3766 = vst.msk [vmem:[%s6435_s3 + $0x16] sm:$0x3] %vm2063_vm7, %v2866_v11 }
 0x599   : > { %3765 = vst.msk [vmem:[%s6435_s3 + $0xe] sm:$0xfc] %vm2061_vm8, %v2864_v44  ;;  %v3278_v54 = vadd.f32 %v3808_v63, %v3253_v14  ;;  %v2875_v42 = vadd.f32 %v3768_v59, %v2850_v6 }
 0x59a   : > { %v3269_v12 = vpop.permute.xlu1 %3268  ;;  %v3267_v47 = vpop.permute.xlu0 %3266 }
 0x59b   : > { %3809 = vst.msk [vmem:[%s6435_s3 + $0x38] sm:$0xff] %vm2070_vm13, %v3278_v54  ;;  %3769 = vst.msk [vmem:[%s6435_s3 + $0x30] sm:$0xff] %vm2070_vm13, %v2875_v42 }
 0x59c   : > { %3806 = vst.msk [vmem:[%s6435_s3 + $0x1e] sm:$0x3] %vm2063_vm7, %v3269_v12 }
 0x59d   : > { %3805 = vst.msk [vmem:[%s6435_s3 + $0x16] sm:$0xfc] %vm2061_vm8, %v3267_v47 }
 0x59e   : > { %4250 = shalt.err (!%p4247_p8)
}
 0x59f   : > { %s4251_s30 = scalar_lea.hbm %s6871_s26, 1024  ;;  %s4255_s19 = scalar_lea.hbm %s7408_s22, 4096 }
 0x5a0   : > { %p4252_p3 = scmp.ne.s32.totalorder %s6871_s26, %s4251_s30  ;;  %p4256_p1 = scmp.lt.u32.totalorder %s6871_s26, %s7408_s22 }
 0x5a1   : > { %p4257_p4 = scmp.lt.u32.totalorder %s4255_s19, %s4251_s30  ;;  %p4259_p2 = scmp.lt.u32.totalorder %s4251_s30, %s6871_s26 }
 0x5a2   : > { %p4253_p10 = pnand %p4252_p3, %p7409_p6 }
 0x5a3   : > { %p4258_p0 = por %p4257_p4, %p4256_p1 }
 0x5a4   : > { %p4254_p12 = pneg %p4253_p10 }
 0x5a5   : > { %p4260_p5 = por %p4259_p2, %p4258_p0 }
 0x5a7   : > { %p4261_p7 = pnand %p4260_p5, %p4254_p12 }
 0x5a9   : > { %4264 = shalt.err (!%p4261_p7)
}
 0x5aa   : > { %s4380_s17 = smov 128   ;;  %s4381_s13 = smov 256  }
 0x5ab   : > { %s4382_s4 = smov 8  }
 0x5ac   : > { %3864 = dma.vmem_to_hbm [thread:$0]  (%p7409_p6), %s6866_s29, 1024, %s6871_s26, %s6883_s18, %s4380_s17, %s4381_s13, %s4382_s4  }
 0x5ad PF: > { %s7410_s0 = sld [smem:[#allocation40_spill]]  ;;  %s7411_s10 = sld [smem:[#allocation33_spill]] }
 0x5ae   : > { %s7412_s5 = sld [smem:[#allocation44_spill]] }
 0x5b3   : > { %p3931_p9 = scmp.ge.s32.totalorder %s7410_s0, 2  ;;  %s3311_s7 = sand.u32 1, %s7411_s10  }
 0x5b4   : > { %p7413_p11 = scmp.ne.s32.totalorder %s7412_s5, 0  ;;  %s3312_s11 = scalar_lea.sflag [#allocation5], %s3311_s7 }
 0x5b6   : > { %p3904_p13 = pnand %p3931_p9, %p7413_p11 }
 0x5b8   : > { %4326 = dma.done.wait (!%p3904_p13), %s3312_s11, 1024  }
 0x5b9   : > { %4328 = vsyncadd (!%p3904_p13), %s3312_s11, 4294966272  ;;  %s33_s15 = sadd.s32 1, %s7410_s0   ;;  %s7414_s25 = sld [smem:[#allocation34_spill]] }
 0x5ba   : > { %p30_p8 = scmp.ge.s32.totalorder %s33_s15, 6   ;;  %s7415_s26 = sld [smem:[#allocation35_spill]] }
 0x5bb   : > { %s7416_s27 = sld [smem:[#allocation45_spill]]  ;;  %s7417_s28 = sld [smem:[#allocation38_spill]] }
 0x5bc   : > { %s7418_s29 = sld [smem:[#allocation39_spill]]  ;;  %s7419_s30 = sld [smem:[#allocation41_spill]] }
 0x5bd   : > { %s7420_s14 = sld [smem:[#allocation43_spill]]  ;;  %32 = sbr.rel (!%p30_p8) target bundleno = 27 (0x1b), region = 183 }
 0x5c4   :  { %3317 = vsyncpa [#allocation5], 1 }
 0x5c5   :  { %3319 = vsyncpa [#allocation5 + $0x1], 1 }
 0x5c6   :  { %3320 = vsyncpa [#allocation6], 1 }
 0x5c7   :  { %3322 = vsyncpa [#allocation6 + $0x1], 1 }
 0x5c8   :  { %3323 = vsyncpa [#allocation8], 1 }
 0x5c9   :  { %3324 = vsyncpa [#allocation11], 1 }
 0x5ca   :  { %3325 = vsyncpa [#allocation14], 1 }
 0x5cb   :  { %3326 = vsyncpa [#allocation17], 1 }
 0x5cc   :  { %3327 = vsyncpa [#allocation20], 1 }
 0x5cd   :  { %3328 = vsyncpa [#allocation23], 1 }

</bundles_post_ra>
